<compile_context>
chip_gen: v7x
topology: tpu7x:2x2x1
jax: 0.10.0
libtpu: 0.0.40
codegen_flags: <defaults>
</compile_context>

<pallas_src>
import jax
import jax.numpy as jnp
from jax.experimental import pallas as pl
from jax.experimental.pallas import tpu as pltpu

_VMEM_LIMIT = 64 * 1024 * 1024  # explicit budget (<= v7x physical 64 MiB per TC)


# ----------------------------------------------------------------------------
# Fused LSTM gate helper (weights laid out (In, 4H) / (H, 4H), order i,f,g,o)
# ----------------------------------------------------------------------------
def _lstm_gates(g, c, H):
    i = jax.nn.sigmoid(g[:, 0 * H:1 * H])
    f = jax.nn.sigmoid(g[:, 1 * H:2 * H])
    gg = jnp.tanh(g[:, 2 * H:3 * H])
    o = jax.nn.sigmoid(g[:, 3 * H:4 * H])
    c_new = f * c + i * gg
    return o * jnp.tanh(c_new), c_new


# ----------------------------------------------------------------------------
# Conv2d(k=3, s=1, p=1) as 9 shifted matmuls accumulated in-kernel (no im2col)
# ----------------------------------------------------------------------------
def _conv3x3_kernel(x_ref, w_ref, b_ref, o_ref):
    # x_ref: (1, H+2, W+2, C)  w_ref: (9, C, Co)  b_ref: (1, Co)  o_ref: (1, H*W, Co)
    Hp, Wp, C = x_ref.shape[1], x_ref.shape[2], x_ref.shape[3]
    H, W = Hp - 2, Wp - 2
    Co = o_ref.shape[2]
    x = x_ref[0]                                             # (H+2, W+2, C)
    acc = jnp.zeros((H * W, Co), jnp.float32)
    for kh in range(3):
        for kw in range(3):
            patch = x[kh:kh + H, kw:kw + W, :].reshape(H * W, C)
            acc = acc + jnp.dot(patch, w_ref[kh * 3 + kw],
                                preferred_element_type=jnp.float32)
    o_ref[0] = acc + b_ref[...]


def conv3x3_key(feat_nchw, w, b):
    """Attention key conv.  Returns (B, H*W, Co)."""
    B, C, H, W = feat_nchw.shape
    Co = w.shape[0]
    x = jnp.transpose(feat_nchw, (0, 2, 3, 1))               # (B, H, W, C)
    xpad = jnp.pad(x, ((0, 0), (1, 1), (1, 1), (0, 0)))      # 1px halo, not 9x im2col
    wk = jnp.transpose(w, (2, 3, 1, 0)).reshape(9, C, Co)    # (kh, kw, C, Co) flat
    return pl.pallas_call(
        _conv3x3_kernel,
        out_shape=jax.ShapeDtypeStruct((B, H * W, Co), jnp.float32),
        grid=(B,),
        in_specs=[
            pl.BlockSpec((1, H + 2, W + 2, C), lambda i: (i, 0, 0, 0)),
            pl.BlockSpec((9, C, Co), lambda i: (0, 0, 0)),
            pl.BlockSpec((1, Co), lambda i: (0, 0)),
        ],
        out_specs=pl.BlockSpec((1, H * W, Co), lambda i: (i, 0, 0)),
        compiler_params=pltpu.CompilerParams(
            dimension_semantics=("parallel",),
            vmem_limit_bytes=_VMEM_LIMIT),
    )(xpad, wk, b.reshape(1, Co))


# ----------------------------------------------------------------------------
# Encoder: 2-layer LSTM over W + final Linear, in ONE kernel.
# Layer-0 input projection hoisted to a single big-M matmul before the loop.
# ----------------------------------------------------------------------------
def _encoder_kernel(x_ref, wih0_ref, whh0_ref, b0_ref, wcat1_ref, b1_ref,
                    linw_ref, linb_ref, out_ref, g0_scr):
    # x_ref: (W, B, C) -- H max-pool already applied on host; channels on lanes.
    Ww, B, C = x_ref.shape
    H = whh0_ref.shape[0]

    # Hoisted layer-0 input projection: ONE (W*B, C)@(C, 4H) MXU matmul.
    x_all = x_ref[...].reshape(Ww * B, C)
    g0_scr[...] = (jnp.dot(x_all, wih0_ref[...], preferred_element_type=jnp.float32)
                   + b0_ref[...]).reshape(Ww, B, 4 * H)

    Whh0 = whh0_ref[...]
    Wcat1 = wcat1_ref[...]       # fused [x|h] weight for layer 1: (2H, 4H)
    Bb1 = b1_ref[...]
    zeros = jnp.zeros((B, H), jnp.float32)

    def step(t, carry):
        h0, c0, h1, c1 = carry
        g0 = g0_scr[t] + jnp.dot(h0, Whh0, preferred_element_type=jnp.float32)
        h0, c0 = _lstm_gates(g0, c0, H)
        g1 = (jnp.dot(jnp.concatenate([h0, h1], axis=-1), Wcat1,
                      preferred_element_type=jnp.float32) + Bb1)
        h1, c1 = _lstm_gates(g1, c1, H)
        return h0, c0, h1, c1

    # Full unroll only for small W; modest unroll otherwise to bound vreg spill.
    unroll = True if Ww <= 16 else 2
    _, _, h1, _ = jax.lax.fori_loop(0, Ww, step, (zeros, zeros, zeros, zeros),
                                    unroll=unroll)
    # valid_hf = last time step (targets=None path), then the encoder Linear.
    out_ref[...] = (jnp.dot(h1, linw_ref[...], preferred_element_type=jnp.float32)
                    + linb_ref[...])


def encoder_forward(feat_nchw, p):
    B, C, Hh, Ww = feat_nchw.shape
    enc_dim = p["enc_lin_w"].shape[0]
    # H max-pool hoisted to host (cuts kernel input DMA by H x).
    feat_v = jnp.transpose(jnp.max(feat_nchw, axis=2), (2, 0, 1))   # (W, B, C)
    wih0, whh0, b0 = p["enc_lstm0"]
    wih1, whh1, b1 = p["enc_lstm1"]
    wcat1 = jnp.concatenate([wih1, whh1], axis=0)                   # (2H, 4H)
    return pl.pallas_call(
        _encoder_kernel,
        out_shape=jax.ShapeDtypeStruct((B, enc_dim), jnp.float32),
        scratch_shapes=[pltpu.VMEM((Ww, B, 4 * enc_dim), jnp.float32)],
        compiler_params=pltpu.CompilerParams(vmem_limit_bytes=_VMEM_LIMIT),
    )(feat_v, wih0, whh0, b0, wcat1, b1,
      p["enc_lin_w"], p["enc_lin_b"].reshape(1, -1))


# ----------------------------------------------------------------------------
# Decoder: whole greedy autoregressive loop in ONE kernel (state carried),
# lane-dense (128-padded) prediction head, batch grid ("parallel").
# ----------------------------------------------------------------------------
def _decode_kernel(feat_ref, key_ref, enc_ref, start_ref, emb_ref,
                   wcat0_ref, b0_ref, wcat1_ref, b1_ref,
                   wq_ref, bq_ref, w2_ref, b2_ref,
                   wpy_ref, wpa_ref, wph_ref, bp_ref,
                   out_ref):
    # feat_ref: (B, HW, C)   key_ref: (B, HW, d_k)   enc_ref/start_ref: (B, E)
    # emb_ref:  (n_cls, E)   out_ref: (T, B, n_pad)  (n_pad = lane-padded classes)
    B = enc_ref.shape[0]
    H = wcat0_ref.shape[1] // 4
    T = out_ref.shape[0]
    n_pad = out_ref.shape[2]
    n_cls = emb_ref.shape[0]

    feat = feat_ref[...]
    key = key_ref[...]
    enc = enc_ref[...]
    emb = emb_ref[...]
    Wcat0 = wcat0_ref[...]        # fused [x|h] weights (2E, 4H)
    Bb0 = b0_ref[...]
    Wcat1 = wcat1_ref[...]
    Bb1 = b1_ref[...]
    Wq = wq_ref[...]
    Bq = bq_ref[...]
    W2 = w2_ref[...]              # (1, 1, d_k)
    B2 = b2_ref[...]              # (1, 1)
    Wpy = wpy_ref[...]            # (E, n_pad)
    Wpa = wpa_ref[...]            # (C, n_pad)

    def lstm_cell(x, h, c, Wcat, Bg):
        g = (jnp.dot(jnp.concatenate([x, h], axis=-1), Wcat,
                     preferred_element_type=jnp.float32) + Bg)
        return _lstm_gates(g, c, H)

    zeros = jnp.zeros((B, H), jnp.float32)
    # position 0 of the decoder input is the holistic (encoder) feature
    h0, c0 = lstm_cell(enc, zeros, zeros, Wcat0, Bb0)
    h1, c1 = lstm_cell(h0, zeros, zeros, Wcat1, Bb1)

    # time-invariant holistic slice of the prediction head, hoisted out of the loop
    hterm = jnp.dot(enc, wph_ref[...], preferred_element_type=jnp.float32) + bp_ref[...]

    def step(i, carry):
        h0, c0, h1, c1, x = carry
        h0, c0 = lstm_cell(x, h0, c0, Wcat0, Bb0)
        h1, c1 = lstm_cell(h0, h1, c1, Wcat1, Bb1)
        y = h1                                                       # (B, E)

        # --- 2-D attention (lane-dense (B, HW) softmax) ---
        q = jnp.dot(y, Wq, preferred_element_type=jnp.float32) + Bq  # (B, d_k)
        # TODO(synk): on v6e/v7x compute this tanh in bf16 (keep f32 on v5e).
        e = jnp.tanh(key + q[:, None, :])                            # (B, HW, d_k)
        score = jnp.sum(e * W2, axis=-1) + B2                        # (B, HW)
        m = jnp.max(score, axis=-1, keepdims=True)
        pexp = jnp.exp(score - m)
        pw = pexp / jnp.sum(pexp, axis=-1, keepdims=True)            # softmax over HW
        # VPU weighted sum instead of an M=1 MXU context matmul
        ctx = jnp.sum(pw[:, :, None] * feat, axis=1)                 # (B, C)

        # --- split prediction head (pred_concat=True): y | ctx | holistic ---
        logits = (jnp.dot(y, Wpy, preferred_element_type=jnp.float32)
                  + jnp.dot(ctx, Wpa, preferred_element_type=jnp.float32)
                  + hterm)                                           # (B, n_pad)
        lm = jnp.max(logits, axis=-1, keepdims=True)
        le = jnp.exp(logits - lm)                                    # padded lanes -> 0
        probs = le / jnp.sum(le, axis=-1, keepdims=True)
        out_ref[i] = probs                                           # lane-dense store

        # --- greedy next-token embedding via one-hot MXU matmul (exact gather) ---
        iota_p = jax.lax.broadcasted_iota(jnp.int32, (B, n_pad), 1)
        pm = jnp.max(probs, axis=-1, keepdims=True)
        idx = jnp.min(jnp.where(probs >= pm, iota_p, n_pad),
                      axis=-1, keepdims=True)                        # first argmax
        iota_c = jax.lax.broadcasted_iota(jnp.int32, (B, n_cls), 1)
        onehot = (iota_c == idx).astype(jnp.float32)                 # (B, n_cls)
        x_next = jnp.dot(onehot, emb, preferred_element_type=jnp.float32)  # (B, E)
        return h0, c0, h1, c1, x_next

    jax.lax.fori_loop(0, T, step, (h0, c0, h1, c1, start_ref[...]))


def decoder_forward_test(feat_nchw, out_enc, p, max_seq_len, num_classes,
                         batch_tile=None):
    B, C, Hh, Ww = feat_nchw.shape
    HW = Hh * Ww
    enc_dim = out_enc.shape[-1]
    n_pred = num_classes - 1
    n_pad = ((n_pred + 127) // 128) * 128          # lane-dense prediction width
    start_idx = num_classes - 2
    T = max_seq_len
    n_cls = num_classes

    # time-invariant attention key (conv3x3 over the feature map), flattened HW
    key_flat = conv3x3_key(feat_nchw, p["w_k"], p["b_k"])            # (B, HW, d_k)
    d_k = key_flat.shape[-1]
    feat_flat = jnp.transpose(feat_nchw, (0, 2, 3, 1)).reshape(B, HW, C)
    start_emb = jnp.broadcast_to(p["embedding"][start_idx][None, :], (B, enc_dim))

    # fused [x|h] decoder LSTM gate weights
    wih0, whh0, b0 = p["dec_lstm0"]
    wih1, whh1, b1 = p["dec_lstm1"]
    wcat0 = jnp.concatenate([wih0, whh0], axis=0)                    # (2E, 4H)
    wcat1 = jnp.concatenate([wih1, whh1], axis=0)

    # lane-pad the prediction head to n_pad (padded logits = -1e30 -> exact softmax)
    padw = lambda w: jnp.pad(w, ((0, 0), (0, n_pad - n_pred)))
    wpy, wpa, wph = padw(p["w_pred_y"]), padw(p["w_pred_a"]), padw(p["w_pred_h"])
    bp = jnp.pad(p["b_pred"], (0, n_pad - n_pred),
                 constant_values=-1e30).reshape(1, n_pad)

    # batch grid axis: bt < B splits work across v7x's 2 TensorCores.
    bt = B if batch_tile is None else batch_tile
    assert B % bt == 0

    probs_tbn = pl.pallas_call(
        _decode_kernel,
        out_shape=jax.ShapeDtypeStruct((T, B, n_pad), jnp.float32),
        grid=(B // bt,),
        in_specs=[
            pl.BlockSpec((bt, HW, C), lambda b: (b, 0, 0)),
            pl.BlockSpec((bt, HW, d_k), lambda b: (b, 0, 0)),
            pl.BlockSpec((bt, enc_dim), lambda b: (b, 0)),
            pl.BlockSpec((bt, enc_dim), lambda b: (b, 0)),
            pl.BlockSpec((n_cls, enc_dim), lambda b: (0, 0)),
            pl.BlockSpec((2 * enc_dim, 4 * enc_dim), lambda b: (0, 0)),
            pl.BlockSpec((1, 4 * enc_dim), lambda b: (0, 0)),
            pl.BlockSpec((2 * enc_dim, 4 * enc_dim), lambda b: (0, 0)),
            pl.BlockSpec((1, 4 * enc_dim), lambda b: (0, 0)),
            pl.BlockSpec((enc_dim, d_k), lambda b: (0, 0)),
            pl.BlockSpec((1, d_k), lambda b: (0, 0)),
            pl.BlockSpec((1, 1, d_k), lambda b: (0, 0, 0)),
            pl.BlockSpec((1, 1), lambda b: (0, 0)),
            pl.BlockSpec((enc_dim, n_pad), lambda b: (0, 0)),
            pl.BlockSpec((C, n_pad), lambda b: (0, 0)),
            pl.BlockSpec((enc_dim, n_pad), lambda b: (0, 0)),
            pl.BlockSpec((1, n_pad), lambda b: (0, 0)),
        ],
        out_specs=pl.BlockSpec((T, bt, n_pad), lambda b: (0, b, 0)),
        compiler_params=pltpu.CompilerParams(
            dimension_semantics=("parallel",),
            vmem_limit_bytes=_VMEM_LIMIT),
    )(feat_flat, key_flat, out_enc, start_emb, p["embedding"],
      wcat0, b0, wcat1, b1,
      p["w_q"], p["b_q"].reshape(1, -1),
      p["w2"].reshape(1, 1, -1), p["b2"].reshape(1, 1),
      wpy, wpa, wph, bp)
    # TODO(synk): valid_ratios spatial masking of attn weights is skipped (targets=None path).
    return jnp.transpose(probs_tbn[:, :, :n_pred], (1, 0, 2))        # (B, T, n_pred)


def sar_head_forward(feat_nchw, params, max_text_length, num_classes):
    holistic_feat = encoder_forward(feat_nchw, params)
    return decoder_forward_test(
        feat_nchw, holistic_feat, params, max_text_length, num_classes
    )


# ----------------------------------------------------------------------------
# Deterministic parameter init (synthetic, matches PyTorch module shapes;
# LSTM weights stored in fused-gate layout (In, 4H)/(H, 4H), order i,f,g,o;
# prediction weight split by concat blocks [y | attn_feat | holistic]).
# ----------------------------------------------------------------------------
def init_params(key, d_model, enc_dim, d_k, num_classes):
    keys = iter(jax.random.split(key, 32))

    def rnd(shape, scale=0.1):
        return (scale * jax.random.normal(next(keys), shape)).astype(jnp.float32)

    def lstm_params(in_dim, hid):
        # fused wih (In, 4H), whh (H, 4H), combined bias b_ih + b_hh (1, 4H)
        return (rnd((in_dim, 4 * hid)), rnd((hid, 4 * hid)), rnd((1, 4 * hid)))

    padding_idx = num_classes - 1
    embedding = rnd((num_classes, enc_dim), scale=1.0)
    embedding = embedding.at[padding_idx].set(0.0)   # nn.Embedding padding_idx row

    return {
        # encoder
        "enc_lstm0": lstm_params(d_model, enc_dim),
        "enc_lstm1": lstm_params(enc_dim, enc_dim),
        "enc_lin_w": rnd((enc_dim, enc_dim)),
        "enc_lin_b": rnd((enc_dim,)),
        # decoder
        "dec_lstm0": lstm_params(enc_dim, enc_dim),
        "dec_lstm1": lstm_params(enc_dim, enc_dim),
        "w_q": rnd((enc_dim, d_k)),          # conv1x1_1 (Linear enc_dim -> d_k)
        "b_q": rnd((d_k,)),
        "w_k": rnd((d_k, d_model, 3, 3)),    # conv3x3_1
        "b_k": rnd((d_k,)),
        "w2": rnd((d_k,)),                   # conv1x1_2 (Linear d_k -> 1)
        "b2": rnd((1,)),
        "embedding": embedding,
        "w_pred_y": rnd((enc_dim, num_classes - 1)),
        "w_pred_a": rnd((d_model, num_classes - 1)),
        "w_pred_h": rnd((enc_dim, num_classes - 1)),
        "b_pred": rnd((num_classes - 1,)),
    }


# ----------------------------------------------------------------------------
if __name__ == "__main__":
    B, C, Hh, Ww = 2, 32, 4, 8          # feat: (batch, in_channels, H, W)
    enc_dim, d_k = 32, 16
    num_classes = 10                    # out_channels
    max_text_length = 5

    key = jax.random.PRNGKey(0)
    kf, kp = jax.random.split(key)
    feat = jax.random.normal(kf, (B, C, Hh, Ww), dtype=jnp.float32)
    params = init_params(kp, C, enc_dim, d_k, num_classes)

    fwd = jax.jit(sar_head_forward, static_argnums=(2, 3))
    out = fwd(feat, params, max_text_length, num_classes)
    out = jax.block_until_ready(out)
    assert out.shape == (B, max_text_length, num_classes - 1)
    assert bool(jnp.all(jnp.isfinite(out)))
    print("KERNEL_OK")
</pallas_src>

<mosaic_0001>
module attributes {stable_mosaic.version = 11 : i64} {
  func.func @_conv3x3_kernel(%arg0: i32, %arg1: memref<1x6x10x32xf32, #tpu.memory_space<vmem>>, %arg2: memref<9x32x16xf32, #tpu.memory_space<vmem>>, %arg3: memref<1x16xf32, #tpu.memory_space<vmem>>, %arg4: memref<1x32x16xf32, #tpu.memory_space<vmem>>) attributes {dimension_semantics = [#tpu.dimension_semantics<parallel>], iteration_bounds = array<i64: 2>, scalar_prefetch = 0 : i64, scratch_operands = 0 : i64, tpu.core_type = #tpu.core_type<tc>, window_params = [{transform_indices = @transform_0, window_bounds = array<i64: 1, 6, 10, 32>}, {pipeline_mode = #tpu.pipeline_mode<synchronous>, transform_indices = @transform_1, window_bounds = array<i64: 9, 32, 16>}, {pipeline_mode = #tpu.pipeline_mode<synchronous>, transform_indices = @transform_2, window_bounds = array<i64: 1, 16>}, {transform_indices = @transform_3, window_bounds = array<i64: 1, 32, 16>}]} {
    %c0 = arith.constant 0 : index
    %c0_0 = arith.constant 0 : index
    %c0_1 = arith.constant 0 : index
    %c0_2 = arith.constant 0 : index
    %0 = vector.load %arg1[%c0, %c0_0, %c0_1, %c0_2] : memref<1x6x10x32xf32, #tpu.memory_space<vmem>>, vector<1x6x10x32xf32>
    %1 = vector.shape_cast %0 : vector<1x6x10x32xf32> to vector<6x10x32xf32>
    %cst = arith.constant 0.000000e+00 : f32
    %2 = vector.broadcast %cst : f32 to vector<32x16xf32>
    %3 = vector.extract_strided_slice %1 {offsets = [0, 0, 0], sizes = [4, 8, 32], strides = [1, 1, 1]} : vector<6x10x32xf32> to vector<4x8x32xf32>
    %4 = vector.shape_cast %3 : vector<4x8x32xf32> to vector<32x32xf32>
    %c0_3 = arith.constant 0 : index
    %c0_4 = arith.constant 0 : index
    %c0_5 = arith.constant 0 : index
    %5 = vector.load %arg2[%c0_3, %c0_4, %c0_5] : memref<9x32x16xf32, #tpu.memory_space<vmem>>, vector<1x32x16xf32>
    %6 = vector.shape_cast %5 : vector<1x32x16xf32> to vector<32x16xf32>
    %cst_6 = arith.constant dense<0.000000e+00> : vector<32x16xf32>
    %7 = tpu.matmul %4, %6, %cst_6 {dimension_numbers = #tpu.dot_dimension_numbers<[1], [0], [0], [1], [0, 0, 1, 1], [], []>} : vector<32x32xf32>, vector<32x16xf32>, vector<32x16xf32> -> vector<32x16xf32>
    %8 = arith.addf %2, %7 : vector<32x16xf32>
    %9 = vector.extract_strided_slice %1 {offsets = [0, 1, 0], sizes = [4, 8, 32], strides = [1, 1, 1]} : vector<6x10x32xf32> to vector<4x8x32xf32>
    %10 = vector.shape_cast %9 : vector<4x8x32xf32> to vector<32x32xf32>
    %c1 = arith.constant 1 : index
    %c0_7 = arith.constant 0 : index
    %c0_8 = arith.constant 0 : index
    %11 = vector.load %arg2[%c1, %c0_7, %c0_8] : memref<9x32x16xf32, #tpu.memory_space<vmem>>, vector<1x32x16xf32>
    %12 = vector.shape_cast %11 : vector<1x32x16xf32> to vector<32x16xf32>
    %cst_9 = arith.constant dense<0.000000e+00> : vector<32x16xf32>
    %13 = tpu.matmul %10, %12, %cst_9 {dimension_numbers = #tpu.dot_dimension_numbers<[1], [0], [0], [1], [0, 0, 1, 1], [], []>} : vector<32x32xf32>, vector<32x16xf32>, vector<32x16xf32> -> vector<32x16xf32>
    %14 = arith.addf %8, %13 : vector<32x16xf32>
    %15 = vector.extract_strided_slice %1 {offsets = [0, 2, 0], sizes = [4, 8, 32], strides = [1, 1, 1]} : vector<6x10x32xf32> to vector<4x8x32xf32>
    %16 = vector.shape_cast %15 : vector<4x8x32xf32> to vector<32x32xf32>
    %c2 = arith.constant 2 : index
    %c0_10 = arith.constant 0 : index
    %c0_11 = arith.constant 0 : index
    %17 = vector.load %arg2[%c2, %c0_10, %c0_11] : memref<9x32x16xf32, #tpu.memory_space<vmem>>, vector<1x32x16xf32>
    %18 = vector.shape_cast %17 : vector<1x32x16xf32> to vector<32x16xf32>
    %cst_12 = arith.constant dense<0.000000e+00> : vector<32x16xf32>
    %19 = tpu.matmul %16, %18, %cst_12 {dimension_numbers = #tpu.dot_dimension_numbers<[1], [0], [0], [1], [0, 0, 1, 1], [], []>} : vector<32x32xf32>, vector<32x16xf32>, vector<32x16xf32> -> vector<32x16xf32>
    %20 = arith.addf %14, %19 : vector<32x16xf32>
    %21 = vector.extract_strided_slice %1 {offsets = [1, 0, 0], sizes = [4, 8, 32], strides = [1, 1, 1]} : vector<6x10x32xf32> to vector<4x8x32xf32>
    %22 = vector.shape_cast %21 : vector<4x8x32xf32> to vector<32x32xf32>
    %c3 = arith.constant 3 : index
    %c0_13 = arith.constant 0 : index
    %c0_14 = arith.constant 0 : index
    %23 = vector.load %arg2[%c3, %c0_13, %c0_14] : memref<9x32x16xf32, #tpu.memory_space<vmem>>, vector<1x32x16xf32>
    %24 = vector.shape_cast %23 : vector<1x32x16xf32> to vector<32x16xf32>
    %cst_15 = arith.constant dense<0.000000e+00> : vector<32x16xf32>
    %25 = tpu.matmul %22, %24, %cst_15 {dimension_numbers = #tpu.dot_dimension_numbers<[1], [0], [0], [1], [0, 0, 1, 1], [], []>} : vector<32x32xf32>, vector<32x16xf32>, vector<32x16xf32> -> vector<32x16xf32>
    %26 = arith.addf %20, %25 : vector<32x16xf32>
    %27 = vector.extract_strided_slice %1 {offsets = [1, 1, 0], sizes = [4, 8, 32], strides = [1, 1, 1]} : vector<6x10x32xf32> to vector<4x8x32xf32>
    %28 = vector.shape_cast %27 : vector<4x8x32xf32> to vector<32x32xf32>
    %c4 = arith.constant 4 : index
    %c0_16 = arith.constant 0 : index
    %c0_17 = arith.constant 0 : index
    %29 = vector.load %arg2[%c4, %c0_16, %c0_17] : memref<9x32x16xf32, #tpu.memory_space<vmem>>, vector<1x32x16xf32>
    %30 = vector.shape_cast %29 : vector<1x32x16xf32> to vector<32x16xf32>
    %cst_18 = arith.constant dense<0.000000e+00> : vector<32x16xf32>
    %31 = tpu.matmul %28, %30, %cst_18 {dimension_numbers = #tpu.dot_dimension_numbers<[1], [0], [0], [1], [0, 0, 1, 1], [], []>} : vector<32x32xf32>, vector<32x16xf32>, vector<32x16xf32> -> vector<32x16xf32>
    %32 = arith.addf %26, %31 : vector<32x16xf32>
    %33 = vector.extract_strided_slice %1 {offsets = [1, 2, 0], sizes = [4, 8, 32], strides = [1, 1, 1]} : vector<6x10x32xf32> to vector<4x8x32xf32>
    %34 = vector.shape_cast %33 : vector<4x8x32xf32> to vector<32x32xf32>
    %c5 = arith.constant 5 : index
    %c0_19 = arith.constant 0 : index
    %c0_20 = arith.constant 0 : index
    %35 = vector.load %arg2[%c5, %c0_19, %c0_20] : memref<9x32x16xf32, #tpu.memory_space<vmem>>, vector<1x32x16xf32>
    %36 = vector.shape_cast %35 : vector<1x32x16xf32> to vector<32x16xf32>
    %cst_21 = arith.constant dense<0.000000e+00> : vector<32x16xf32>
    %37 = tpu.matmul %34, %36, %cst_21 {dimension_numbers = #tpu.dot_dimension_numbers<[1], [0], [0], [1], [0, 0, 1, 1], [], []>} : vector<32x32xf32>, vector<32x16xf32>, vector<32x16xf32> -> vector<32x16xf32>
    %38 = arith.addf %32, %37 : vector<32x16xf32>
    %39 = vector.extract_strided_slice %1 {offsets = [2, 0, 0], sizes = [4, 8, 32], strides = [1, 1, 1]} : vector<6x10x32xf32> to vector<4x8x32xf32>
    %40 = vector.shape_cast %39 : vector<4x8x32xf32> to vector<32x32xf32>
    %c6 = arith.constant 6 : index
    %c0_22 = arith.constant 0 : index
    %c0_23 = arith.constant 0 : index
    %41 = vector.load %arg2[%c6, %c0_22, %c0_23] : memref<9x32x16xf32, #tpu.memory_space<vmem>>, vector<1x32x16xf32>
    %42 = vector.shape_cast %41 : vector<1x32x16xf32> to vector<32x16xf32>
    %cst_24 = arith.constant dense<0.000000e+00> : vector<32x16xf32>
    %43 = tpu.matmul %40, %42, %cst_24 {dimension_numbers = #tpu.dot_dimension_numbers<[1], [0], [0], [1], [0, 0, 1, 1], [], []>} : vector<32x32xf32>, vector<32x16xf32>, vector<32x16xf32> -> vector<32x16xf32>
    %44 = arith.addf %38, %43 : vector<32x16xf32>
    %45 = vector.extract_strided_slice %1 {offsets = [2, 1, 0], sizes = [4, 8, 32], strides = [1, 1, 1]} : vector<6x10x32xf32> to vector<4x8x32xf32>
    %46 = vector.shape_cast %45 : vector<4x8x32xf32> to vector<32x32xf32>
    %c7 = arith.constant 7 : index
    %c0_25 = arith.constant 0 : index
    %c0_26 = arith.constant 0 : index
    %47 = vector.load %arg2[%c7, %c0_25, %c0_26] : memref<9x32x16xf32, #tpu.memory_space<vmem>>, vector<1x32x16xf32>
    %48 = vector.shape_cast %47 : vector<1x32x16xf32> to vector<32x16xf32>
    %cst_27 = arith.constant dense<0.000000e+00> : vector<32x16xf32>
    %49 = tpu.matmul %46, %48, %cst_27 {dimension_numbers = #tpu.dot_dimension_numbers<[1], [0], [0], [1], [0, 0, 1, 1], [], []>} : vector<32x32xf32>, vector<32x16xf32>, vector<32x16xf32> -> vector<32x16xf32>
    %50 = arith.addf %44, %49 : vector<32x16xf32>
    %51 = vector.extract_strided_slice %1 {offsets = [2, 2, 0], sizes = [4, 8, 32], strides = [1, 1, 1]} : vector<6x10x32xf32> to vector<4x8x32xf32>
    %52 = vector.shape_cast %51 : vector<4x8x32xf32> to vector<32x32xf32>
    %c8 = arith.constant 8 : index
    %c0_28 = arith.constant 0 : index
    %c0_29 = arith.constant 0 : index
    %53 = vector.load %arg2[%c8, %c0_28, %c0_29] : memref<9x32x16xf32, #tpu.memory_space<vmem>>, vector<1x32x16xf32>
    %54 = vector.shape_cast %53 : vector<1x32x16xf32> to vector<32x16xf32>
    %cst_30 = arith.constant dense<0.000000e+00> : vector<32x16xf32>
    %55 = tpu.matmul %52, %54, %cst_30 {dimension_numbers = #tpu.dot_dimension_numbers<[1], [0], [0], [1], [0, 0, 1, 1], [], []>} : vector<32x32xf32>, vector<32x16xf32>, vector<32x16xf32> -> vector<32x16xf32>
    %56 = arith.addf %50, %55 : vector<32x16xf32>
    %c0_31 = arith.constant 0 : index
    %c0_32 = arith.constant 0 : index
    %57 = vector.load %arg3[%c0_31, %c0_32] : memref<1x16xf32, #tpu.memory_space<vmem>>, vector<1x16xf32>
    %58 = vector.broadcast %57 : vector<1x16xf32> to vector<32x16xf32>
    %59 = arith.addf %56, %58 : vector<32x16xf32>
    %c0_33 = arith.constant 0 : index
    %c0_34 = arith.constant 0 : index
    %c0_35 = arith.constant 0 : index
    %60 = vector.load %arg4[%c0_33, %c0_34, %c0_35] : memref<1x32x16xf32, #tpu.memory_space<vmem>>, vector<1x32x16xf32>
    %61 = vector.shape_cast %60 : vector<1x32x16xf32> to vector<32x16xf32>
    %62 = vector.shape_cast %59 : vector<32x16xf32> to vector<1x32x16xf32>
    tpu.vector_store %arg4[%c0_33, %c0_34, %c0_35], %62 {strides = array<i32>} : memref<1x32x16xf32, #tpu.memory_space<vmem>>, vector<1x32x16xf32>,
    return
  }
  func.func @transform_0(%arg0: i32) -> (i32, i32, i32, i32) {
    %c0_i32 = arith.constant 0 : i32
    %c0_i32_0 = arith.constant 0 : i32
    %c0_i32_1 = arith.constant 0 : i32
    %c0_i32_2 = arith.constant 0 : i32
    return %arg0, %c0_i32, %c0_i32_0, %c0_i32_1 : i32, i32, i32, i32
  }
  func.func @transform_1(%arg0: i32) -> (i32, i32, i32) {
    %c0_i32 = arith.constant 0 : i32
    %c0_i32_0 = arith.constant 0 : i32
    %c0_i32_1 = arith.constant 0 : i32
    %c0_i32_2 = arith.constant 0 : i32
    return %c0_i32, %c0_i32_0, %c0_i32_1 : i32, i32, i32
  }
  func.func @transform_2(%arg0: i32) -> (i32, i32) {
    %c0_i32 = arith.constant 0 : i32
    %c0_i32_0 = arith.constant 0 : i32
    %c0_i32_1 = arith.constant 0 : i32
    return %c0_i32, %c0_i32_0 : i32, i32
  }
  func.func @transform_3(%arg0: i32) -> (i32, i32, i32) {
    %c0_i32 = arith.constant 0 : i32
    %c0_i32_0 = arith.constant 0 : i32
    %c0_i32_1 = arith.constant 0 : i32
    return %arg0, %c0_i32, %c0_i32_0 : i32, i32, i32
  }
}

module attributes {stable_mosaic.version = 11 : i64} {
  func.func @_encoder_kernel(%arg0: memref<8x2x32xf32, #tpu.memory_space<vmem>>, %arg1: memref<32x128xf32, #tpu.memory_space<vmem>>, %arg2: memref<32x128xf32, #tpu.memory_space<vmem>>, %arg3: memref<1x128xf32, #tpu.memory_space<vmem>>, %arg4: memref<64x128xf32, #tpu.memory_space<vmem>>, %arg5: memref<1x128xf32, #tpu.memory_space<vmem>>, %arg6: memref<32x32xf32, #tpu.memory_space<vmem>>, %arg7: memref<1x32xf32, #tpu.memory_space<vmem>>, %arg8: memref<2x32xf32, #tpu.memory_space<vmem>>, %arg9: memref<8x2x128xf32, #tpu.memory_space<vmem>>) attributes {dimension_semantics = [], scalar_prefetch = 0 : i64, scratch_operands = 1 : i64, tpu.core_type = #tpu.core_type<tc>} {
    %c0 = arith.constant 0 : index
    %c0_0 = arith.constant 0 : index
    %c0_1 = arith.constant 0 : index
    %0 = vector.load %arg0[%c0, %c0_0, %c0_1] : memref<8x2x32xf32, #tpu.memory_space<vmem>>, vector<8x2x32xf32>
    %1 = vector.shape_cast %0 : vector<8x2x32xf32> to vector<16x32xf32>
    %c0_2 = arith.constant 0 : index
    %c0_3 = arith.constant 0 : index
    %2 = vector.load %arg1[%c0_2, %c0_3] : memref<32x128xf32, #tpu.memory_space<vmem>>, vector<32x128xf32>
    %cst = arith.constant dense<0.000000e+00> : vector<16x128xf32>
    %3 = tpu.matmul %1, %2, %cst {dimension_numbers = #tpu.dot_dimension_numbers<[1], [0], [0], [1], [0, 0, 1, 1], [], []>} : vector<16x32xf32>, vector<32x128xf32>, vector<16x128xf32> -> vector<16x128xf32>
    %c0_4 = arith.constant 0 : index
    %c0_5 = arith.constant 0 : index
    %4 = vector.load %arg3[%c0_4, %c0_5] : memref<1x128xf32, #tpu.memory_space<vmem>>, vector<1x128xf32>
    %5 = vector.broadcast %4 : vector<1x128xf32> to vector<16x128xf32>
    %6 = arith.addf %3, %5 : vector<16x128xf32>
    %7 = vector.shape_cast %6 : vector<16x128xf32> to vector<8x2x128xf32>
    %c0_6 = arith.constant 0 : index
    %c0_7 = arith.constant 0 : index
    %c0_8 = arith.constant 0 : index
    %8 = vector.load %arg9[%c0_6, %c0_7, %c0_8] : memref<8x2x128xf32, #tpu.memory_space<vmem>>, vector<8x2x128xf32>
    tpu.vector_store %arg9[%c0_6, %c0_7, %c0_8], %7 {strides = array<i32>} : memref<8x2x128xf32, #tpu.memory_space<vmem>>, vector<8x2x128xf32>,
    %c0_9 = arith.constant 0 : index
    %c0_10 = arith.constant 0 : index
    %9 = vector.load %arg2[%c0_9, %c0_10] : memref<32x128xf32, #tpu.memory_space<vmem>>, vector<32x128xf32>
    %c0_11 = arith.constant 0 : index
    %c0_12 = arith.constant 0 : index
    %10 = vector.load %arg4[%c0_11, %c0_12] : memref<64x128xf32, #tpu.memory_space<vmem>>, vector<64x128xf32>
    %c0_13 = arith.constant 0 : index
    %c0_14 = arith.constant 0 : index
    %11 = vector.load %arg5[%c0_13, %c0_14] : memref<1x128xf32, #tpu.memory_space<vmem>>, vector<1x128xf32>
    %cst_15 = arith.constant 0.000000e+00 : f32
    %12 = vector.broadcast %cst_15 : f32 to vector<2x32xf32>
    %c0_i32 = arith.constant 0 : i32
    %13 = arith.index_cast %c0_i32 : i32 to index
    %c0_16 = arith.constant 0 : index
    %c0_17 = arith.constant 0 : index
    %14 = vector.load %arg9[%13, %c0_16, %c0_17] : memref<8x2x128xf32, #tpu.memory_space<vmem>>, vector<1x2x128xf32>
    %15 = vector.shape_cast %14 : vector<1x2x128xf32> to vector<2x128xf32>
    %cst_18 = arith.constant dense<0.000000e+00> : vector<2x128xf32>
    %16 = tpu.matmul %12, %9, %cst_18 {dimension_numbers = #tpu.dot_dimension_numbers<[1], [0], [0], [1], [0, 0, 1, 1], [], []>} : vector<2x32xf32>, vector<32x128xf32>, vector<2x128xf32> -> vector<2x128xf32>
    %17 = arith.addf %15, %16 : vector<2x128xf32>
    %18 = vector.extract_strided_slice %17 {offsets = [0, 0], sizes = [2, 32], strides = [1, 1]} : vector<2x128xf32> to vector<2x32xf32>
    %19 = arith.negf %18 : vector<2x32xf32>
    %20 = math.exp %19 : vector<2x32xf32>
    %cst_19 = arith.constant 1.000000e+00 : f32
    %21 = vector.broadcast %cst_19 : f32 to vector<2x32xf32>
    %22 = arith.addf %21, %20 : vector<2x32xf32>
    %23 = arith.divf %21, %22 : vector<2x32xf32>
    %24 = vector.extract_strided_slice %17 {offsets = [0, 32], sizes = [2, 32], strides = [1, 1]} : vector<2x128xf32> to vector<2x32xf32>
    %25 = arith.negf %24 : vector<2x32xf32>
    %26 = math.exp %25 : vector<2x32xf32>
    %cst_20 = arith.constant 1.000000e+00 : f32
    %27 = vector.broadcast %cst_20 : f32 to vector<2x32xf32>
    %28 = arith.addf %27, %26 : vector<2x32xf32>
    %29 = arith.divf %27, %28 : vector<2x32xf32>
    %30 = vector.extract_strided_slice %17 {offsets = [0, 64], sizes = [2, 32], strides = [1, 1]} : vector<2x128xf32> to vector<2x32xf32>
    %31 = math.tanh %30 : vector<2x32xf32>
    %32 = vector.extract_strided_slice %17 {offsets = [0, 96], sizes = [2, 32], strides = [1, 1]} : vector<2x128xf32> to vector<2x32xf32>
    %33 = arith.negf %32 : vector<2x32xf32>
    %34 = math.exp %33 : vector<2x32xf32>
    %cst_21 = arith.constant 1.000000e+00 : f32
    %35 = vector.broadcast %cst_21 : f32 to vector<2x32xf32>
    %36 = arith.addf %35, %34 : vector<2x32xf32>
    %37 = arith.divf %35, %36 : vector<2x32xf32>
    %38 = arith.mulf %29, %12 : vector<2x32xf32>
    %39 = arith.mulf %23, %31 : vector<2x32xf32>
    %40 = arith.addf %38, %39 : vector<2x32xf32>
    %41 = math.tanh %40 : vector<2x32xf32>
    %42 = arith.mulf %37, %41 : vector<2x32xf32>
    %43 = tpu.concatenate %42, %12 in 1 : vector<2x32xf32>, vector<2x32xf32> -> vector<2x64xf32>
    %cst_22 = arith.constant dense<0.000000e+00> : vector<2x128xf32>
    %44 = tpu.matmul %43, %10, %cst_22 {dimension_numbers = #tpu.dot_dimension_numbers<[1], [0], [0], [1], [0, 0, 1, 1], [], []>} : vector<2x64xf32>, vector<64x128xf32>, vector<2x128xf32> -> vector<2x128xf32>
    %45 = vector.broadcast %11 : vector<1x128xf32> to vector<2x128xf32>
    %46 = arith.addf %44, %45 : vector<2x128xf32>
    %47 = vector.extract_strided_slice %46 {offsets = [0, 0], sizes = [2, 32], strides = [1, 1]} : vector<2x128xf32> to vector<2x32xf32>
    %48 = arith.negf %47 : vector<2x32xf32>
    %49 = math.exp %48 : vector<2x32xf32>
    %cst_23 = arith.constant 1.000000e+00 : f32
    %50 = vector.broadcast %cst_23 : f32 to vector<2x32xf32>
    %51 = arith.addf %50, %49 : vector<2x32xf32>
    %52 = arith.divf %50, %51 : vector<2x32xf32>
    %53 = vector.extract_strided_slice %46 {offsets = [0, 32], sizes = [2, 32], strides = [1, 1]} : vector<2x128xf32> to vector<2x32xf32>
    %54 = arith.negf %53 : vector<2x32xf32>
    %55 = math.exp %54 : vector<2x32xf32>
    %cst_24 = arith.constant 1.000000e+00 : f32
    %56 = vector.broadcast %cst_24 : f32 to vector<2x32xf32>
    %57 = arith.addf %56, %55 : vector<2x32xf32>
    %58 = arith.divf %56, %57 : vector<2x32xf32>
    %59 = vector.extract_strided_slice %46 {offsets = [0, 64], sizes = [2, 32], strides = [1, 1]} : vector<2x128xf32> to vector<2x32xf32>
    %60 = math.tanh %59 : vector<2x32xf32>
    %61 = vector.extract_strided_slice %46 {offsets = [0, 96], sizes = [2, 32], strides = [1, 1]} : vector<2x128xf32> to vector<2x32xf32>
    %62 = arith.negf %61 : vector<2x32xf32>
    %63 = math.exp %62 : vector<2x32xf32>
    %cst_25 = arith.constant 1.000000e+00 : f32
    %64 = vector.broadcast %cst_25 : f32 to vector<2x32xf32>
    %65 = arith.addf %64, %63 : vector<2x32xf32>
    %66 = arith.divf %64, %65 : vector<2x32xf32>
    %67 = arith.mulf %58, %12 : vector<2x32xf32>
    %68 = arith.mulf %52, %60 : vector<2x32xf32>
    %69 = arith.addf %67, %68 : vector<2x32xf32>
    %70 = math.tanh %69 : vector<2x32xf32>
    %71 = arith.mulf %66, %70 : vector<2x32xf32>
    %c1_i32 = arith.constant 1 : i32
    %72 = arith.index_cast %c1_i32 : i32 to index
    %c0_26 = arith.constant 0 : index
    %c0_27 = arith.constant 0 : index
    %73 = vector.load %arg9[%72, %c0_26, %c0_27] : memref<8x2x128xf32, #tpu.memory_space<vmem>>, vector<1x2x128xf32>
    %74 = vector.shape_cast %73 : vector<1x2x128xf32> to vector<2x128xf32>
    %cst_28 = arith.constant dense<0.000000e+00> : vector<2x128xf32>
    %75 = tpu.matmul %42, %9, %cst_28 {dimension_numbers = #tpu.dot_dimension_numbers<[1], [0], [0], [1], [0, 0, 1, 1], [], []>} : vector<2x32xf32>, vector<32x128xf32>, vector<2x128xf32> -> vector<2x128xf32>
    %76 = arith.addf %74, %75 : vector<2x128xf32>
    %77 = vector.extract_strided_slice %76 {offsets = [0, 0], sizes = [2, 32], strides = [1, 1]} : vector<2x128xf32> to vector<2x32xf32>
    %78 = arith.negf %77 : vector<2x32xf32>
    %79 = math.exp %78 : vector<2x32xf32>
    %cst_29 = arith.constant 1.000000e+00 : f32
    %80 = vector.broadcast %cst_29 : f32 to vector<2x32xf32>
    %81 = arith.addf %80, %79 : vector<2x32xf32>
    %82 = arith.divf %80, %81 : vector<2x32xf32>
    %83 = vector.extract_strided_slice %76 {offsets = [0, 32], sizes = [2, 32], strides = [1, 1]} : vector<2x128xf32> to vector<2x32xf32>
    %84 = arith.negf %83 : vector<2x32xf32>
    %85 = math.exp %84 : vector<2x32xf32>
    %cst_30 = arith.constant 1.000000e+00 : f32
    %86 = vector.broadcast %cst_30 : f32 to vector<2x32xf32>
    %87 = arith.addf %86, %85 : vector<2x32xf32>
    %88 = arith.divf %86, %87 : vector<2x32xf32>
    %89 = vector.extract_strided_slice %76 {offsets = [0, 64], sizes = [2, 32], strides = [1, 1]} : vector<2x128xf32> to vector<2x32xf32>
    %90 = math.tanh %89 : vector<2x32xf32>
    %91 = vector.extract_strided_slice %76 {offsets = [0, 96], sizes = [2, 32], strides = [1, 1]} : vector<2x128xf32> to vector<2x32xf32>
    %92 = arith.negf %91 : vector<2x32xf32>
    %93 = math.exp %92 : vector<2x32xf32>
    %cst_31 = arith.constant 1.000000e+00 : f32
    %94 = vector.broadcast %cst_31 : f32 to vector<2x32xf32>
    %95 = arith.addf %94, %93 : vector<2x32xf32>
    %96 = arith.divf %94, %95 : vector<2x32xf32>
    %97 = arith.mulf %88, %40 : vector<2x32xf32>
    %98 = arith.mulf %82, %90 : vector<2x32xf32>
    %99 = arith.addf %97, %98 : vector<2x32xf32>
    %100 = math.tanh %99 : vector<2x32xf32>
    %101 = arith.mulf %96, %100 : vector<2x32xf32>
    %102 = tpu.concatenate %101, %71 in 1 : vector<2x32xf32>, vector<2x32xf32> -> vector<2x64xf32>
    %cst_32 = arith.constant dense<0.000000e+00> : vector<2x128xf32>
    %103 = tpu.matmul %102, %10, %cst_32 {dimension_numbers = #tpu.dot_dimension_numbers<[1], [0], [0], [1], [0, 0, 1, 1], [], []>} : vector<2x64xf32>, vector<64x128xf32>, vector<2x128xf32> -> vector<2x128xf32>
    %104 = vector.broadcast %11 : vector<1x128xf32> to vector<2x128xf32>
    %105 = arith.addf %103, %104 : vector<2x128xf32>
    %106 = vector.extract_strided_slice %105 {offsets = [0, 0], sizes = [2, 32], strides = [1, 1]} : vector<2x128xf32> to vector<2x32xf32>
    %107 = arith.negf %106 : vector<2x32xf32>
    %108 = math.exp %107 : vector<2x32xf32>
    %cst_33 = arith.constant 1.000000e+00 : f32
    %109 = vector.broadcast %cst_33 : f32 to vector<2x32xf32>
    %110 = arith.addf %109, %108 : vector<2x32xf32>
    %111 = arith.divf %109, %110 : vector<2x32xf32>
    %112 = vector.extract_strided_slice %105 {offsets = [0, 32], sizes = [2, 32], strides = [1, 1]} : vector<2x128xf32> to vector<2x32xf32>
    %113 = arith.negf %112 : vector<2x32xf32>
    %114 = math.exp %113 : vector<2x32xf32>
    %cst_34 = arith.constant 1.000000e+00 : f32
    %115 = vector.broadcast %cst_34 : f32 to vector<2x32xf32>
    %116 = arith.addf %115, %114 : vector<2x32xf32>
    %117 = arith.divf %115, %116 : vector<2x32xf32>
    %118 = vector.extract_strided_slice %105 {offsets = [0, 64], sizes = [2, 32], strides = [1, 1]} : vector<2x128xf32> to vector<2x32xf32>
    %119 = math.tanh %118 : vector<2x32xf32>
    %120 = vector.extract_strided_slice %105 {offsets = [0, 96], sizes = [2, 32], strides = [1, 1]} : vector<2x128xf32> to vector<2x32xf32>
    %121 = arith.negf %120 : vector<2x32xf32>
    %122 = math.exp %121 : vector<2x32xf32>
    %cst_35 = arith.constant 1.000000e+00 : f32
    %123 = vector.broadcast %cst_35 : f32 to vector<2x32xf32>
    %124 = arith.addf %123, %122 : vector<2x32xf32>
    %125 = arith.divf %123, %124 : vector<2x32xf32>
    %126 = arith.mulf %117, %69 : vector<2x32xf32>
    %127 = arith.mulf %111, %119 : vector<2x32xf32>
    %128 = arith.addf %126, %127 : vector<2x32xf32>
    %129 = math.tanh %128 : vector<2x32xf32>
    %130 = arith.mulf %125, %129 : vector<2x32xf32>
    %c2_i32 = arith.constant 2 : i32
    %131 = arith.index_cast %c2_i32 : i32 to index
    %c0_36 = arith.constant 0 : index
    %c0_37 = arith.constant 0 : index
    %132 = vector.load %arg9[%131, %c0_36, %c0_37] : memref<8x2x128xf32, #tpu.memory_space<vmem>>, vector<1x2x128xf32>
    %133 = vector.shape_cast %132 : vector<1x2x128xf32> to vector<2x128xf32>
    %cst_38 = arith.constant dense<0.000000e+00> : vector<2x128xf32>
    %134 = tpu.matmul %101, %9, %cst_38 {dimension_numbers = #tpu.dot_dimension_numbers<[1], [0], [0], [1], [0, 0, 1, 1], [], []>} : vector<2x32xf32>, vector<32x128xf32>, vector<2x128xf32> -> vector<2x128xf32>
    %135 = arith.addf %133, %134 : vector<2x128xf32>
    %136 = vector.extract_strided_slice %135 {offsets = [0, 0], sizes = [2, 32], strides = [1, 1]} : vector<2x128xf32> to vector<2x32xf32>
    %137 = arith.negf %136 : vector<2x32xf32>
    %138 = math.exp %137 : vector<2x32xf32>
    %cst_39 = arith.constant 1.000000e+00 : f32
    %139 = vector.broadcast %cst_39 : f32 to vector<2x32xf32>
    %140 = arith.addf %139, %138 : vector<2x32xf32>
    %141 = arith.divf %139, %140 : vector<2x32xf32>
    %142 = vector.extract_strided_slice %135 {offsets = [0, 32], sizes = [2, 32], strides = [1, 1]} : vector<2x128xf32> to vector<2x32xf32>
    %143 = arith.negf %142 : vector<2x32xf32>
    %144 = math.exp %143 : vector<2x32xf32>
    %cst_40 = arith.constant 1.000000e+00 : f32
    %145 = vector.broadcast %cst_40 : f32 to vector<2x32xf32>
    %146 = arith.addf %145, %144 : vector<2x32xf32>
    %147 = arith.divf %145, %146 : vector<2x32xf32>
    %148 = vector.extract_strided_slice %135 {offsets = [0, 64], sizes = [2, 32], strides = [1, 1]} : vector<2x128xf32> to vector<2x32xf32>
    %149 = math.tanh %148 : vector<2x32xf32>
    %150 = vector.extract_strided_slice %135 {offsets = [0, 96], sizes = [2, 32], strides = [1, 1]} : vector<2x128xf32> to vector<2x32xf32>
    %151 = arith.negf %150 : vector<2x32xf32>
    %152 = math.exp %151 : vector<2x32xf32>
    %cst_41 = arith.constant 1.000000e+00 : f32
    %153 = vector.broadcast %cst_41 : f32 to vector<2x32xf32>
    %154 = arith.addf %153, %152 : vector<2x32xf32>
    %155 = arith.divf %153, %154 : vector<2x32xf32>
    %156 = arith.mulf %147, %99 : vector<2x32xf32>
    %157 = arith.mulf %141, %149 : vector<2x32xf32>
    %158 = arith.addf %156, %157 : vector<2x32xf32>
    %159 = math.tanh %158 : vector<2x32xf32>
    %160 = arith.mulf %155, %159 : vector<2x32xf32>
    %161 = tpu.concatenate %160, %130 in 1 : vector<2x32xf32>, vector<2x32xf32> -> vector<2x64xf32>
    %cst_42 = arith.constant dense<0.000000e+00> : vector<2x128xf32>
    %162 = tpu.matmul %161, %10, %cst_42 {dimension_numbers = #tpu.dot_dimension_numbers<[1], [0], [0], [1], [0, 0, 1, 1], [], []>} : vector<2x64xf32>, vector<64x128xf32>, vector<2x128xf32> -> vector<2x128xf32>
    %163 = vector.broadcast %11 : vector<1x128xf32> to vector<2x128xf32>
    %164 = arith.addf %162, %163 : vector<2x128xf32>
    %165 = vector.extract_strided_slice %164 {offsets = [0, 0], sizes = [2, 32], strides = [1, 1]} : vector<2x128xf32> to vector<2x32xf32>
    %166 = arith.negf %165 : vector<2x32xf32>
    %167 = math.exp %166 : vector<2x32xf32>
    %cst_43 = arith.constant 1.000000e+00 : f32
    %168 = vector.broadcast %cst_43 : f32 to vector<2x32xf32>
    %169 = arith.addf %168, %167 : vector<2x32xf32>
    %170 = arith.divf %168, %169 : vector<2x32xf32>
    %171 = vector.extract_strided_slice %164 {offsets = [0, 32], sizes = [2, 32], strides = [1, 1]} : vector<2x128xf32> to vector<2x32xf32>
    %172 = arith.negf %171 : vector<2x32xf32>
    %173 = math.exp %172 : vector<2x32xf32>
    %cst_44 = arith.constant 1.000000e+00 : f32
    %174 = vector.broadcast %cst_44 : f32 to vector<2x32xf32>
    %175 = arith.addf %174, %173 : vector<2x32xf32>
    %176 = arith.divf %174, %175 : vector<2x32xf32>
    %177 = vector.extract_strided_slice %164 {offsets = [0, 64], sizes = [2, 32], strides = [1, 1]} : vector<2x128xf32> to vector<2x32xf32>
    %178 = math.tanh %177 : vector<2x32xf32>
    %179 = vector.extract_strided_slice %164 {offsets = [0, 96], sizes = [2, 32], strides = [1, 1]} : vector<2x128xf32> to vector<2x32xf32>
    %180 = arith.negf %179 : vector<2x32xf32>
    %181 = math.exp %180 : vector<2x32xf32>
    %cst_45 = arith.constant 1.000000e+00 : f32
    %182 = vector.broadcast %cst_45 : f32 to vector<2x32xf32>
    %183 = arith.addf %182, %181 : vector<2x32xf32>
    %184 = arith.divf %182, %183 : vector<2x32xf32>
    %185 = arith.mulf %176, %128 : vector<2x32xf32>
    %186 = arith.mulf %170, %178 : vector<2x32xf32>
    %187 = arith.addf %185, %186 : vector<2x32xf32>
    %188 = math.tanh %187 : vector<2x32xf32>
    %189 = arith.mulf %184, %188 : vector<2x32xf32>
    %c3_i32 = arith.constant 3 : i32
    %190 = arith.index_cast %c3_i32 : i32 to index
    %c0_46 = arith.constant 0 : index
    %c0_47 = arith.constant 0 : index
    %191 = vector.load %arg9[%190, %c0_46, %c0_47] : memref<8x2x128xf32, #tpu.memory_space<vmem>>, vector<1x2x128xf32>
    %192 = vector.shape_cast %191 : vector<1x2x128xf32> to vector<2x128xf32>
    %cst_48 = arith.constant dense<0.000000e+00> : vector<2x128xf32>
    %193 = tpu.matmul %160, %9, %cst_48 {dimension_numbers = #tpu.dot_dimension_numbers<[1], [0], [0], [1], [0, 0, 1, 1], [], []>} : vector<2x32xf32>, vector<32x128xf32>, vector<2x128xf32> -> vector<2x128xf32>
    %194 = arith.addf %192, %193 : vector<2x128xf32>
    %195 = vector.extract_strided_slice %194 {offsets = [0, 0], sizes = [2, 32], strides = [1, 1]} : vector<2x128xf32> to vector<2x32xf32>
    %196 = arith.negf %195 : vector<2x32xf32>
    %197 = math.exp %196 : vector<2x32xf32>
    %cst_49 = arith.constant 1.000000e+00 : f32
    %198 = vector.broadcast %cst_49 : f32 to vector<2x32xf32>
    %199 = arith.addf %198, %197 : vector<2x32xf32>
    %200 = arith.divf %198, %199 : vector<2x32xf32>
    %201 = vector.extract_strided_slice %194 {offsets = [0, 32], sizes = [2, 32], strides = [1, 1]} : vector<2x128xf32> to vector<2x32xf32>
    %202 = arith.negf %201 : vector<2x32xf32>
    %203 = math.exp %202 : vector<2x32xf32>
    %cst_50 = arith.constant 1.000000e+00 : f32
    %204 = vector.broadcast %cst_50 : f32 to vector<2x32xf32>
    %205 = arith.addf %204, %203 : vector<2x32xf32>
    %206 = arith.divf %204, %205 : vector<2x32xf32>
    %207 = vector.extract_strided_slice %194 {offsets = [0, 64], sizes = [2, 32], strides = [1, 1]} : vector<2x128xf32> to vector<2x32xf32>
    %208 = math.tanh %207 : vector<2x32xf32>
    %209 = vector.extract_strided_slice %194 {offsets = [0, 96], sizes = [2, 32], strides = [1, 1]} : vector<2x128xf32> to vector<2x32xf32>
    %210 = arith.negf %209 : vector<2x32xf32>
    %211 = math.exp %210 : vector<2x32xf32>
    %cst_51 = arith.constant 1.000000e+00 : f32
    %212 = vector.broadcast %cst_51 : f32 to vector<2x32xf32>
    %213 = arith.addf %212, %211 : vector<2x32xf32>
    %214 = arith.divf %212, %213 : vector<2x32xf32>
    %215 = arith.mulf %206, %158 : vector<2x32xf32>
    %216 = arith.mulf %200, %208 : vector<2x32xf32>
    %217 = arith.addf %215, %216 : vector<2x32xf32>
    %218 = math.tanh %217 : vector<2x32xf32>
    %219 = arith.mulf %214, %218 : vector<2x32xf32>
    %220 = tpu.concatenate %219, %189 in 1 : vector<2x32xf32>, vector<2x32xf32> -> vector<2x64xf32>
    %cst_52 = arith.constant dense<0.000000e+00> : vector<2x128xf32>
    %221 = tpu.matmul %220, %10, %cst_52 {dimension_numbers = #tpu.dot_dimension_numbers<[1], [0], [0], [1], [0, 0, 1, 1], [], []>} : vector<2x64xf32>, vector<64x128xf32>, vector<2x128xf32> -> vector<2x128xf32>
    %222 = vector.broadcast %11 : vector<1x128xf32> to vector<2x128xf32>
    %223 = arith.addf %221, %222 : vector<2x128xf32>
    %224 = vector.extract_strided_slice %223 {offsets = [0, 0], sizes = [2, 32], strides = [1, 1]} : vector<2x128xf32> to vector<2x32xf32>
    %225 = arith.negf %224 : vector<2x32xf32>
    %226 = math.exp %225 : vector<2x32xf32>
    %cst_53 = arith.constant 1.000000e+00 : f32
    %227 = vector.broadcast %cst_53 : f32 to vector<2x32xf32>
    %228 = arith.addf %227, %226 : vector<2x32xf32>
    %229 = arith.divf %227, %228 : vector<2x32xf32>
    %230 = vector.extract_strided_slice %223 {offsets = [0, 32], sizes = [2, 32], strides = [1, 1]} : vector<2x128xf32> to vector<2x32xf32>
    %231 = arith.negf %230 : vector<2x32xf32>
    %232 = math.exp %231 : vector<2x32xf32>
    %cst_54 = arith.constant 1.000000e+00 : f32
    %233 = vector.broadcast %cst_54 : f32 to vector<2x32xf32>
    %234 = arith.addf %233, %232 : vector<2x32xf32>
    %235 = arith.divf %233, %234 : vector<2x32xf32>
    %236 = vector.extract_strided_slice %223 {offsets = [0, 64], sizes = [2, 32], strides = [1, 1]} : vector<2x128xf32> to vector<2x32xf32>
    %237 = math.tanh %236 : vector<2x32xf32>
    %238 = vector.extract_strided_slice %223 {offsets = [0, 96], sizes = [2, 32], strides = [1, 1]} : vector<2x128xf32> to vector<2x32xf32>
    %239 = arith.negf %238 : vector<2x32xf32>
    %240 = math.exp %239 : vector<2x32xf32>
    %cst_55 = arith.constant 1.000000e+00 : f32
    %241 = vector.broadcast %cst_55 : f32 to vector<2x32xf32>
    %242 = arith.addf %241, %240 : vector<2x32xf32>
    %243 = arith.divf %241, %242 : vector<2x32xf32>
    %244 = arith.mulf %235, %187 : vector<2x32xf32>
    %245 = arith.mulf %229, %237 : vector<2x32xf32>
    %246 = arith.addf %244, %245 : vector<2x32xf32>
    %247 = math.tanh %246 : vector<2x32xf32>
    %248 = arith.mulf %243, %247 : vector<2x32xf32>
    %c4_i32 = arith.constant 4 : i32
    %249 = arith.index_cast %c4_i32 : i32 to index
    %c0_56 = arith.constant 0 : index
    %c0_57 = arith.constant 0 : index
    %250 = vector.load %arg9[%249, %c0_56, %c0_57] : memref<8x2x128xf32, #tpu.memory_space<vmem>>, vector<1x2x128xf32>
    %251 = vector.shape_cast %250 : vector<1x2x128xf32> to vector<2x128xf32>
    %cst_58 = arith.constant dense<0.000000e+00> : vector<2x128xf32>
    %252 = tpu.matmul %219, %9, %cst_58 {dimension_numbers = #tpu.dot_dimension_numbers<[1], [0], [0], [1], [0, 0, 1, 1], [], []>} : vector<2x32xf32>, vector<32x128xf32>, vector<2x128xf32> -> vector<2x128xf32>
    %253 = arith.addf %251, %252 : vector<2x128xf32>
    %254 = vector.extract_strided_slice %253 {offsets = [0, 0], sizes = [2, 32], strides = [1, 1]} : vector<2x128xf32> to vector<2x32xf32>
    %255 = arith.negf %254 : vector<2x32xf32>
    %256 = math.exp %255 : vector<2x32xf32>
    %cst_59 = arith.constant 1.000000e+00 : f32
    %257 = vector.broadcast %cst_59 : f32 to vector<2x32xf32>
    %258 = arith.addf %257, %256 : vector<2x32xf32>
    %259 = arith.divf %257, %258 : vector<2x32xf32>
    %260 = vector.extract_strided_slice %253 {offsets = [0, 32], sizes = [2, 32], strides = [1, 1]} : vector<2x128xf32> to vector<2x32xf32>
    %261 = arith.negf %260 : vector<2x32xf32>
    %262 = math.exp %261 : vector<2x32xf32>
    %cst_60 = arith.constant 1.000000e+00 : f32
    %263 = vector.broadcast %cst_60 : f32 to vector<2x32xf32>
    %264 = arith.addf %263, %262 : vector<2x32xf32>
    %265 = arith.divf %263, %264 : vector<2x32xf32>
    %266 = vector.extract_strided_slice %253 {offsets = [0, 64], sizes = [2, 32], strides = [1, 1]} : vector<2x128xf32> to vector<2x32xf32>
    %267 = math.tanh %266 : vector<2x32xf32>
    %268 = vector.extract_strided_slice %253 {offsets = [0, 96], sizes = [2, 32], strides = [1, 1]} : vector<2x128xf32> to vector<2x32xf32>
    %269 = arith.negf %268 : vector<2x32xf32>
    %270 = math.exp %269 : vector<2x32xf32>
    %cst_61 = arith.constant 1.000000e+00 : f32
    %271 = vector.broadcast %cst_61 : f32 to vector<2x32xf32>
    %272 = arith.addf %271, %270 : vector<2x32xf32>
    %273 = arith.divf %271, %272 : vector<2x32xf32>
    %274 = arith.mulf %265, %217 : vector<2x32xf32>
    %275 = arith.mulf %259, %267 : vector<2x32xf32>
    %276 = arith.addf %274, %275 : vector<2x32xf32>
    %277 = math.tanh %276 : vector<2x32xf32>
    %278 = arith.mulf %273, %277 : vector<2x32xf32>
    %279 = tpu.concatenate %278, %248 in 1 : vector<2x32xf32>, vector<2x32xf32> -> vector<2x64xf32>
    %cst_62 = arith.constant dense<0.000000e+00> : vector<2x128xf32>
    %280 = tpu.matmul %279, %10, %cst_62 {dimension_numbers = #tpu.dot_dimension_numbers<[1], [0], [0], [1], [0, 0, 1, 1], [], []>} : vector<2x64xf32>, vector<64x128xf32>, vector<2x128xf32> -> vector<2x128xf32>
    %281 = vector.broadcast %11 : vector<1x128xf32> to vector<2x128xf32>
    %282 = arith.addf %280, %281 : vector<2x128xf32>
    %283 = vector.extract_strided_slice %282 {offsets = [0, 0], sizes = [2, 32], strides = [1, 1]} : vector<2x128xf32> to vector<2x32xf32>
    %284 = arith.negf %283 : vector<2x32xf32>
    %285 = math.exp %284 : vector<2x32xf32>
    %cst_63 = arith.constant 1.000000e+00 : f32
    %286 = vector.broadcast %cst_63 : f32 to vector<2x32xf32>
    %287 = arith.addf %286, %285 : vector<2x32xf32>
    %288 = arith.divf %286, %287 : vector<2x32xf32>
    %289 = vector.extract_strided_slice %282 {offsets = [0, 32], sizes = [2, 32], strides = [1, 1]} : vector<2x128xf32> to vector<2x32xf32>
    %290 = arith.negf %289 : vector<2x32xf32>
    %291 = math.exp %290 : vector<2x32xf32>
    %cst_64 = arith.constant 1.000000e+00 : f32
    %292 = vector.broadcast %cst_64 : f32 to vector<2x32xf32>
    %293 = arith.addf %292, %291 : vector<2x32xf32>
    %294 = arith.divf %292, %293 : vector<2x32xf32>
    %295 = vector.extract_strided_slice %282 {offsets = [0, 64], sizes = [2, 32], strides = [1, 1]} : vector<2x128xf32> to vector<2x32xf32>
    %296 = math.tanh %295 : vector<2x32xf32>
    %297 = vector.extract_strided_slice %282 {offsets = [0, 96], sizes = [2, 32], strides = [1, 1]} : vector<2x128xf32> to vector<2x32xf32>
    %298 = arith.negf %297 : vector<2x32xf32>
    %299 = math.exp %298 : vector<2x32xf32>
    %cst_65 = arith.constant 1.000000e+00 : f32
    %300 = vector.broadcast %cst_65 : f32 to vector<2x32xf32>
    %301 = arith.addf %300, %299 : vector<2x32xf32>
    %302 = arith.divf %300, %301 : vector<2x32xf32>
    %303 = arith.mulf %294, %246 : vector<2x32xf32>
    %304 = arith.mulf %288, %296 : vector<2x32xf32>
    %305 = arith.addf %303, %304 : vector<2x32xf32>
    %306 = math.tanh %305 : vector<2x32xf32>
    %307 = arith.mulf %302, %306 : vector<2x32xf32>
    %c5_i32 = arith.constant 5 : i32
    %308 = arith.index_cast %c5_i32 : i32 to index
    %c0_66 = arith.constant 0 : index
    %c0_67 = arith.constant 0 : index
    %309 = vector.load %arg9[%308, %c0_66, %c0_67] : memref<8x2x128xf32, #tpu.memory_space<vmem>>, vector<1x2x128xf32>
    %310 = vector.shape_cast %309 : vector<1x2x128xf32> to vector<2x128xf32>
    %cst_68 = arith.constant dense<0.000000e+00> : vector<2x128xf32>
    %311 = tpu.matmul %278, %9, %cst_68 {dimension_numbers = #tpu.dot_dimension_numbers<[1], [0], [0], [1], [0, 0, 1, 1], [], []>} : vector<2x32xf32>, vector<32x128xf32>, vector<2x128xf32> -> vector<2x128xf32>
    %312 = arith.addf %310, %311 : vector<2x128xf32>
    %313 = vector.extract_strided_slice %312 {offsets = [0, 0], sizes = [2, 32], strides = [1, 1]} : vector<2x128xf32> to vector<2x32xf32>
    %314 = arith.negf %313 : vector<2x32xf32>
    %315 = math.exp %314 : vector<2x32xf32>
    %cst_69 = arith.constant 1.000000e+00 : f32
    %316 = vector.broadcast %cst_69 : f32 to vector<2x32xf32>
    %317 = arith.addf %316, %315 : vector<2x32xf32>
    %318 = arith.divf %316, %317 : vector<2x32xf32>
    %319 = vector.extract_strided_slice %312 {offsets = [0, 32], sizes = [2, 32], strides = [1, 1]} : vector<2x128xf32> to vector<2x32xf32>
    %320 = arith.negf %319 : vector<2x32xf32>
    %321 = math.exp %320 : vector<2x32xf32>
    %cst_70 = arith.constant 1.000000e+00 : f32
    %322 = vector.broadcast %cst_70 : f32 to vector<2x32xf32>
    %323 = arith.addf %322, %321 : vector<2x32xf32>
    %324 = arith.divf %322, %323 : vector<2x32xf32>
    %325 = vector.extract_strided_slice %312 {offsets = [0, 64], sizes = [2, 32], strides = [1, 1]} : vector<2x128xf32> to vector<2x32xf32>
    %326 = math.tanh %325 : vector<2x32xf32>
    %327 = vector.extract_strided_slice %312 {offsets = [0, 96], sizes = [2, 32], strides = [1, 1]} : vector<2x128xf32> to vector<2x32xf32>
    %328 = arith.negf %327 : vector<2x32xf32>
    %329 = math.exp %328 : vector<2x32xf32>
    %cst_71 = arith.constant 1.000000e+00 : f32
    %330 = vector.broadcast %cst_71 : f32 to vector<2x32xf32>
    %331 = arith.addf %330, %329 : vector<2x32xf32>
    %332 = arith.divf %330, %331 : vector<2x32xf32>
    %333 = arith.mulf %324, %276 : vector<2x32xf32>
    %334 = arith.mulf %318, %326 : vector<2x32xf32>
    %335 = arith.addf %333, %334 : vector<2x32xf32>
    %336 = math.tanh %335 : vector<2x32xf32>
    %337 = arith.mulf %332, %336 : vector<2x32xf32>
    %338 = tpu.concatenate %337, %307 in 1 : vector<2x32xf32>, vector<2x32xf32> -> vector<2x64xf32>
    %cst_72 = arith.constant dense<0.000000e+00> : vector<2x128xf32>
    %339 = tpu.matmul %338, %10, %cst_72 {dimension_numbers = #tpu.dot_dimension_numbers<[1], [0], [0], [1], [0, 0, 1, 1], [], []>} : vector<2x64xf32>, vector<64x128xf32>, vector<2x128xf32> -> vector<2x128xf32>
    %340 = vector.broadcast %11 : vector<1x128xf32> to vector<2x128xf32>
    %341 = arith.addf %339, %340 : vector<2x128xf32>
    %342 = vector.extract_strided_slice %341 {offsets = [0, 0], sizes = [2, 32], strides = [1, 1]} : vector<2x128xf32> to vector<2x32xf32>
    %343 = arith.negf %342 : vector<2x32xf32>
    %344 = math.exp %343 : vector<2x32xf32>
    %cst_73 = arith.constant 1.000000e+00 : f32
    %345 = vector.broadcast %cst_73 : f32 to vector<2x32xf32>
    %346 = arith.addf %345, %344 : vector<2x32xf32>
    %347 = arith.divf %345, %346 : vector<2x32xf32>
    %348 = vector.extract_strided_slice %341 {offsets = [0, 32], sizes = [2, 32], strides = [1, 1]} : vector<2x128xf32> to vector<2x32xf32>
    %349 = arith.negf %348 : vector<2x32xf32>
    %350 = math.exp %349 : vector<2x32xf32>
    %cst_74 = arith.constant 1.000000e+00 : f32
    %351 = vector.broadcast %cst_74 : f32 to vector<2x32xf32>
    %352 = arith.addf %351, %350 : vector<2x32xf32>
    %353 = arith.divf %351, %352 : vector<2x32xf32>
    %354 = vector.extract_strided_slice %341 {offsets = [0, 64], sizes = [2, 32], strides = [1, 1]} : vector<2x128xf32> to vector<2x32xf32>
    %355 = math.tanh %354 : vector<2x32xf32>
    %356 = vector.extract_strided_slice %341 {offsets = [0, 96], sizes = [2, 32], strides = [1, 1]} : vector<2x128xf32> to vector<2x32xf32>
    %357 = arith.negf %356 : vector<2x32xf32>
    %358 = math.exp %357 : vector<2x32xf32>
    %cst_75 = arith.constant 1.000000e+00 : f32
    %359 = vector.broadcast %cst_75 : f32 to vector<2x32xf32>
    %360 = arith.addf %359, %358 : vector<2x32xf32>
    %361 = arith.divf %359, %360 : vector<2x32xf32>
    %362 = arith.mulf %353, %305 : vector<2x32xf32>
    %363 = arith.mulf %347, %355 : vector<2x32xf32>
    %364 = arith.addf %362, %363 : vector<2x32xf32>
    %365 = math.tanh %364 : vector<2x32xf32>
    %366 = arith.mulf %361, %365 : vector<2x32xf32>
    %c6_i32 = arith.constant 6 : i32
    %367 = arith.index_cast %c6_i32 : i32 to index
    %c0_76 = arith.constant 0 : index
    %c0_77 = arith.constant 0 : index
    %368 = vector.load %arg9[%367, %c0_76, %c0_77] : memref<8x2x128xf32, #tpu.memory_space<vmem>>, vector<1x2x128xf32>
    %369 = vector.shape_cast %368 : vector<1x2x128xf32> to vector<2x128xf32>
    %cst_78 = arith.constant dense<0.000000e+00> : vector<2x128xf32>
    %370 = tpu.matmul %337, %9, %cst_78 {dimension_numbers = #tpu.dot_dimension_numbers<[1], [0], [0], [1], [0, 0, 1, 1], [], []>} : vector<2x32xf32>, vector<32x128xf32>, vector<2x128xf32> -> vector<2x128xf32>
    %371 = arith.addf %369, %370 : vector<2x128xf32>
    %372 = vector.extract_strided_slice %371 {offsets = [0, 0], sizes = [2, 32], strides = [1, 1]} : vector<2x128xf32> to vector<2x32xf32>
    %373 = arith.negf %372 : vector<2x32xf32>
    %374 = math.exp %373 : vector<2x32xf32>
    %cst_79 = arith.constant 1.000000e+00 : f32
    %375 = vector.broadcast %cst_79 : f32 to vector<2x32xf32>
    %376 = arith.addf %375, %374 : vector<2x32xf32>
    %377 = arith.divf %375, %376 : vector<2x32xf32>
    %378 = vector.extract_strided_slice %371 {offsets = [0, 32], sizes = [2, 32], strides = [1, 1]} : vector<2x128xf32> to vector<2x32xf32>
    %379 = arith.negf %378 : vector<2x32xf32>
    %380 = math.exp %379 : vector<2x32xf32>
    %cst_80 = arith.constant 1.000000e+00 : f32
    %381 = vector.broadcast %cst_80 : f32 to vector<2x32xf32>
    %382 = arith.addf %381, %380 : vector<2x32xf32>
    %383 = arith.divf %381, %382 : vector<2x32xf32>
    %384 = vector.extract_strided_slice %371 {offsets = [0, 64], sizes = [2, 32], strides = [1, 1]} : vector<2x128xf32> to vector<2x32xf32>
    %385 = math.tanh %384 : vector<2x32xf32>
    %386 = vector.extract_strided_slice %371 {offsets = [0, 96], sizes = [2, 32], strides = [1, 1]} : vector<2x128xf32> to vector<2x32xf32>
    %387 = arith.negf %386 : vector<2x32xf32>
    %388 = math.exp %387 : vector<2x32xf32>
    %cst_81 = arith.constant 1.000000e+00 : f32
    %389 = vector.broadcast %cst_81 : f32 to vector<2x32xf32>
    %390 = arith.addf %389, %388 : vector<2x32xf32>
    %391 = arith.divf %389, %390 : vector<2x32xf32>
    %392 = arith.mulf %383, %335 : vector<2x32xf32>
    %393 = arith.mulf %377, %385 : vector<2x32xf32>
    %394 = arith.addf %392, %393 : vector<2x32xf32>
    %395 = math.tanh %394 : vector<2x32xf32>
    %396 = arith.mulf %391, %395 : vector<2x32xf32>
    %397 = tpu.concatenate %396, %366 in 1 : vector<2x32xf32>, vector<2x32xf32> -> vector<2x64xf32>
    %cst_82 = arith.constant dense<0.000000e+00> : vector<2x128xf32>
    %398 = tpu.matmul %397, %10, %cst_82 {dimension_numbers = #tpu.dot_dimension_numbers<[1], [0], [0], [1], [0, 0, 1, 1], [], []>} : vector<2x64xf32>, vector<64x128xf32>, vector<2x128xf32> -> vector<2x128xf32>
    %399 = vector.broadcast %11 : vector<1x128xf32> to vector<2x128xf32>
    %400 = arith.addf %398, %399 : vector<2x128xf32>
    %401 = vector.extract_strided_slice %400 {offsets = [0, 0], sizes = [2, 32], strides = [1, 1]} : vector<2x128xf32> to vector<2x32xf32>
    %402 = arith.negf %401 : vector<2x32xf32>
    %403 = math.exp %402 : vector<2x32xf32>
    %cst_83 = arith.constant 1.000000e+00 : f32
    %404 = vector.broadcast %cst_83 : f32 to vector<2x32xf32>
    %405 = arith.addf %404, %403 : vector<2x32xf32>
    %406 = arith.divf %404, %405 : vector<2x32xf32>
    %407 = vector.extract_strided_slice %400 {offsets = [0, 32], sizes = [2, 32], strides = [1, 1]} : vector<2x128xf32> to vector<2x32xf32>
    %408 = arith.negf %407 : vector<2x32xf32>
    %409 = math.exp %408 : vector<2x32xf32>
    %cst_84 = arith.constant 1.000000e+00 : f32
    %410 = vector.broadcast %cst_84 : f32 to vector<2x32xf32>
    %411 = arith.addf %410, %409 : vector<2x32xf32>
    %412 = arith.divf %410, %411 : vector<2x32xf32>
    %413 = vector.extract_strided_slice %400 {offsets = [0, 64], sizes = [2, 32], strides = [1, 1]} : vector<2x128xf32> to vector<2x32xf32>
    %414 = math.tanh %413 : vector<2x32xf32>
    %415 = vector.extract_strided_slice %400 {offsets = [0, 96], sizes = [2, 32], strides = [1, 1]} : vector<2x128xf32> to vector<2x32xf32>
    %416 = arith.negf %415 : vector<2x32xf32>
    %417 = math.exp %416 : vector<2x32xf32>
    %cst_85 = arith.constant 1.000000e+00 : f32
    %418 = vector.broadcast %cst_85 : f32 to vector<2x32xf32>
    %419 = arith.addf %418, %417 : vector<2x32xf32>
    %420 = arith.divf %418, %419 : vector<2x32xf32>
    %421 = arith.mulf %412, %364 : vector<2x32xf32>
    %422 = arith.mulf %406, %414 : vector<2x32xf32>
    %423 = arith.addf %421, %422 : vector<2x32xf32>
    %424 = math.tanh %423 : vector<2x32xf32>
    %425 = arith.mulf %420, %424 : vector<2x32xf32>
    %c7_i32 = arith.constant 7 : i32
    %426 = arith.index_cast %c7_i32 : i32 to index
    %c0_86 = arith.constant 0 : index
    %c0_87 = arith.constant 0 : index
    %427 = vector.load %arg9[%426, %c0_86, %c0_87] : memref<8x2x128xf32, #tpu.memory_space<vmem>>, vector<1x2x128xf32>
    %428 = vector.shape_cast %427 : vector<1x2x128xf32> to vector<2x128xf32>
    %cst_88 = arith.constant dense<0.000000e+00> : vector<2x128xf32>
    %429 = tpu.matmul %396, %9, %cst_88 {dimension_numbers = #tpu.dot_dimension_numbers<[1], [0], [0], [1], [0, 0, 1, 1], [], []>} : vector<2x32xf32>, vector<32x128xf32>, vector<2x128xf32> -> vector<2x128xf32>
    %430 = arith.addf %428, %429 : vector<2x128xf32>
    %431 = vector.extract_strided_slice %430 {offsets = [0, 0], sizes = [2, 32], strides = [1, 1]} : vector<2x128xf32> to vector<2x32xf32>
    %432 = arith.negf %431 : vector<2x32xf32>
    %433 = math.exp %432 : vector<2x32xf32>
    %cst_89 = arith.constant 1.000000e+00 : f32
    %434 = vector.broadcast %cst_89 : f32 to vector<2x32xf32>
    %435 = arith.addf %434, %433 : vector<2x32xf32>
    %436 = arith.divf %434, %435 : vector<2x32xf32>
    %437 = vector.extract_strided_slice %430 {offsets = [0, 32], sizes = [2, 32], strides = [1, 1]} : vector<2x128xf32> to vector<2x32xf32>
    %438 = arith.negf %437 : vector<2x32xf32>
    %439 = math.exp %438 : vector<2x32xf32>
    %cst_90 = arith.constant 1.000000e+00 : f32
    %440 = vector.broadcast %cst_90 : f32 to vector<2x32xf32>
    %441 = arith.addf %440, %439 : vector<2x32xf32>
    %442 = arith.divf %440, %441 : vector<2x32xf32>
    %443 = vector.extract_strided_slice %430 {offsets = [0, 64], sizes = [2, 32], strides = [1, 1]} : vector<2x128xf32> to vector<2x32xf32>
    %444 = math.tanh %443 : vector<2x32xf32>
    %445 = vector.extract_strided_slice %430 {offsets = [0, 96], sizes = [2, 32], strides = [1, 1]} : vector<2x128xf32> to vector<2x32xf32>
    %446 = arith.negf %445 : vector<2x32xf32>
    %447 = math.exp %446 : vector<2x32xf32>
    %cst_91 = arith.constant 1.000000e+00 : f32
    %448 = vector.broadcast %cst_91 : f32 to vector<2x32xf32>
    %449 = arith.addf %448, %447 : vector<2x32xf32>
    %450 = arith.divf %448, %449 : vector<2x32xf32>
    %451 = arith.mulf %442, %394 : vector<2x32xf32>
    %452 = arith.mulf %436, %444 : vector<2x32xf32>
    %453 = arith.addf %451, %452 : vector<2x32xf32>
    %454 = math.tanh %453 : vector<2x32xf32>
    %455 = arith.mulf %450, %454 : vector<2x32xf32>
    %456 = tpu.concatenate %455, %425 in 1 : vector<2x32xf32>, vector<2x32xf32> -> vector<2x64xf32>
    %cst_92 = arith.constant dense<0.000000e+00> : vector<2x128xf32>
    %457 = tpu.matmul %456, %10, %cst_92 {dimension_numbers = #tpu.dot_dimension_numbers<[1], [0], [0], [1], [0, 0, 1, 1], [], []>} : vector<2x64xf32>, vector<64x128xf32>, vector<2x128xf32> -> vector<2x128xf32>
    %458 = vector.broadcast %11 : vector<1x128xf32> to vector<2x128xf32>
    %459 = arith.addf %457, %458 : vector<2x128xf32>
    %460 = vector.extract_strided_slice %459 {offsets = [0, 0], sizes = [2, 32], strides = [1, 1]} : vector<2x128xf32> to vector<2x32xf32>
    %461 = arith.negf %460 : vector<2x32xf32>
    %462 = math.exp %461 : vector<2x32xf32>
    %cst_93 = arith.constant 1.000000e+00 : f32
    %463 = vector.broadcast %cst_93 : f32 to vector<2x32xf32>
    %464 = arith.addf %463, %462 : vector<2x32xf32>
    %465 = arith.divf %463, %464 : vector<2x32xf32>
    %466 = vector.extract_strided_slice %459 {offsets = [0, 32], sizes = [2, 32], strides = [1, 1]} : vector<2x128xf32> to vector<2x32xf32>
    %467 = arith.negf %466 : vector<2x32xf32>
    %468 = math.exp %467 : vector<2x32xf32>
    %cst_94 = arith.constant 1.000000e+00 : f32
    %469 = vector.broadcast %cst_94 : f32 to vector<2x32xf32>
    %470 = arith.addf %469, %468 : vector<2x32xf32>
    %471 = arith.divf %469, %470 : vector<2x32xf32>
    %472 = vector.extract_strided_slice %459 {offsets = [0, 64], sizes = [2, 32], strides = [1, 1]} : vector<2x128xf32> to vector<2x32xf32>
    %473 = math.tanh %472 : vector<2x32xf32>
    %474 = vector.extract_strided_slice %459 {offsets = [0, 96], sizes = [2, 32], strides = [1, 1]} : vector<2x128xf32> to vector<2x32xf32>
    %475 = arith.negf %474 : vector<2x32xf32>
    %476 = math.exp %475 : vector<2x32xf32>
    %cst_95 = arith.constant 1.000000e+00 : f32
    %477 = vector.broadcast %cst_95 : f32 to vector<2x32xf32>
    %478 = arith.addf %477, %476 : vector<2x32xf32>
    %479 = arith.divf %477, %478 : vector<2x32xf32>
    %480 = arith.mulf %471, %423 : vector<2x32xf32>
    %481 = arith.mulf %465, %473 : vector<2x32xf32>
    %482 = arith.addf %480, %481 : vector<2x32xf32>
    %483 = math.tanh %482 : vector<2x32xf32>
    %484 = arith.mulf %479, %483 : vector<2x32xf32>
    %c8_i32 = arith.constant 8 : i32
    %c0_96 = arith.constant 0 : index
    %c0_97 = arith.constant 0 : index
    %485 = vector.load %arg6[%c0_96, %c0_97] : memref<32x32xf32, #tpu.memory_space<vmem>>, vector<32x32xf32>
    %cst_98 = arith.constant dense<0.000000e+00> : vector<2x32xf32>
    %486 = tpu.matmul %484, %485, %cst_98 {dimension_numbers = #tpu.dot_dimension_numbers<[1], [0], [0], [1], [0, 0, 1, 1], [], []>} : vector<2x32xf32>, vector<32x32xf32>, vector<2x32xf32> -> vector<2x32xf32>
    %c0_99 = arith.constant 0 : index
    %c0_100 = arith.constant 0 : index
    %487 = vector.load %arg7[%c0_99, %c0_100] : memref<1x32xf32, #tpu.memory_space<vmem>>, vector<1x32xf32>
    %488 = vector.broadcast %487 : vector<1x32xf32> to vector<2x32xf32>
    %489 = arith.addf %486, %488 : vector<2x32xf32>
    %c0_101 = arith.constant 0 : index
    %c0_102 = arith.constant 0 : index
    %490 = vector.load %arg8[%c0_101, %c0_102] : memref<2x32xf32, #tpu.memory_space<vmem>>, vector<2x32xf32>
    tpu.vector_store %arg8[%c0_101, %c0_102], %489 {strides = array<i32>} : memref<2x32xf32, #tpu.memory_space<vmem>>, vector<2x32xf32>,
    return
  }
}

module attributes {stable_mosaic.version = 11 : i64} {
  func.func @_decode_kernel(%arg0: i32, %arg1: memref<2x32x32xf32, #tpu.memory_space<vmem>>, %arg2: memref<2x32x16xf32, #tpu.memory_space<vmem>>, %arg3: memref<2x32xf32, #tpu.memory_space<vmem>>, %arg4: memref<2x32xf32, #tpu.memory_space<vmem>>, %arg5: memref<10x32xf32, #tpu.memory_space<vmem>>, %arg6: memref<64x128xf32, #tpu.memory_space<vmem>>, %arg7: memref<1x128xf32, #tpu.memory_space<vmem>>, %arg8: memref<64x128xf32, #tpu.memory_space<vmem>>, %arg9: memref<1x128xf32, #tpu.memory_space<vmem>>, %arg10: memref<32x16xf32, #tpu.memory_space<vmem>>, %arg11: memref<1x16xf32, #tpu.memory_space<vmem>>, %arg12: memref<1x1x16xf32, #tpu.memory_space<vmem>>, %arg13: memref<1x1xf32, #tpu.memory_space<vmem>>, %arg14: memref<32x128xf32, #tpu.memory_space<vmem>>, %arg15: memref<32x128xf32, #tpu.memory_space<vmem>>, %arg16: memref<32x128xf32, #tpu.memory_space<vmem>>, %arg17: memref<1x128xf32, #tpu.memory_space<vmem>>, %arg18: memref<5x2x128xf32, #tpu.memory_space<vmem>>) attributes {dimension_semantics = [#tpu.dimension_semantics<parallel>], iteration_bounds = array<i64: 1>, scalar_prefetch = 0 : i64, scratch_operands = 0 : i64, tpu.core_type = #tpu.core_type<tc>, window_params = [{transform_indices = @transform_0, window_bounds = array<i64: 2, 32, 32>}, {transform_indices = @transform_1, window_bounds = array<i64: 2, 32, 16>}, {transform_indices = @transform_2, window_bounds = array<i64: 2, 32>}, {transform_indices = @transform_3, window_bounds = array<i64: 2, 32>}, {pipeline_mode = #tpu.pipeline_mode<synchronous>, transform_indices = @transform_4, window_bounds = array<i64: 10, 32>}, {pipeline_mode = #tpu.pipeline_mode<synchronous>, transform_indices = @transform_5, window_bounds = array<i64: 64, 128>}, {pipeline_mode = #tpu.pipeline_mode<synchronous>, transform_indices = @transform_6, window_bounds = array<i64: 1, 128>}, {pipeline_mode = #tpu.pipeline_mode<synchronous>, transform_indices = @transform_7, window_bounds = array<i64: 64, 128>}, {pipeline_mode = #tpu.pipeline_mode<synchronous>, transform_indices = @transform_8, window_bounds = array<i64: 1, 128>}, {pipeline_mode = #tpu.pipeline_mode<synchronous>, transform_indices = @transform_9, window_bounds = array<i64: 32, 16>}, {pipeline_mode = #tpu.pipeline_mode<synchronous>, transform_indices = @transform_10, window_bounds = array<i64: 1, 16>}, {pipeline_mode = #tpu.pipeline_mode<synchronous>, transform_indices = @transform_11, window_bounds = array<i64: 1, 1, 16>}, {pipeline_mode = #tpu.pipeline_mode<synchronous>, transform_indices = @transform_12, window_bounds = array<i64: 1, 1>}, {pipeline_mode = #tpu.pipeline_mode<synchronous>, transform_indices = @transform_13, window_bounds = array<i64: 32, 128>}, {pipeline_mode = #tpu.pipeline_mode<synchronous>, transform_indices = @transform_14, window_bounds = array<i64: 32, 128>}, {pipeline_mode = #tpu.pipeline_mode<synchronous>, transform_indices = @transform_15, window_bounds = array<i64: 32, 128>}, {pipeline_mode = #tpu.pipeline_mode<synchronous>, transform_indices = @transform_16, window_bounds = array<i64: 1, 128>}, {transform_indices = @transform_17, window_bounds = array<i64: 5, 2, 128>}]} {
    %c0 = arith.constant 0 : index
    %c0_0 = arith.constant 0 : index
    %c0_1 = arith.constant 0 : index
    %0 = vector.load %arg1[%c0, %c0_0, %c0_1] : memref<2x32x32xf32, #tpu.memory_space<vmem>>, vector<2x32x32xf32>
    %c0_2 = arith.constant 0 : index
    %c0_3 = arith.constant 0 : index
    %c0_4 = arith.constant 0 : index
    %1 = vector.load %arg2[%c0_2, %c0_3, %c0_4] : memref<2x32x16xf32, #tpu.memory_space<vmem>>, vector<2x32x16xf32>
    %c0_5 = arith.constant 0 : index
    %c0_6 = arith.constant 0 : index
    %2 = vector.load %arg3[%c0_5, %c0_6] : memref<2x32xf32, #tpu.memory_space<vmem>>, vector<2x32xf32>
    %c0_7 = arith.constant 0 : index
    %c0_8 = arith.constant 0 : index
    %3 = vector.load %arg5[%c0_7, %c0_8] : memref<10x32xf32, #tpu.memory_space<vmem>>, vector<10x32xf32>
    %c0_9 = arith.constant 0 : index
    %c0_10 = arith.constant 0 : index
    %4 = vector.load %arg6[%c0_9, %c0_10] : memref<64x128xf32, #tpu.memory_space<vmem>>, vector<64x128xf32>
    %c0_11 = arith.constant 0 : index
    %c0_12 = arith.constant 0 : index
    %5 = vector.load %arg7[%c0_11, %c0_12] : memref<1x128xf32, #tpu.memory_space<vmem>>, vector<1x128xf32>
    %c0_13 = arith.constant 0 : index
    %c0_14 = arith.constant 0 : index
    %6 = vector.load %arg8[%c0_13, %c0_14] : memref<64x128xf32, #tpu.memory_space<vmem>>, vector<64x128xf32>
    %c0_15 = arith.constant 0 : index
    %c0_16 = arith.constant 0 : index
    %7 = vector.load %arg9[%c0_15, %c0_16] : memref<1x128xf32, #tpu.memory_space<vmem>>, vector<1x128xf32>
    %c0_17 = arith.constant 0 : index
    %c0_18 = arith.constant 0 : index
    %8 = vector.load %arg10[%c0_17, %c0_18] : memref<32x16xf32, #tpu.memory_space<vmem>>, vector<32x16xf32>
    %c0_19 = arith.constant 0 : index
    %c0_20 = arith.constant 0 : index
    %9 = vector.load %arg11[%c0_19, %c0_20] : memref<1x16xf32, #tpu.memory_space<vmem>>, vector<1x16xf32>
    %c0_21 = arith.constant 0 : index
    %c0_22 = arith.constant 0 : index
    %c0_23 = arith.constant 0 : index
    %10 = vector.load %arg12[%c0_21, %c0_22, %c0_23] : memref<1x1x16xf32, #tpu.memory_space<vmem>>, vector<1x1x16xf32>
    %c0_24 = arith.constant 0 : index
    %c0_25 = arith.constant 0 : index
    %11 = vector.load %arg13[%c0_24, %c0_25] : memref<1x1xf32, #tpu.memory_space<vmem>>, vector<1x1xf32>
    %c0_26 = arith.constant 0 : index
    %c0_27 = arith.constant 0 : index
    %12 = vector.load %arg14[%c0_26, %c0_27] : memref<32x128xf32, #tpu.memory_space<vmem>>, vector<32x128xf32>
    %c0_28 = arith.constant 0 : index
    %c0_29 = arith.constant 0 : index
    %13 = vector.load %arg15[%c0_28, %c0_29] : memref<32x128xf32, #tpu.memory_space<vmem>>, vector<32x128xf32>
    %cst = arith.constant 0.000000e+00 : f32
    %14 = vector.broadcast %cst : f32 to vector<2x32xf32>
    %15 = tpu.concatenate %2, %14 in 1 : vector<2x32xf32>, vector<2x32xf32> -> vector<2x64xf32>
    %cst_30 = arith.constant dense<0.000000e+00> : vector<2x128xf32>
    %16 = tpu.matmul %15, %4, %cst_30 {dimension_numbers = #tpu.dot_dimension_numbers<[1], [0], [0], [1], [0, 0, 1, 1], [], []>} : vector<2x64xf32>, vector<64x128xf32>, vector<2x128xf32> -> vector<2x128xf32>
    %17 = vector.broadcast %5 : vector<1x128xf32> to vector<2x128xf32>
    %18 = arith.addf %16, %17 : vector<2x128xf32>
    %19 = vector.extract_strided_slice %18 {offsets = [0, 0], sizes = [2, 32], strides = [1, 1]} : vector<2x128xf32> to vector<2x32xf32>
    %20 = arith.negf %19 : vector<2x32xf32>
    %21 = math.exp %20 : vector<2x32xf32>
    %cst_31 = arith.constant 1.000000e+00 : f32
    %22 = vector.broadcast %cst_31 : f32 to vector<2x32xf32>
    %23 = arith.addf %22, %21 : vector<2x32xf32>
    %24 = arith.divf %22, %23 : vector<2x32xf32>
    %25 = vector.extract_strided_slice %18 {offsets = [0, 32], sizes = [2, 32], strides = [1, 1]} : vector<2x128xf32> to vector<2x32xf32>
    %26 = arith.negf %25 : vector<2x32xf32>
    %27 = math.exp %26 : vector<2x32xf32>
    %cst_32 = arith.constant 1.000000e+00 : f32
    %28 = vector.broadcast %cst_32 : f32 to vector<2x32xf32>
    %29 = arith.addf %28, %27 : vector<2x32xf32>
    %30 = arith.divf %28, %29 : vector<2x32xf32>
    %31 = vector.extract_strided_slice %18 {offsets = [0, 64], sizes = [2, 32], strides = [1, 1]} : vector<2x128xf32> to vector<2x32xf32>
    %32 = math.tanh %31 : vector<2x32xf32>
    %33 = vector.extract_strided_slice %18 {offsets = [0, 96], sizes = [2, 32], strides = [1, 1]} : vector<2x128xf32> to vector<2x32xf32>
    %34 = arith.negf %33 : vector<2x32xf32>
    %35 = math.exp %34 : vector<2x32xf32>
    %cst_33 = arith.constant 1.000000e+00 : f32
    %36 = vector.broadcast %cst_33 : f32 to vector<2x32xf32>
    %37 = arith.addf %36, %35 : vector<2x32xf32>
    %38 = arith.divf %36, %37 : vector<2x32xf32>
    %39 = arith.mulf %30, %14 : vector<2x32xf32>
    %40 = arith.mulf %24, %32 : vector<2x32xf32>
    %41 = arith.addf %39, %40 : vector<2x32xf32>
    %42 = math.tanh %41 : vector<2x32xf32>
    %43 = arith.mulf %38, %42 : vector<2x32xf32>
    %44 = tpu.concatenate %43, %14 in 1 : vector<2x32xf32>, vector<2x32xf32> -> vector<2x64xf32>
    %cst_34 = arith.constant dense<0.000000e+00> : vector<2x128xf32>
    %45 = tpu.matmul %44, %6, %cst_34 {dimension_numbers = #tpu.dot_dimension_numbers<[1], [0], [0], [1], [0, 0, 1, 1], [], []>} : vector<2x64xf32>, vector<64x128xf32>, vector<2x128xf32> -> vector<2x128xf32>
    %46 = vector.broadcast %7 : vector<1x128xf32> to vector<2x128xf32>
    %47 = arith.addf %45, %46 : vector<2x128xf32>
    %48 = vector.extract_strided_slice %47 {offsets = [0, 0], sizes = [2, 32], strides = [1, 1]} : vector<2x128xf32> to vector<2x32xf32>
    %49 = arith.negf %48 : vector<2x32xf32>
    %50 = math.exp %49 : vector<2x32xf32>
    %cst_35 = arith.constant 1.000000e+00 : f32
    %51 = vector.broadcast %cst_35 : f32 to vector<2x32xf32>
    %52 = arith.addf %51, %50 : vector<2x32xf32>
    %53 = arith.divf %51, %52 : vector<2x32xf32>
    %54 = vector.extract_strided_slice %47 {offsets = [0, 32], sizes = [2, 32], strides = [1, 1]} : vector<2x128xf32> to vector<2x32xf32>
    %55 = arith.negf %54 : vector<2x32xf32>
    %56 = math.exp %55 : vector<2x32xf32>
    %cst_36 = arith.constant 1.000000e+00 : f32
    %57 = vector.broadcast %cst_36 : f32 to vector<2x32xf32>
    %58 = arith.addf %57, %56 : vector<2x32xf32>
    %59 = arith.divf %57, %58 : vector<2x32xf32>
    %60 = vector.extract_strided_slice %47 {offsets = [0, 64], sizes = [2, 32], strides = [1, 1]} : vector<2x128xf32> to vector<2x32xf32>
    %61 = math.tanh %60 : vector<2x32xf32>
    %62 = vector.extract_strided_slice %47 {offsets = [0, 96], sizes = [2, 32], strides = [1, 1]} : vector<2x128xf32> to vector<2x32xf32>
    %63 = arith.negf %62 : vector<2x32xf32>
    %64 = math.exp %63 : vector<2x32xf32>
    %cst_37 = arith.constant 1.000000e+00 : f32
    %65 = vector.broadcast %cst_37 : f32 to vector<2x32xf32>
    %66 = arith.addf %65, %64 : vector<2x32xf32>
    %67 = arith.divf %65, %66 : vector<2x32xf32>
    %68 = arith.mulf %59, %14 : vector<2x32xf32>
    %69 = arith.mulf %53, %61 : vector<2x32xf32>
    %70 = arith.addf %68, %69 : vector<2x32xf32>
    %71 = math.tanh %70 : vector<2x32xf32>
    %72 = arith.mulf %67, %71 : vector<2x32xf32>
    %c0_38 = arith.constant 0 : index
    %c0_39 = arith.constant 0 : index
    %73 = vector.load %arg16[%c0_38, %c0_39] : memref<32x128xf32, #tpu.memory_space<vmem>>, vector<32x128xf32>
    %cst_40 = arith.constant dense<0.000000e+00> : vector<2x128xf32>
    %74 = tpu.matmul %2, %73, %cst_40 {dimension_numbers = #tpu.dot_dimension_numbers<[1], [0], [0], [1], [0, 0, 1, 1], [], []>} : vector<2x32xf32>, vector<32x128xf32>, vector<2x128xf32> -> vector<2x128xf32>
    %c0_41 = arith.constant 0 : index
    %c0_42 = arith.constant 0 : index
    %75 = vector.load %arg17[%c0_41, %c0_42] : memref<1x128xf32, #tpu.memory_space<vmem>>, vector<1x128xf32>
    %76 = vector.broadcast %75 : vector<1x128xf32> to vector<2x128xf32>
    %77 = arith.addf %74, %76 : vector<2x128xf32>
    %c0_43 = arith.constant 0 : index
    %c0_44 = arith.constant 0 : index
    %78 = vector.load %arg4[%c0_43, %c0_44] : memref<2x32xf32, #tpu.memory_space<vmem>>, vector<2x32xf32>
    %c0_i32 = arith.constant 0 : i32
    %c5_i32 = arith.constant 5 : i32
    %79 = arith.addi %c0_i32, %c5_i32 : i32
    %c1_i32 = arith.constant 1 : i32
    %80:5 = scf.for %arg19 = %c0_i32 to %79 step %c1_i32 iter_args(%arg20 = %43, %arg21 = %41, %arg22 = %72, %arg23 = %70, %arg24 = %78) -> (vector<2x32xf32>, vector<2x32xf32>, vector<2x32xf32>, vector<2x32xf32>, vector<2x32xf32>)  : i32 {
      %81 = tpu.concatenate %arg24, %arg20 in 1 : vector<2x32xf32>, vector<2x32xf32> -> vector<2x64xf32>
      %cst_46 = arith.constant dense<0.000000e+00> : vector<2x128xf32>
      %82 = tpu.matmul %81, %4, %cst_46 {dimension_numbers = #tpu.dot_dimension_numbers<[1], [0], [0], [1], [0, 0, 1, 1], [], []>} : vector<2x64xf32>, vector<64x128xf32>, vector<2x128xf32> -> vector<2x128xf32>
      %83 = vector.broadcast %5 : vector<1x128xf32> to vector<2x128xf32>
      %84 = arith.addf %82, %83 : vector<2x128xf32>
      %85 = vector.extract_strided_slice %84 {offsets = [0, 0], sizes = [2, 32], strides = [1, 1]} : vector<2x128xf32> to vector<2x32xf32>
      %86 = arith.negf %85 : vector<2x32xf32>
      %87 = math.exp %86 : vector<2x32xf32>
      %cst_47 = arith.constant 1.000000e+00 : f32
      %88 = vector.broadcast %cst_47 : f32 to vector<2x32xf32>
      %89 = arith.addf %88, %87 : vector<2x32xf32>
      %90 = arith.divf %88, %89 : vector<2x32xf32>
      %91 = vector.extract_strided_slice %84 {offsets = [0, 32], sizes = [2, 32], strides = [1, 1]} : vector<2x128xf32> to vector<2x32xf32>
      %92 = arith.negf %91 : vector<2x32xf32>
      %93 = math.exp %92 : vector<2x32xf32>
      %cst_48 = arith.constant 1.000000e+00 : f32
      %94 = vector.broadcast %cst_48 : f32 to vector<2x32xf32>
      %95 = arith.addf %94, %93 : vector<2x32xf32>
      %96 = arith.divf %94, %95 : vector<2x32xf32>
      %97 = vector.extract_strided_slice %84 {offsets = [0, 64], sizes = [2, 32], strides = [1, 1]} : vector<2x128xf32> to vector<2x32xf32>
      %98 = math.tanh %97 : vector<2x32xf32>
      %99 = vector.extract_strided_slice %84 {offsets = [0, 96], sizes = [2, 32], strides = [1, 1]} : vector<2x128xf32> to vector<2x32xf32>
      %100 = arith.negf %99 : vector<2x32xf32>
      %101 = math.exp %100 : vector<2x32xf32>
      %cst_49 = arith.constant 1.000000e+00 : f32
      %102 = vector.broadcast %cst_49 : f32 to vector<2x32xf32>
      %103 = arith.addf %102, %101 : vector<2x32xf32>
      %104 = arith.divf %102, %103 : vector<2x32xf32>
      %105 = arith.mulf %96, %arg21 : vector<2x32xf32>
      %106 = arith.mulf %90, %98 : vector<2x32xf32>
      %107 = arith.addf %105, %106 : vector<2x32xf32>
      %108 = math.tanh %107 : vector<2x32xf32>
      %109 = arith.mulf %104, %108 : vector<2x32xf32>
      %110 = tpu.concatenate %109, %arg22 in 1 : vector<2x32xf32>, vector<2x32xf32> -> vector<2x64xf32>
      %cst_50 = arith.constant dense<0.000000e+00> : vector<2x128xf32>
      %111 = tpu.matmul %110, %6, %cst_50 {dimension_numbers = #tpu.dot_dimension_numbers<[1], [0], [0], [1], [0, 0, 1, 1], [], []>} : vector<2x64xf32>, vector<64x128xf32>, vector<2x128xf32> -> vector<2x128xf32>
      %112 = vector.broadcast %7 : vector<1x128xf32> to vector<2x128xf32>
      %113 = arith.addf %111, %112 : vector<2x128xf32>
      %114 = vector.extract_strided_slice %113 {offsets = [0, 0], sizes = [2, 32], strides = [1, 1]} : vector<2x128xf32> to vector<2x32xf32>
      %115 = arith.negf %114 : vector<2x32xf32>
      %116 = math.exp %115 : vector<2x32xf32>
      %cst_51 = arith.constant 1.000000e+00 : f32
      %117 = vector.broadcast %cst_51 : f32 to vector<2x32xf32>
      %118 = arith.addf %117, %116 : vector<2x32xf32>
      %119 = arith.divf %117, %118 : vector<2x32xf32>
      %120 = vector.extract_strided_slice %113 {offsets = [0, 32], sizes = [2, 32], strides = [1, 1]} : vector<2x128xf32> to vector<2x32xf32>
      %121 = arith.negf %120 : vector<2x32xf32>
      %122 = math.exp %121 : vector<2x32xf32>
      %cst_52 = arith.constant 1.000000e+00 : f32
      %123 = vector.broadcast %cst_52 : f32 to vector<2x32xf32>
      %124 = arith.addf %123, %122 : vector<2x32xf32>
      %125 = arith.divf %123, %124 : vector<2x32xf32>
      %126 = vector.extract_strided_slice %113 {offsets = [0, 64], sizes = [2, 32], strides = [1, 1]} : vector<2x128xf32> to vector<2x32xf32>
      %127 = math.tanh %126 : vector<2x32xf32>
      %128 = vector.extract_strided_slice %113 {offsets = [0, 96], sizes = [2, 32], strides = [1, 1]} : vector<2x128xf32> to vector<2x32xf32>
      %129 = arith.negf %128 : vector<2x32xf32>
      %130 = math.exp %129 : vector<2x32xf32>
      %cst_53 = arith.constant 1.000000e+00 : f32
      %131 = vector.broadcast %cst_53 : f32 to vector<2x32xf32>
      %132 = arith.addf %131, %130 : vector<2x32xf32>
      %133 = arith.divf %131, %132 : vector<2x32xf32>
      %134 = arith.mulf %125, %arg23 : vector<2x32xf32>
      %135 = arith.mulf %119, %127 : vector<2x32xf32>
      %136 = arith.addf %134, %135 : vector<2x32xf32>
      %137 = math.tanh %136 : vector<2x32xf32>
      %138 = arith.mulf %133, %137 : vector<2x32xf32>
      %cst_54 = arith.constant dense<0.000000e+00> : vector<2x16xf32>
      %139 = tpu.matmul %138, %8, %cst_54 {dimension_numbers = #tpu.dot_dimension_numbers<[1], [0], [0], [1], [0, 0, 1, 1], [], []>} : vector<2x32xf32>, vector<32x16xf32>, vector<2x16xf32> -> vector<2x16xf32>
      %140 = vector.broadcast %9 : vector<1x16xf32> to vector<2x16xf32>
      %141 = arith.addf %139, %140 : vector<2x16xf32>
      %142 = vector.shape_cast %141 : vector<2x16xf32> to vector<2x1x16xf32>
      %143 = vector.broadcast %142 : vector<2x1x16xf32> to vector<2x32x16xf32>
      %144 = arith.addf %1, %143 : vector<2x32x16xf32>
      %145 = math.tanh %144 : vector<2x32x16xf32>
      %146 = vector.broadcast %10 : vector<1x1x16xf32> to vector<2x32x16xf32>
      %147 = arith.mulf %145, %146 : vector<2x32x16xf32>
      %cst_55 = arith.constant dense<0.000000e+00> : vector<2x32xf32>
      %148 = vector.multi_reduction <add>, %147, %cst_55 [2] : vector<2x32x16xf32> to vector<2x32xf32>
      %149 = vector.broadcast %11 : vector<1x1xf32> to vector<2x32xf32>
      %150 = arith.addf %148, %149 : vector<2x32xf32>
      %cst_56 = arith.constant dense<0xFF800000> : vector<2xf32>
      %151 = vector.multi_reduction <maximumf>, %150, %cst_56 [1] : vector<2x32xf32> to vector<2xf32>
      %152 = vector.shape_cast %151 : vector<2xf32> to vector<2x1xf32>
      %153 = vector.broadcast %152 : vector<2x1xf32> to vector<2x32xf32>
      %154 = arith.subf %150, %153 : vector<2x32xf32>
      %155 = math.exp %154 : vector<2x32xf32>
      %cst_57 = arith.constant dense<0.000000e+00> : vector<2xf32>
      %156 = vector.multi_reduction <add>, %155, %cst_57 [1] : vector<2x32xf32> to vector<2xf32>
      %157 = vector.shape_cast %156 : vector<2xf32> to vector<2x1xf32>
      %158 = vector.broadcast %157 : vector<2x1xf32> to vector<2x32xf32>
      %159 = arith.divf %155, %158 : vector<2x32xf32>
      %160 = vector.shape_cast %159 : vector<2x32xf32> to vector<2x32x1xf32>
      %161 = vector.broadcast %160 : vector<2x32x1xf32> to vector<2x32x32xf32>
      %162 = arith.mulf %161, %0 : vector<2x32x32xf32>
      %cst_58 = arith.constant dense<0.000000e+00> : vector<2x32xf32>
      %163 = vector.multi_reduction <add>, %162, %cst_58 [1] : vector<2x32x32xf32> to vector<2x32xf32>
      %cst_59 = arith.constant dense<0.000000e+00> : vector<2x128xf32>
      %164 = tpu.matmul %138, %12, %cst_59 {dimension_numbers = #tpu.dot_dimension_numbers<[1], [0], [0], [1], [0, 0, 1, 1], [], []>} : vector<2x32xf32>, vector<32x128xf32>, vector<2x128xf32> -> vector<2x128xf32>
      %cst_60 = arith.constant dense<0.000000e+00> : vector<2x128xf32>
      %165 = tpu.matmul %163, %13, %cst_60 {dimension_numbers = #tpu.dot_dimension_numbers<[1], [0], [0], [1], [0, 0, 1, 1], [], []>} : vector<2x32xf32>, vector<32x128xf32>, vector<2x128xf32> -> vector<2x128xf32>
      %166 = arith.addf %164, %165 : vector<2x128xf32>
      %167 = arith.addf %166, %77 : vector<2x128xf32>
      %cst_61 = arith.constant dense<0xFF800000> : vector<2xf32>
      %168 = vector.multi_reduction <maximumf>, %167, %cst_61 [1] : vector<2x128xf32> to vector<2xf32>
      %169 = vector.shape_cast %168 : vector<2xf32> to vector<2x1xf32>
      %170 = vector.broadcast %169 : vector<2x1xf32> to vector<2x128xf32>
      %171 = arith.subf %167, %170 : vector<2x128xf32>
      %172 = math.exp %171 : vector<2x128xf32>
      %cst_62 = arith.constant dense<0.000000e+00> : vector<2xf32>
      %173 = vector.multi_reduction <add>, %172, %cst_62 [1] : vector<2x128xf32> to vector<2xf32>
      %174 = vector.shape_cast %173 : vector<2xf32> to vector<2x1xf32>
      %175 = vector.broadcast %174 : vector<2x1xf32> to vector<2x128xf32>
      %176 = arith.divf %172, %175 : vector<2x128xf32>
      %177 = arith.index_cast %arg19 : i32 to index
      %c0_63 = arith.constant 0 : index
      %c0_64 = arith.constant 0 : index
      %178 = vector.load %arg18[%177, %c0_63, %c0_64] : memref<5x2x128xf32, #tpu.memory_space<vmem>>, vector<1x2x128xf32>
      %179 = vector.shape_cast %178 : vector<1x2x128xf32> to vector<2x128xf32>
      %180 = vector.shape_cast %176 : vector<2x128xf32> to vector<1x2x128xf32>
      tpu.vector_store %arg18[%177, %c0_63, %c0_64], %180 {strides = array<i32>} : memref<5x2x128xf32, #tpu.memory_space<vmem>>, vector<1x2x128xf32>,
      %181 = tpu.iota {dimensions = array<i32: 1>} : vector<2x128xi32>
      %cst_65 = arith.constant dense<0xFF800000> : vector<2xf32>
      %182 = vector.multi_reduction <maximumf>, %176, %cst_65 [1] : vector<2x128xf32> to vector<2xf32>
      %183 = vector.shape_cast %182 : vector<2xf32> to vector<2x1xf32>
      %184 = vector.broadcast %183 : vector<2x1xf32> to vector<2x128xf32>
      %185 = arith.cmpf oge, %176, %184 : vector<2x128xf32>
      %c128_i32 = arith.constant 128 : i32
      %186 = vector.broadcast %c128_i32 : i32 to vector<2x128xi32>
      %187 = arith.select %185, %181, %186 : vector<2x128xi1>, vector<2x128xi32>
      %cst_66 = arith.constant dense<2147483647> : vector<2xi32>
      %188 = vector.multi_reduction <minsi>, %187, %cst_66 [1] : vector<2x128xi32> to vector<2xi32>
      %189 = vector.shape_cast %188 : vector<2xi32> to vector<2x1xi32>
      %190 = tpu.iota {dimensions = array<i32: 1>} : vector<2x10xi32>
      %191 = vector.broadcast %189 : vector<2x1xi32> to vector<2x10xi32>
      %192 = arith.cmpi eq, %190, %191 : vector<2x10xi32>
      %193 = arith.extui %192 : vector<2x10xi1> to vector<2x10xi32>
      %194 = arith.sitofp %193 : vector<2x10xi32> to vector<2x10xf32>
      %cst_67 = arith.constant dense<0.000000e+00> : vector<2x32xf32>
      %195 = tpu.matmul %194, %3, %cst_67 {dimension_numbers = #tpu.dot_dimension_numbers<[1], [0], [0], [1], [0, 0, 1, 1], [], []>} : vector<2x10xf32>, vector<10x32xf32>, vector<2x32xf32> -> vector<2x32xf32>
      scf.yield %109, %107, %138, %136, %195 : vector<2x32xf32>, vector<2x32xf32>, vector<2x32xf32>, vector<2x32xf32>, vector<2x32xf32>
    }
    %c5_i32_45 = arith.constant 5 : i32
    return
  }
  func.func @transform_0(%arg0: i32) -> (i32, i32, i32) {
    %c0_i32 = arith.constant 0 : i32
    %c0_i32_0 = arith.constant 0 : i32
    %c0_i32_1 = arith.constant 0 : i32
    return %arg0, %c0_i32, %c0_i32_0 : i32, i32, i32
  }
  func.func @transform_1(%arg0: i32) -> (i32, i32, i32) {
    %c0_i32 = arith.constant 0 : i32
    %c0_i32_0 = arith.constant 0 : i32
    %c0_i32_1 = arith.constant 0 : i32
    return %arg0, %c0_i32, %c0_i32_0 : i32, i32, i32
  }
  func.func @transform_2(%arg0: i32) -> (i32, i32) {
    %c0_i32 = arith.constant 0 : i32
    %c0_i32_0 = arith.constant 0 : i32
    return %arg0, %c0_i32 : i32, i32
  }
  func.func @transform_3(%arg0: i32) -> (i32, i32) {
    %c0_i32 = arith.constant 0 : i32
    %c0_i32_0 = arith.constant 0 : i32
    return %arg0, %c0_i32 : i32, i32
  }
  func.func @transform_4(%arg0: i32) -> (i32, i32) {
    %c0_i32 = arith.constant 0 : i32
    %c0_i32_0 = arith.constant 0 : i32
    %c0_i32_1 = arith.constant 0 : i32
    return %c0_i32, %c0_i32_0 : i32, i32
  }
  func.func @transform_5(%arg0: i32) -> (i32, i32) {
    %c0_i32 = arith.constant 0 : i32
    %c0_i32_0 = arith.constant 0 : i32
    %c0_i32_1 = arith.constant 0 : i32
    return %c0_i32, %c0_i32_0 : i32, i32
  }
  func.func @transform_6(%arg0: i32) -> (i32, i32) {
    %c0_i32 = arith.constant 0 : i32
    %c0_i32_0 = arith.constant 0 : i32
    %c0_i32_1 = arith.constant 0 : i32
    return %c0_i32, %c0_i32_0 : i32, i32
  }
  func.func @transform_7(%arg0: i32) -> (i32, i32) {
    %c0_i32 = arith.constant 0 : i32
    %c0_i32_0 = arith.constant 0 : i32
    %c0_i32_1 = arith.constant 0 : i32
    return %c0_i32, %c0_i32_0 : i32, i32
  }
  func.func @transform_8(%arg0: i32) -> (i32, i32) {
    %c0_i32 = arith.constant 0 : i32
    %c0_i32_0 = arith.constant 0 : i32
    %c0_i32_1 = arith.constant 0 : i32
    return %c0_i32, %c0_i32_0 : i32, i32
  }
  func.func @transform_9(%arg0: i32) -> (i32, i32) {
    %c0_i32 = arith.constant 0 : i32
    %c0_i32_0 = arith.constant 0 : i32
    %c0_i32_1 = arith.constant 0 : i32
    return %c0_i32, %c0_i32_0 : i32, i32
  }
  func.func @transform_10(%arg0: i32) -> (i32, i32) {
    %c0_i32 = arith.constant 0 : i32
    %c0_i32_0 = arith.constant 0 : i32
    %c0_i32_1 = arith.constant 0 : i32
    return %c0_i32, %c0_i32_0 : i32, i32
  }
  func.func @transform_11(%arg0: i32) -> (i32, i32, i32) {
    %c0_i32 = arith.constant 0 : i32
    %c0_i32_0 = arith.constant 0 : i32
    %c0_i32_1 = arith.constant 0 : i32
    %c0_i32_2 = arith.constant 0 : i32
    return %c0_i32, %c0_i32_0, %c0_i32_1 : i32, i32, i32
  }
  func.func @transform_12(%arg0: i32) -> (i32, i32) {
    %c0_i32 = arith.constant 0 : i32
    %c0_i32_0 = arith.constant 0 : i32
    %c0_i32_1 = arith.constant 0 : i32
    return %c0_i32, %c0_i32_0 : i32, i32
  }
  func.func @transform_13(%arg0: i32) -> (i32, i32) {
    %c0_i32 = arith.constant 0 : i32
    %c0_i32_0 = arith.constant 0 : i32
    %c0_i32_1 = arith.constant 0 : i32
    return %c0_i32, %c0_i32_0 : i32, i32
  }
  func.func @transform_14(%arg0: i32) -> (i32, i32) {
    %c0_i32 = arith.constant 0 : i32
    %c0_i32_0 = arith.constant 0 : i32
    %c0_i32_1 = arith.constant 0 : i32
    return %c0_i32, %c0_i32_0 : i32, i32
  }
  func.func @transform_15(%arg0: i32) -> (i32, i32) {
    %c0_i32 = arith.constant 0 : i32
    %c0_i32_0 = arith.constant 0 : i32
    %c0_i32_1 = arith.constant 0 : i32
    return %c0_i32, %c0_i32_0 : i32, i32
  }
  func.func @transform_16(%arg0: i32) -> (i32, i32) {
    %c0_i32 = arith.constant 0 : i32
    %c0_i32_0 = arith.constant 0 : i32
    %c0_i32_1 = arith.constant 0 : i32
    return %c0_i32, %c0_i32_0 : i32, i32
  }
  func.func @transform_17(%arg0: i32) -> (i32, i32, i32) {
    %c0_i32 = arith.constant 0 : i32
    %c0_i32_0 = arith.constant 0 : i32
    %c0_i32_1 = arith.constant 0 : i32
    return %c0_i32, %arg0, %c0_i32_0 : i32, i32, i32
  }
}

</mosaic_0001>

<bundles_post_ra>
// kernel: sar_head_forward.4
= control target key start
LH: loop header
LB: loop body
LE: loop exit
PB: predicated region body
PF: predicated region fallthrough
CT: control target
= control target key end

     0   :  { %8 = vsyncpa [#allocation3], 0  ;;  %s2276_s0 = inlined_call_operand.hbm [shape: f32[2,6,10,32], index: 0, kind: input, shape index: {}]   ;;  %s2277_s1 = inlined_call_operand.hbm [shape: f32[9,32,16], index: 1, kind: input, shape index: {}]   ;;  %s2278_s2 = inlined_call_operand.hbm [shape: f32[1,16], index: 2, kind: input, shape index: {}]   ;;  %s2279_s3 = inlined_call_operand.hbm [shape: f32[2,32,16], index: 3, kind: output, shape index: {}]  }
   0x1   :  { %10 = vsyncpa [#allocation3 + $0x1], 0 }
   0x2   :  { %11 = vsyncpa [#allocation6], 0 }
   0x3   :  { %12 = vsyncpa [#allocation4], 0 }
   0x4   :  { %14 = vsyncpa [#allocation4 + $0x1], 0  ;;  %s1893_s12 = smov 0   ;;  %s1895_s13 = smov 0  }
   0x5   :  { %s1897_s14 = smov 0   ;;  %s1899_s15 = smov 0  }
   0x6 LB: > { %s1914_s16 = sadd.s32 4294967295, %s1863_s15   ;;  %s1274_s17 = sadd.s32 4294967294, %s1863_s15   ;;  %s1863_s15 = sphi %s1899_s15, %s2299_s15   ;;  %s1859_s14 = sphi %s1897_s14, %s2298_s14   ;;  %s1855_s13 = sphi %s1895_s13, %s2297_s13   ;;  %s1851_s12 = sphi %s1893_s12, %s2296_s12  }
   0x7   : > { %p40_p0 = scmp.ne.s32.totalorder %s1855_s13, %s1851_s12  ;;  %p2280_p1 = scmp.eq.s32.totalorder %s1914_s16, 0 }
   0x8   : > { %p112_p3 = scmp.eq.s32.totalorder %s1274_s17, 1  ;;  %p1275_p5 = scmp.ge.s32.totalorder %s1863_s15, 1 }
   0x9   : > { %p1923_p4 = por %p2280_p1, %p40_p0  ;;  %p119_p7 = scmp.lt.s32.totalorder %s1863_s15, 3 }
   0xa   : > { %p1928_p6 = por %p112_p3, %p40_p0  ;;  %s1865_s21 = smov [#allocation5]  }
   0xb   : > { %s2283_s18 = scalar_select %p1923_p4, 1, 0 }
   0xc   : > { %s2284_s19 = scalar_select %p1928_p6, 1, 0 }
   0xd   : > { %p1933_p8 = pnand %p1275_p5, %p119_p7  ;;  %s131_s22 = sshll.u32 %s1865_s21, 4  ;;  %s1937_s22 = int_to_ptr.vmem [resolvable:$true] %s131_s22 }
   0xe   : > { %s1866_s24 = smov [#allocation7]   ;;  %s1707_s28 = scalar_lea.hbm %s2277_s1, 4608 }
   0xf   : > { %p1648_p9 = pneg %p1933_p8  ;;  %s145_s25 = sshll.u32 %s1866_s24, 4  ;;  %s1948_s25 = int_to_ptr.vmem [resolvable:$true] %s145_s25 }
  0x10   : > { %p1708_p12 = scmp.ne.s32.totalorder %s2277_s1, %s1707_s28  ;;  %p1714_p5 = scmp.lt.u32.totalorder %s1707_s28, %s2277_s1 }
  0x11   : > { %p1944_p11 = pnand %p1648_p9, %p2280_p1 }
  0x13   : > { %p1709_p13 = pneg %p1944_p11 }
  0x15   : > { %p1710_p0 = pnand %p1709_p13, %p1708_p12 }
  0x17   : > { %p1711_p3 = pneg %p1710_p0 }
  0x19   : > { %p1716_p7 = pnand %p1714_p5, %p1711_p3 }
  0x1b   : > { %1719 = shalt.err (!%p1716_p7)
}
  0x1c   : > { %s1720_s6 = scalar_lea.vmem %s1937_s22, 4608  ;;  %p1728_p2 = scmp.lt.s32.totalorder %s1937_s22, %s1937_s22 }
  0x1d   : > { %p1721_p9 = scmp.ne.s32.totalorder %s1937_s22, %s1720_s6  ;;  %p1729_p12 = scmp.lt.s32.totalorder %s1720_s6, %s1720_s6 }
  0x1f   : > { %p1723_p10 = pnand %p1721_p9, %p1709_p13  ;;  %p1730_p0 = por %p1729_p12, %p1728_p2 }
  0x21   : > { %p1724_p1 = pneg %p1723_p10 }
  0x23   : > { %p1731_p6 = pnand %p1730_p0, %p1724_p1 }
  0x25   : > { %1734 = shalt.err (!%p1731_p6)
}
  0x26   : > { %s1867_s7 = smov 128   ;;  %s1868_s8 = smov 8  }
  0x27   : > { %1651 = dma.hbm_to_vmem [thread:$0]  (!%p1944_p11), %s2277_s1, 4608, %s1937_s22, [#allocation6], %s1867_s7, %s1867_s7, %s1868_s8  }
  0x28   : > { %s1735_s21 = scalar_lea.hbm %s2278_s2, 16 }
  0x29   : > { %p1736_p1 = scmp.ne.s32.totalorder %s2278_s2, %s1735_s21  ;;  %p1742_p10 = scmp.lt.u32.totalorder %s1735_s21, %s2278_s2 }
  0x2b   : > { %p1738_p2 = pnand %p1736_p1, %p1709_p13 }
  0x2d   : > { %p1739_p6 = pneg %p1738_p2 }
  0x2f   : > { %p1744_p3 = pnand %p1742_p10, %p1739_p6 }
  0x31   : > { %1747 = shalt.err (!%p1744_p3)
}
  0x32   : > { %s1748_s22 = scalar_lea.vmem %s1948_s25, 16  ;;  %s1755_s29 = scalar_lea.vmem %s1948_s25, 32 }
  0x33   : > { %p1749_p5 = scmp.ne.s32.totalorder %s1948_s25, %s1748_s22  ;;  %p1756_p12 = scmp.lt.s32.totalorder %s1948_s25, %s1948_s25 }
  0x34   : > { %p1757_p0 = scmp.lt.s32.totalorder %s1755_s29, %s1748_s22 }
  0x35   : > { %p1751_p7 = pnand %p1749_p5, %p1709_p13 }
  0x36   : > { %p1758_p1 = por %p1757_p0, %p1756_p12 }
  0x37   : > { %p1752_p9 = pneg %p1751_p7 }
  0x39   : > { %p1759_p2 = pnand %p1758_p1, %p1752_p9 }
  0x3b   : > { %1762 = shalt.err (!%p1759_p2)
}
  0x3c   : > { %1654 = dma.hbm_to_vmem [thread:$0]  (!%p1944_p11), %s2278_s2, 16, %s1948_s25, [#allocation6]  }
  0x3d   : > { %s2007_s5 = sadd.s32 1, %s1863_s15   ;;  %s27_s23 = sadd.s32 1, %s1859_s14 }
  0x3e   : > { %s24_s6 = ssub.s32 %s1863_s15, %s2007_s5  ;;  %p34_p13 = scmp.ne.s32.totalorder %s1859_s14, %s1855_s13 }
  0x3f   : > { %p25_p6 = scmp.eq.s32.totalorder %s24_s6, 0  ;;  %p35_p10 = scmp.eq.s32.totalorder %s1863_s15, 0 }
  0x40   : > { %p2287_p3 = scmp.eq.s32.totalorder %s1914_s16, 1  ;;  %p1665_p7 = scmp.lt.s32.totalorder %s1863_s15, 2 }
  0x41   : > { %s2023_s10 = scalar_select %p25_p6, %s1859_s14, %s27_s23  }
  0x42   : > { %p2017_p5 = por %p2287_p3, %p34_p13  ;;  %p36_p9 = por %p35_p10, %p34_p13 }
  0x43   : > { %s156_s11 = sand.u32 1, %s1859_s14   ;;  %s1634_s25 = smul.u32 1536, %s1863_s15 }
  0x44   : > { %s2288_s9 = scalar_select %p2017_p5, 1, 0 }
  0x45   : > { %s1633_s17 = smul.u32 96, %s156_s11  ;;  %p2027_p11 = pnand %p1665_p7, %p36_p9 }
  0x46   : > { %s2034_s27 = scalar_lea.hbm %s2276_s0, %s1634_s25  ;;  %s2038_s29 = scalar_lea.sflag [#allocation3], %s156_s11 }
  0x47   : > { %s160_s28 = scalar_lea.vmem [#allocation2], %s1633_s17  ;;  %s1763_s30 = scalar_lea.hbm %s2034_s27, 1536 }
  0x48   : > { %s167_s22 = sshll.u32 %s160_s28, 4  ;;  %p1764_p12 = scmp.ne.s32.totalorder %s2034_s27, %s1763_s30  ;;  %s2036_s22 = int_to_ptr.vmem [resolvable:$true] %s167_s22 }
  0x49   : > { %p1765_p0 = pneg %p2027_p11  ;;  %s1768_s6 = scalar_lea.hbm %s2276_s0, 3072 }
  0x4a   : > { %p1769_p13 = scmp.lt.u32.totalorder %s2034_s27, %s2276_s0  ;;  %p1770_p6 = scmp.lt.u32.totalorder %s1768_s6, %s1763_s30 }
  0x4b   : > { %p1766_p1 = pnand %p1765_p0, %p1764_p12  ;;  %p1772_p3 = scmp.lt.u32.totalorder %s1763_s30, %s2034_s27 }
  0x4c   : > { %p1771_p10 = por %p1770_p6, %p1769_p13 }
  0x4d   : > { %p1767_p2 = pneg %p1766_p1 }
  0x4e   : > { %p1773_p7 = por %p1772_p3, %p1771_p10 }
  0x50   : > { %p1774_p9 = pnand %p1773_p7, %p1767_p2 }
  0x52   : > { %1777 = shalt.err (!%p1774_p9)
}
  0x53   : > { %s1778_s11 = scalar_lea.vmem %s2036_s22, 1536  ;;  %s1869_s17 = smov [#allocation2]  }
  0x54   : > { %p1779_p12 = scmp.ne.s32.totalorder %s2036_s22, %s1778_s11  ;;  %s1783_s26 = sshll.u32 %s1869_s17, 4  ;;  %s1784_s26 = int_to_ptr.vmem [resolvable:$false] %s1783_s26 }
  0x55   : > { %s1785_s28 = scalar_lea.vmem %s1784_s26, 3072  ;;  %p1786_p4 = scmp.lt.s32.totalorder %s2036_s22, %s1784_s26 }
  0x56   : > { %p1781_p1 = pnand %p1779_p12, %p1765_p0  ;;  %p1787_p13 = scmp.lt.s32.totalorder %s1785_s28, %s1778_s11 }
  0x58   : > { %p1782_p5 = pneg %p1781_p1  ;;  %p1788_p6 = por %p1787_p13, %p1786_p4 }
  0x5a   : > { %p1789_p10 = pnand %p1788_p6, %p1782_p5 }
  0x5c   : > { %1792 = shalt.err (!%p1789_p10)
}
  0x5d   : > { %1658 = dma.hbm_to_vmem [thread:$0]  (!%p2027_p11), %s2034_s27, 1536, %s2036_s22, %s2038_s29, %s1867_s7, %s1867_s7, %s1868_s8  }
  0x5e   : > { %179 = sbr.rel (%p1933_p8) target bundleno = 381 (0x17d), region = 32  ;;  %s2072_s30 = sand.u32 (!%p1933_p8), 1, %s1855_s13  }
  0x5f   : > { %s1635_s4 = smul.u32 (!%p1933_p8), 96, %s2072_s30  ;;  %s182_s23 = scalar_lea.sflag (!%p1933_p8), [#allocation3], %s2072_s30 }
  0x60   : > { %p2290_p4 = scmp.ne.s32.totalorder (!%p1933_p8), %s2283_s18, 0 }
  0x61   : > { %s2076_s6 = scalar_lea.vmem (!%p1933_p8), [#allocation2], %s1635_s4 }
  0x65   : > { %1838 = dma.done.wait (%p2290_p4), %s182_s23, 1536  }
  0x66   : > { %1840 = vsyncadd (%p2290_p4), %s182_s23, 4294965760  ;;  %p2291_p5 = scmp.eq.s32.totalorder %s1914_s16, 0 }
  0x68   : > { %1842 = dma.done.wait (%p2291_p5), [#allocation6], 4624   ;;  %p2292_p8 = pmov %p2291_p5 }
  0x69   : > { %v254_v0 = vld [vmem:[#allocation5 + $0x20] sm:$0xff]  ;;  %v255_v1 = vld [vmem:[#allocation5 + $0x28] sm:$0xff]  ;;  %v256_v5 = vld [vmem:[#allocation5 + $0x30] sm:$0xff]  ;;  %vm240_vm0 = vcmask 1046528   ;;  %vm258_vm1 = vcmask 261120   ;;  %vm445_vm2 = vcmask 1045504  }
  0x6a   : > { %1844 = vsyncadd (%p2292_p8), [#allocation6], 4294962672  ;;  %v662_v2 = vld [vmem:[#allocation5 + $0x80] sm:$0xff]  ;;  %v1525_v3 = vpack.c.bf16 %v255_v1, %v254_v0  ;;  %v663_v4 = vld [vmem:[#allocation5 + $0x88] sm:$0xff]  ;;  %s1283_s18 = sshll.u32 %s2072_s30, 5  ;;  %s1326_s8 = sshll.u32 %s1914_s16, 9 }
  0x6b   : > { %v257_v6 = vld [vmem:[#allocation5 + $0x38] sm:$0xff]  ;;  %v1557_v7 = vpack.c.bf16 %v663_v4, %v662_v2  ;;  %v664_v9 = vld [vmem:[#allocation5 + $0x90] sm:$0xff]  ;;  %v2087_v11 = vld [vmem:[%s2076_s6] sm:$0xff]  ;;  %s215_s20 = scalar_lea.vmem [#allocation8], %s1283_s18  ;;  %vm1163_vm3 = vcmask 130048   ;;  %s2232_s22 = scalar_lea.hbm %s2279_s3, %s1326_s8 }
  0x6c   : > { %v1529_v8 = vpack.c.bf16 %v257_v6, %v256_v5  ;;  %v665_v10 = vld [vmem:[#allocation5 + $0x98] sm:$0xff]  ;;  %1526 = vmatprep.subr.bf16.mxu1 %v1525_v3  ;;  %v2090_v13 = vld [vmem:[%s2076_s6 + $0x8] sm:$0x3]  ;;  %v241_v14 = vrot.slane %v2087_v11, 1  ;;  %v2094_v15 = vld [vmem:[%s2076_s6 + $0x10] sm:$0xff]  ;;  %s1182_s7 = sshll.u32 %s215_s20, 4  ;;  %s2227_s7 = int_to_ptr.vmem [resolvable:$true] %s1182_s7 }
  0x6d   : > { %v1561_v12 = vpack.c.bf16 %v665_v10, %v664_v9  ;;  %v2097_v16 = vld [vmem:[%s2076_s6 + $0x18] sm:$0x3]  ;;  %1558 = vmatprep.subr.bf16.mxu0 %v1557_v7  ;;  %1528 = vmatpush3.bf16.msra.mxu1 %v1525_v3  ;;  %v242_v17 = vrot.slane %v2090_v13, 1  ;;  %v244_v18 = vrot.slane %v2094_v15, 1  ;;  %v228_v20 = vld [vmem:[#allocation5] sm:$0xff]  ;;  %v229_v21 = vld [vmem:[#allocation5 + $0x8] sm:$0xff] }
  0x6e   : > { %v245_v19 = vrot.slane %v2097_v16, 1  ;;  %1560 = vmatpush3.bf16.msra.mxu0 %v1557_v7  ;;  %1530 = vmatprep.subr.bf16.mxu1 %v1529_v8  ;;  %v1533_v22 = vpack.c.bf16 %v229_v21, %v228_v20  ;;  %v2103_v23 = vld [vmem:[%s2076_s6 + $0x20] sm:$0xff]  ;;  %v2106_v24 = vld [vmem:[%s2076_s6 + $0x28] sm:$0x3]  ;;  %v2113_v31 = vld [vmem:[%s2076_s6 + $0x30] sm:$0xff]  ;;  %v450_v46 = vrot.slane %v2097_v16, 2 }
  0x6f   : > { %v761_v25 = vld [vmem:[#allocation5 + $0xa0] sm:$0xff]  ;;  %1562 = vmatprep.subr.bf16.mxu0 %v1561_v12  ;;  %v243_v26 = vsel %vm240_vm0, %v241_v14, %v242_v17  ;;  %v247_v28 = vrot.slane %v2103_v23, 1  ;;  %v248_v29 = vrot.slane %v2106_v24, 1  ;;  %v762_v30 = vld [vmem:[#allocation5 + $0xa8] sm:$0xff]  ;;  %v2116_v32 = vld [vmem:[%s2076_s6 + $0x38] sm:$0x3] }
  0x70   : > { %v246_v27 = vsel %vm240_vm0, %v244_v18, %v245_v19  ;;  %1407 = vmatprep.mubr.msk.f32.mxu1 %vm258_vm1, %v243_v26  ;;  %v1565_v33 = vpack.c.bf16 %v762_v30, %v761_v25  ;;  %v250_v34 = vrot.slane %v2113_v31, 1  ;;  %v251_v35 = vrot.slane %v2116_v32, 1  ;;  %v230_v36 = vld [vmem:[#allocation5 + $0x10] sm:$0xff]  ;;  %v231_v37 = vld [vmem:[#allocation5 + $0x18] sm:$0xff]  ;;  %v2123_v38 = vld [vmem:[%s2076_s6 + $0x40] sm:$0xff]  ;;  %s1169_s16 = scalar_lea.sflag [#allocation4], %s2072_s30 }
  0x71   : > { %1463 = vmatprep.mubr.msk.f32.mxu0 %vm258_vm1, %v246_v27  ;;  %1532 = vmatpush3.bf16.msra.mxu1 %v1529_v8  ;;  %v2126_v39 = vld [vmem:[%s2076_s6 + $0x48] sm:$0x3]  ;;  %v763_v40 = vld [vmem:[#allocation5 + $0xb0] sm:$0xff]  ;;  %v764_v41 = vld [vmem:[#allocation5 + $0xb8] sm:$0xff]  ;;  %v2129_v42 = vsel %vm240_vm0, %v247_v28, %v248_v29  ;;  %v658_v43 = vrot.slane %v2123_v38, 1  ;;  %v1537_v45 = vpack.c.bf16 %v231_v37, %v230_v36  ;;  %v449_v49 = vrot.slane %v2094_v15, 2 }
  0x72   : > { %1564 = vmatpush3.bf16.msra.mxu0 %v1561_v12  ;;  %1534 = vmatprep.subr.bf16.mxu1 %v1533_v22  ;;  %v659_v44 = vrot.slane %v2126_v39, 1  ;;  %v2136_v47 = vsel %vm240_vm0, %v250_v34, %v251_v35  ;;  %v1569_v48 = vpack.c.bf16 %v764_v41, %v763_v40  ;;  %v459_v50 = vld [vmem:[#allocation5 + $0x40] sm:$0xff]  ;;  %v460_v51 = vld [vmem:[#allocation5 + $0x48] sm:$0xff]  ;;  %v453_v54 = vrot.slane %v2106_v24, 2  ;;  %v461_v62 = vld [vmem:[#allocation5 + $0x50] sm:$0xff]  ;;  %s1793_s29 = scalar_lea.vmem %s2227_s7, 512 }
  0x73   : > { %1566 = vmatprep.subr.bf16.mxu0 %v1565_v33  ;;  %v857_v52 = vld [vmem:[#allocation5 + $0xc0] sm:$0xff]  ;;  %v858_v53 = vld [vmem:[#allocation5 + $0xc8] sm:$0xff]  ;;  %v452_v56 = vrot.slane %v2103_v23, 2  ;;  %v1541_v57 = vpack.c.bf16 %v460_v51, %v459_v50  ;;  %v451_v58 = vsel %vm445_vm2, %v449_v49, %v450_v46  ;;  %v455_v60 = vrot.slane %v2113_v31, 2  ;;  %v462_v63 = vld [vmem:[#allocation5 + $0x58] sm:$0xff]  ;;  %p1794_p11 = scmp.ne.s32.totalorder %s2227_s7, %s1793_s29  ;;  %p2293_p0 = scmp.ne.s32.totalorder %s2288_s9, 0 }
  0x74   : > { %1408 = vmatmul.mubr.msk.f32.vlgmr.msra.gmra.mrb[0].mxu1 %vm258_vm1, %v246_v27  ;;  %v2145_v55 = vsel %vm240_vm0, %v658_v43, %v659_v44  ;;  %v1573_v59 = vpack.c.bf16 %v858_v53, %v857_v52  ;;  %v456_v61 = vrot.slane %v2116_v32, 2  ;;  %v859_v0 = vld [vmem:[#allocation5 + $0xd0] sm:$0xff]  ;;  %v860_v1 = vld [vmem:[#allocation5 + $0xd8] sm:$0xff]  ;;  %v757_v3 = vrot.slane %v2123_v38, 2  ;;  %v561_v10 = vld [vmem:[#allocation5 + $0x60] sm:$0xff]  ;;  %s1870_s25 = smov [#allocation8]  }
  0x75   : > { %1464 = vmatmul.mubr.msk.f32.vlgmr.msra.gmra.mrb[0].mxu0 %vm258_vm1, %v2129_v42  ;;  %1536 = vmatpush3.bf16.msra.mxu1 %v1533_v22  ;;  %v2160_v2 = vsel %vm445_vm2, %v452_v56, %v453_v54  ;;  %v758_v4 = vrot.slane %v2126_v39, 2  ;;  %v447_v5 = vrot.slane %v2090_v13, 2  ;;  %v1545_v6 = vpack.c.bf16 %v462_v63, %v461_v62  ;;  %v562_v12 = vld [vmem:[#allocation5 + $0x68] sm:$0xff]  ;;  %v958_v13 = vld [vmem:[#allocation5 + $0xe0] sm:$0xff]  ;;  %v563_v19 = vld [vmem:[#allocation5 + $0x70] sm:$0xff]  ;;  %p1795_p2 = pnand %p1794_p11, %p2293_p0  ;;  %s1797_s24 = sshll.u32 %s1870_s25, 4  ;;  %s1798_s24 = int_to_ptr.vmem [resolvable:$false] %s1797_s24 }
  0x76   : > { %1568 = vmatpush3.bf16.msra.mxu0 %v1565_v33  ;;  %1410 = vmatprep.mubr.msk.f32.mxu1 %vm258_vm1, %v2129_v42  ;;  %v446_v7 = vrot.slane %v2087_v11, 2  ;;  %v2170_v8 = vsel %vm445_vm2, %v455_v60, %v456_v61  ;;  %v1577_v9 = vpack.c.bf16 %v860_v1, %v859_v0  ;;  %v959_v14 = vld [vmem:[#allocation5 + $0xe8] sm:$0xff]  ;;  %v1549_v17 = vpack.c.bf16 %v562_v12, %v561_v10  ;;  %v564_v20 = vld [vmem:[#allocation5 + $0x78] sm:$0xff]  ;;  %v960_v21 = vld [vmem:[#allocation5 + $0xf0] sm:$0xff]  ;;  %s1799_s11 = scalar_lea.vmem %s1798_s24, 1024  ;;  %p1800_p7 = scmp.lt.s32.totalorder %s2227_s7, %s1798_s24 }
  0x77   : > { %1466 = vmatprep.mubr.msk.f32.mxu0 %vm258_vm1, %v2136_v47  ;;  %1538 = vmatprep.subr.bf16.mxu1 %v1537_v45  ;;  %v1581_v18 = vpack.c.bf16 %v959_v14, %v958_v13  ;;  %v961_v22 = vld [vmem:[#allocation5 + $0xf8] sm:$0xff]  ;;  %v1553_v24 = vpack.c.bf16 %v564_v20, %v563_v19  ;;  %v1057_v26 = vld [vmem:[#allocation5 + $0x100] sm:$0xff]  ;;  %v1058_v27 = vld [vmem:[#allocation5 + $0x108] sm:$0xff]  ;;  %p1796_p3 = pneg %p1795_p2  ;;  %p1801_p9 = scmp.lt.s32.totalorder %s1799_s11, %s1793_s29 }
  0x78   : > { %1411 = vmatmul.mubr.msk.f32.gmra.mrb[2].mxu1 %vm258_vm1, %v2136_v47  ;;  %1570 = vmatprep.subr.bf16.mxu0 %v1569_v48  ;;  %v448_v16 = vsel %vm445_vm2, %v446_v7, %v447_v5  ;;  %v1585_v25 = vpack.c.bf16 %v961_v22, %v960_v21  ;;  %v226_v28 = vld [vmem:[%s2076_s6 + $0x50] sm:$0xff]  ;;  %v1589_v29 = vpack.c.bf16 %v1058_v27, %v1057_v26  ;;  %v227_v30 = vld [vmem:[%s2076_s6 + $0x58] sm:$0x3]  ;;  %v1320_v46 = vld [vmem:[#allocation7] ss:$0 sm:$0xff] }
  0x79   : > { %1467 = vmatmul.mubr.msk.f32.gmra.mrb[2].mxu0 %vm258_vm1, %v2145_v55  ;;  %1540 = vmatpush3.bf16.msra.mxu1 %v1537_v45  ;;  %v1059_v32 = vld [vmem:[#allocation5 + $0x110] sm:$0xff]  ;;  %v1060_v33 = vld [vmem:[#allocation5 + $0x118] sm:$0xff]  ;;  %v954_v34 = vrot.slane %v226_v28, 1  ;;  %v955_v35 = vrot.slane %v227_v30, 1  ;;  %v1053_v37 = vrot.slane %v226_v28, 2  ;;  %v1054_v39 = vrot.slane %v227_v30, 2  ;;  %p1802_p12 = por %p1801_p9, %p1800_p7 }
  0x7a   : > { %1572 = vmatpush3.bf16.msra.mxu0 %v1569_v48  ;;  %1421 = vmatprep.mubr.msk.f32.mxu1 %vm258_vm1, %v2087_v11  ;;  %v2177_v11 = vsel %vm445_vm2, %v757_v3, %v758_v4  ;;  %v1593_v36 = vpack.c.bf16 %v1060_v33, %v1059_v32 }
  0x7b   : > { %1477 = vmatprep.mubr.msk.f32.mxu0 %vm258_vm1, %v451_v58  ;;  %1542 = vmatprep.subr.bf16.mxu1 %v1541_v57  ;;  %p1803_p1 = pnand %p1802_p12, %p1796_p3 }
  0x7c   : > { %1422 = vmatmul.mubr.msk.f32.vlgmr.msra.gmra.mrb[0].mxu1 %vm258_vm1, %v2094_v15  ;;  %1574 = vmatprep.subr.bf16.mxu0 %v1573_v59 }
  0x7d   : > { %1478 = vmatmul.mubr.msk.f32.vlgmr.msra.gmra.mrb[0].mxu0 %vm258_vm1, %v2160_v2  ;;  %1544 = vmatpush3.bf16.msra.mxu1 %v1541_v57 }
  0x7e   : > { %1576 = vmatpush3.bf16.msra.mxu0 %v1573_v59  ;;  %1424 = vmatprep.mubr.msk.f32.mxu1 %vm258_vm1, %v2103_v23 }
  0x7f   : > { %1480 = vmatprep.mubr.msk.f32.mxu0 %vm258_vm1, %v2170_v8  ;;  %1546 = vmatprep.subr.bf16.mxu1 %v1545_v6 }
  0x80   : > { %1425 = vmatmul.mubr.msk.f32.gmra.mrb[2].mxu1 %vm258_vm1, %v2113_v31  ;;  %1578 = vmatprep.subr.bf16.mxu0 %v1577_v9 }
  0x81   : > { %1481 = vmatmul.mubr.msk.f32.gmra.mrb[2].mxu0 %vm258_vm1, %v2177_v11  ;;  %1548 = vmatpush3.bf16.msra.mxu1 %v1545_v6 }
  0x82   : > { %1580 = vmatpush3.bf16.msra.mxu0 %v1577_v9  ;;  %1435 = vmatprep.mubr.msk.f32.mxu1 %vm258_vm1, %v448_v16 }
  0x83   : > { %1491 = vmatprep.mubr.msk.f32.mxu0 %vm258_vm1, %v2103_v23  ;;  %1550 = vmatprep.subr.bf16.mxu1 %v1549_v17 }
  0x84   : > { %1436 = vmatmul.mubr.msk.f32.vlgmr.msra.gmra.mrb[0].mxu1 %vm258_vm1, %v451_v58  ;;  %1582 = vmatprep.subr.bf16.mxu0 %v1581_v18 }
  0x85   : > { %1492 = vmatmul.mubr.msk.f32.vlgmr.msra.gmra.mrb[0].mxu0 %vm258_vm1, %v2113_v31  ;;  %1552 = vmatpush3.bf16.msra.mxu1 %v1549_v17 }
  0x86   : > { %1584 = vmatpush3.bf16.msra.mxu0 %v1581_v18  ;;  %1438 = vmatprep.mubr.msk.f32.mxu1 %vm258_vm1, %v2160_v2 }
  0x87   : > { %1494 = vmatprep.mubr.msk.f32.mxu0 %vm258_vm1, %v2123_v38  ;;  %1554 = vmatprep.subr.bf16.mxu1 %v1553_v24 }
  0x88   : > { %1439 = vmatmul.mubr.msk.f32.gmra.mrb[2].mxu1 %vm258_vm1, %v2170_v8  ;;  %1586 = vmatprep.subr.bf16.mxu0 %v1585_v25 }
  0x89   : > { %1495 = vmatmul.mubr.msk.f32.gmra.mrb[2].mxu0 %vm258_vm1, %v226_v28  ;;  %1556 = vmatpush3.bf16.msra.mxu1 %v1553_v24 }
  0x8a   : > { %1588 = vmatpush3.bf16.msra.mxu0 %v1585_v25  ;;  %1449 = vmatprep.mubr.msk.f32.mxu1 %vm258_vm1, %v2094_v15  ;;  %v956_v15 = vsel %vm240_vm0, %v954_v34, %v955_v35 }
  0x8b   : > { %1505 = vmatprep.mubr.msk.f32.mxu0 %vm258_vm1, %v2129_v42  ;;  %1590 = vmatprep.subr.bf16.mxu0 %v1589_v29 }
  0x8c   : > { %1450 = vmatmul.mubr.msk.f32.vlgmr.msra.gmra.mrb[0].mxu1 %vm258_vm1, %v2103_v23  ;;  %1597 = vmatprep.subr.bf16.mxu1 %v1589_v29  ;;  %v1055_v23 = vsel %vm445_vm2, %v1053_v37, %v1054_v39 }
  0x8d   : > { %1506 = vmatmul.mubr.msk.f32.vlgmr.msra.gmra.mrb[0].mxu0 %vm258_vm1, %v2136_v47  ;;  %1599 = vmatpush3.bf16.msra.mxu1 %v1589_v29 }
  0x8e   : > { %1592 = vmatpush3.bf16.msra.mxu0 %v1589_v29  ;;  %1452 = vmatprep.mubr.msk.f32.mxu1 %vm258_vm1, %v2113_v31 }
  0x8f   : > { %1508 = vmatprep.mubr.msk.f32.mxu0 %vm258_vm1, %v2145_v55  ;;  %1594 = vmatprep.subr.bf16.mxu0 %v1593_v36 }
  0x90   : > { %1453 = vmatmul.mubr.msk.f32.gmra.mrb[2].mxu1 %vm258_vm1, %v2123_v38  ;;  %1598 = vmatprep.subr.bf16.mxu1 %v1593_v36 }
  0x91   : > { %1509 = vmatmul.mubr.msk.f32.gmra.mrb[2].mxu0 %vm258_vm1, %v956_v15  ;;  %1600 = vmatpush3.bf16.msra.mxu1 %v1593_v36 }
  0x92   : > { %1596 = vmatpush3.bf16.msra.mxu0 %v1593_v36  ;;  %1519 = vmatprep.mubr.msk.f32.mxu0 %vm258_vm1, %v2160_v2 }
  0x93   : > { %1522 = vmatprep.mubr.msk.f32.mxu1 %vm258_vm1, %v2177_v11 }
  0x94   : > { %1523 = vmatmul.mubr.msk.f32.vlgmr.msra.gmra.mrb[4].mxu1 %vm258_vm1, %v1055_v23 }
  0x95   : > { %1520 = vmatmul.mubr.msk.f32.vlgmr.msra.gmra.mrb[0].mxu0 %vm258_vm1, %v2170_v8 }
 0x15f   : > { %v1451_v31 = vpop.f32.mrb[0].mxu1 }
 0x160   : > { %v634_v38 = vpop.f32.mrb[1].mxu1 }
 0x163   : > { %v1454_v40 = vpop.f32.mrb[2].mxu1 }
 0x164   : > { %v1510_v41 = vpop.f32.mrb[2].mxu0  ;;  %v644_v42 = vpop.f32.mrb[3].mxu1 }
 0x165   : > { %v1603_v43 = vadd.f32 %v1510_v41, %v1454_v40  ;;  %v1040_v44 = vpop.f32.mrb[3].mxu0 }
 0x166   : > { %v1605_v45 = vadd.f32 %v1040_v44, %v644_v42 }
 0x167   : > { %v1524_v47 = vpop.f32.mrb[4].mxu1 }
 0x168   : > { %v1521_v48 = vpop.f32.mrb[0].mxu0  ;;  %v1604_v49 = vadd.f32 %v1603_v43, %v1524_v47  ;;  %v1139_v50 = vpop.f32.mrb[5].mxu1 }
 0x169   : > { %v1601_v51 = vadd.f32 %v1521_v48, %v1451_v31  ;;  %v1129_v52 = vpop.f32.mrb[1].mxu0  ;;  %v1606_v53 = vadd.f32 %v1605_v45, %v1139_v50 }
 0x16a   : > { %v1162_v54 = vadd.f32 %v1604_v49, %v1320_v46  ;;  %v1602_v55 = vadd.f32 %v1129_v52, %v634_v38 }
 0x16b   : > { %v1160_v56 = vadd.f32 %v1601_v51, %v1320_v46  ;;  %v1161_v57 = vadd.f32 %v1606_v53, %v1320_v46 }
 0x16c   : > { %1167 = vst.msk [vmem:[%s215_s20 + $0x18] sm:$0xff] %vm1163_vm3, %v1162_v54  ;;  %v1159_v58 = vadd.f32 %v1602_v55, %v1320_v46 }
 0x16d   : > { %1165 = vst.msk [vmem:[%s215_s20 + $0x8] sm:$0xff] %vm1163_vm3, %v1160_v56  ;;  %1166 = vst.msk [vmem:[%s215_s20 + $0x10] sm:$0xff] %vm1163_vm3, %v1161_v57 }
 0x16e   : > { %1164 = vst.msk [vmem:[%s215_s20] sm:$0xff] %vm1163_vm3, %v1159_v58 }
 0x16f   : > { %1806 = shalt.err (!%p1803_p1)
}
 0x170   : > { %s1807_s17 = scalar_lea.hbm %s2232_s22, 512  ;;  %s1811_s4 = scalar_lea.hbm %s2279_s3, 1024 }
 0x171   : > { %p1808_p13 = scmp.ne.s32.totalorder %s2232_s22, %s1807_s17  ;;  %p1812_p4 = scmp.lt.u32.totalorder %s2232_s22, %s2279_s3 }
 0x172   : > { %p1813_p5 = scmp.lt.u32.totalorder %s1811_s4, %s1807_s17  ;;  %p1815_p11 = scmp.lt.u32.totalorder %s1807_s17, %s2232_s22 }
 0x173   : > { %p1809_p6 = pnand %p1808_p13, %p2293_p0 }
 0x174   : > { %p1814_p8 = por %p1813_p5, %p1812_p4 }
 0x175   : > { %p1810_p10 = pneg %p1809_p6 }
 0x176   : > { %p1816_p2 = por %p1815_p11, %p1814_p8 }
 0x178   : > { %p1817_p3 = pnand %p1816_p2, %p1810_p10 }
 0x17a   : > { %1820 = shalt.err (!%p1817_p3)
}
 0x17b   : > { %s1871_s18 = smov 128   ;;  %s1872_s20 = smov 8  }
 0x17c   : > { %1646 = dma.vmem_to_hbm [thread:$0]  (%p2293_p0), %s2227_s7, 512, %s2232_s22, %s1169_s16, %s1871_s18, %s1871_s18, %s1872_s20  }
 0x17d PF: > { %s1197_s8 = sand.u32 1, %s1851_s12   ;;  %p2294_p7 = scmp.ne.s32.totalorder %s2284_s19, 0 }
 0x17e   : > { %p2295_p9 = scmp.ge.s32.totalorder %s1863_s15, 2  ;;  %s1198_s21 = scalar_lea.sflag [#allocation4], %s1197_s8 }
 0x180   : > { %p1660_p12 = pnand %p2295_p9, %p2294_p7 }
 0x182   : > { %1846 = dma.done.wait (!%p1660_p12), %s1198_s21, 512  }
 0x183   : > { %1848 = vsyncadd (!%p1660_p12), %s1198_s21, 4294966784  ;;  %p17_p1 = scmp.ge.s32.totalorder %s2007_s5, 4   ;;  %s2296_s12 = smov %s1855_s13 }
 0x184   : > { %s2297_s13 = smov %s1859_s14  ;;  %s2298_s14 = smov %s2023_s10 }
 0x185   : > { %s2299_s15 = smov %s2007_s5  ;;  %19 = sbr.rel (!%p17_p1) target bundleno = 6 (0x6), region = 93 }
 0x18c   :  { %1203 = vsyncpa [#allocation3], 1 }
 0x18d   :  { %1205 = vsyncpa [#allocation3 + $0x1], 1 }
 0x18e   :  { %1206 = vsyncpa [#allocation6], 1 }
 0x18f   :  { %1207 = vsyncpa [#allocation4], 1 }
 0x190   :  { %1209 = vsyncpa [#allocation4 + $0x1], 1 }

// kernel: sar_head_forward.3
= control target key start
LH: loop header
LB: loop body
LE: loop exit
PB: predicated region body
PF: predicated region fallthrough
CT: control target
= control target key end

     0   :  { %13 = vsyncpa [#allocation4], 0  ;;  %s3520_s0 = inlined_call_operand.hbm [shape: f32[8,2,32], index: 0, kind: input, shape index: {}]   ;;  %s3521_s1 = inlined_call_operand.hbm [shape: f32[32,128], index: 1, kind: input, shape index: {}]   ;;  %s3522_s2 = inlined_call_operand.hbm [shape: f32[32,128], index: 2, kind: input, shape index: {}]   ;;  %s3523_s3 = inlined_call_operand.hbm [shape: f32[1,128], index: 3, kind: input, shape index: {}]   ;;  %s3524_s4 = inlined_call_operand.hbm [shape: f32[64,128], index: 4, kind: input, shape index: {}]   ;;  %s3525_s5 = inlined_call_operand.hbm [shape: f32[1,128], index: 5, kind: input, shape index: {}]   ;;  %s3526_s6 = inlined_call_operand.hbm [shape: f32[32,32], index: 6, kind: input, shape index: {}]   ;;  %s3527_s7 = inlined_call_operand.hbm [shape: f32[1,32], index: 7, kind: input, shape index: {}]   ;;  %s3528_s8 = inlined_call_operand.hbm [shape: f32[2,32], index: 8, kind: output, shape index: {}]  }
   0x1   :  { %14 = vsyncpa [#allocation7], 0 }
   0x2   :  { %15 = vsyncpa [#allocation10], 0 }
   0x3   :  { %16 = vsyncpa [#allocation13], 0 }
   0x4   :  { %17 = vsyncpa [#allocation16], 0 }
   0x5   :  { %18 = vsyncpa [#allocation5], 0  ;;  %s3029_s27 = smov [#allocation6]   ;;  %s2819_s9 = scalar_lea.hbm %s3521_s1, 512 }
   0x6   :  { %s36_s28 = sshll.u32 %s3029_s27, 4  ;;  %p2820_p0 = scmp.ne.s32.totalorder %s3521_s1, %s2819_s9  ;;  %s37_s28 = int_to_ptr.vmem [resolvable:$true] %s36_s28 }
   0x7   :  { %p2823_p1 = scmp.lt.u32.totalorder %s2819_s9, %s3521_s1 }
   0x9   :  { %p2825_p2 = pnand %p2823_p1, %p2820_p0 }
   0xb   :  { %2828 = shalt.err (!%p2825_p2)
}
   0xc   :  { %s2829_s14 = scalar_lea.vmem %s37_s28, 512  ;;  %p2834_p4 = scmp.lt.s32.totalorder %s37_s28, %s37_s28 }
   0xd   :  { %p2830_p3 = scmp.ne.s32.totalorder %s37_s28, %s2829_s14  ;;  %p2835_p5 = scmp.lt.s32.totalorder %s2829_s14, %s2829_s14 }
   0xf   :  { %p2836_p6 = por %p2835_p5, %p2834_p4 }
  0x11   :  { %p2837_p7 = pnand %p2836_p6, %p2830_p3 }
  0x13   :  { %2840 = shalt.err (!%p2837_p7)
}
  0x14   :  { %s3030_s15 = smov 128   ;;  %s3031_s16 = smov 8  }
  0x15   :  { %42 = dma.hbm_to_vmem [thread:$0]  %s3521_s1, 512, %s37_s28, [#allocation7], %s3030_s15, %s3030_s15, %s3031_s16  }
  0x16   :  { %s3032_s19 = smov [#allocation9]   ;;  %s3033_s21 = smov [#allocation12]  }
  0x17   :  { %s61_s20 = sshll.u32 %s3032_s19, 4  ;;  %s83_s22 = sshll.u32 %s3033_s21, 4  ;;  %s62_s20 = int_to_ptr.vmem [resolvable:$true] %s61_s20  ;;  %s84_s22 = int_to_ptr.vmem [resolvable:$true] %s83_s22 }
  0x18   :  { %s2841_s25 = scalar_lea.hbm %s3523_s3, 16 }
  0x19   :  { %p2842_p8 = scmp.ne.s32.totalorder %s3523_s3, %s2841_s25  ;;  %p2845_p9 = scmp.lt.u32.totalorder %s2841_s25, %s3523_s3 }
  0x1b   :  { %p2847_p10 = pnand %p2845_p9, %p2842_p8 }
  0x1d   :  { %2850 = shalt.err (!%p2847_p10)
}
  0x1e   :  { %s2851_s1 = scalar_lea.vmem %s62_s20, 16  ;;  %s2855_s28 = scalar_lea.vmem %s62_s20, 32 }
  0x1f   :  { %p2852_p11 = scmp.ne.s32.totalorder %s62_s20, %s2851_s1  ;;  %p2856_p12 = scmp.lt.s32.totalorder %s62_s20, %s62_s20 }
  0x20   :  { %p2857_p13 = scmp.lt.s32.totalorder %s2855_s28, %s2851_s1 }
  0x22   :  { %p2858_p0 = por %p2857_p13, %p2856_p12 }
  0x24   :  { %p2859_p1 = pnand %p2858_p0, %p2852_p11 }
  0x26   :  { %2862 = shalt.err (!%p2859_p1)
}
  0x27   :  { %64 = dma.hbm_to_vmem [thread:$0]  %s3523_s3, 16, %s62_s20, [#allocation10]  }
  0x28   :  { %s2863_s13 = scalar_lea.hbm %s3525_s5, 16 }
  0x29   :  { %p2864_p2 = scmp.ne.s32.totalorder %s3525_s5, %s2863_s13  ;;  %p2867_p3 = scmp.lt.u32.totalorder %s2863_s13, %s3525_s5 }
  0x2b   :  { %p2869_p4 = pnand %p2867_p3, %p2864_p2 }
  0x2d   :  { %2872 = shalt.err (!%p2869_p4)
}
  0x2e   :  { %s2873_s21 = scalar_lea.vmem %s84_s22, 16  ;;  %s2877_s23 = scalar_lea.vmem %s84_s22, 32 }
  0x2f   :  { %p2874_p5 = scmp.ne.s32.totalorder %s84_s22, %s2873_s21  ;;  %p2878_p6 = scmp.lt.s32.totalorder %s84_s22, %s84_s22 }
  0x30   :  { %p2879_p7 = scmp.lt.s32.totalorder %s2877_s23, %s2873_s21 }
  0x32   :  { %p2880_p8 = por %p2879_p7, %p2878_p6 }
  0x34   :  { %p2881_p9 = pnand %p2880_p8, %p2874_p5 }
  0x36   :  { %2884 = shalt.err (!%p2881_p9)
}
  0x37   :  { %86 = dma.hbm_to_vmem [thread:$0]  %s3525_s5, 16, %s84_s22, [#allocation13]  }
  0x38   :  { %s3034_s24 = smov [#allocation3]   ;;  %s2885_s29 = scalar_lea.hbm %s3520_s0, 256 }
  0x39   :  { %s24_s25 = sshll.u32 %s3034_s24, 4  ;;  %p2886_p10 = scmp.ne.s32.totalorder %s3520_s0, %s2885_s29  ;;  %s25_s25 = int_to_ptr.vmem [resolvable:$true] %s24_s25 }
  0x3a   :  { %p2889_p11 = scmp.lt.u32.totalorder %s2885_s29, %s3520_s0 }
  0x3c   :  { %p2891_p12 = pnand %p2889_p11, %p2886_p10 }
  0x3e   :  { %2894 = shalt.err (!%p2891_p12)
}
  0x3f   :  { %s2895_s10 = scalar_lea.vmem %s25_s25, 256  ;;  %p2900_p0 = scmp.lt.s32.totalorder %s25_s25, %s25_s25 }
  0x40   :  { %p2896_p13 = scmp.ne.s32.totalorder %s25_s25, %s2895_s10  ;;  %p2901_p1 = scmp.lt.s32.totalorder %s2895_s10, %s2895_s10 }
  0x42   :  { %p2902_p2 = por %p2901_p1, %p2900_p0 }
  0x44   :  { %p2903_p3 = pnand %p2902_p2, %p2896_p13 }
  0x46   :  { %2906 = shalt.err (!%p2903_p3)
}
  0x47   :  { %s3035_s5 = smov 32   ;;  %s3036_s22 = smov 2  }
  0x48   :  { %30 = dma.hbm_to_vmem [thread:$0]  %s3520_s0, 256, %s25_s25, [#allocation4], %s3035_s5, %s3035_s5, %s3036_s22  }
  0x49   :  { %s3037_s13 = smov [#allocation8]   ;;  %s3038_s17 = smov [#allocation11]  }
  0x4a   :  { %s48_s14 = sshll.u32 %s3037_s13, 4  ;;  %s70_s18 = sshll.u32 %s3038_s17, 4  ;;  %s49_s14 = int_to_ptr.vmem [resolvable:$true] %s48_s14  ;;  %s3145_s18 = int_to_ptr.vmem [resolvable:$true] %s70_s18 }
  0x4b   :  { %s2907_s23 = scalar_lea.hbm %s3522_s2, 512 }
  0x4c   :  { %p2908_p4 = scmp.ne.s32.totalorder %s3522_s2, %s2907_s23  ;;  %p2911_p5 = scmp.lt.u32.totalorder %s2907_s23, %s3522_s2 }
  0x4e   :  { %p2913_p6 = pnand %p2911_p5, %p2908_p4 }
  0x50   :  { %2916 = shalt.err (!%p2913_p6)
}
  0x51   :  { %s2917_s0 = scalar_lea.vmem %s49_s14, 512  ;;  %p2922_p8 = scmp.lt.s32.totalorder %s49_s14, %s49_s14 }
  0x52   :  { %p2918_p7 = scmp.ne.s32.totalorder %s49_s14, %s2917_s0  ;;  %p2923_p9 = scmp.lt.s32.totalorder %s2917_s0, %s2917_s0 }
  0x54   :  { %p2924_p10 = por %p2923_p9, %p2922_p8 }
  0x56   :  { %p2925_p11 = pnand %p2924_p10, %p2918_p7 }
  0x58   :  { %2928 = shalt.err (!%p2925_p11)
}
  0x59   :  { %54 = dma.hbm_to_vmem [thread:$0]  %s3522_s2, 512, %s49_s14, [#allocation7], %s3030_s15, %s3030_s15, %s3031_s16  }
  0x5a   :  { %s2929_s1 = scalar_lea.hbm %s3524_s4, 1024 }
  0x5b   :  { %p2930_p12 = scmp.ne.s32.totalorder %s3524_s4, %s2929_s1  ;;  %p2933_p13 = scmp.lt.u32.totalorder %s2929_s1, %s3524_s4 }
  0x5d   :  { %p2935_p0 = pnand %p2933_p13, %p2930_p12 }
  0x5f   :  { %2938 = shalt.err (!%p2935_p0)
}
  0x60   :  { %s2939_s11 = scalar_lea.vmem %s3145_s18, 1024  ;;  %p2944_p2 = scmp.lt.s32.totalorder %s3145_s18, %s3145_s18 }
  0x61   :  { %p2940_p1 = scmp.ne.s32.totalorder %s3145_s18, %s2939_s11  ;;  %p2945_p3 = scmp.lt.s32.totalorder %s2939_s11, %s2939_s11 }
  0x63   :  { %p2946_p4 = por %p2945_p3, %p2944_p2 }
  0x65   :  { %p2947_p5 = pnand %p2946_p4, %p2940_p1 }
  0x67   :  { %2950 = shalt.err (!%p2947_p5)
}
  0x68   :  { %76 = dma.hbm_to_vmem [thread:$0]  %s3524_s4, 1024, %s3145_s18, [#allocation10], %s3030_s15, %s3030_s15, %s3031_s16  }
  0x69   :  { %s3039_s13 = smov [#allocation14]   ;;  %s3040_s17 = smov [#allocation15]  }
  0x6a   :  { %s92_s14 = sshll.u32 %s3039_s13, 4  ;;  %s105_s19 = sshll.u32 %s3040_s17, 4  ;;  %s93_s14 = int_to_ptr.vmem [resolvable:$true] %s92_s14  ;;  %s106_s19 = int_to_ptr.vmem [resolvable:$true] %s105_s19 }
  0x6b   :  { %s2951_s3 = scalar_lea.hbm %s3526_s6, 512 }
  0x6c   :  { %p2952_p6 = scmp.ne.s32.totalorder %s3526_s6, %s2951_s3  ;;  %p2955_p7 = scmp.lt.u32.totalorder %s2951_s3, %s3526_s6 }
  0x6e   :  { %p2957_p8 = pnand %p2955_p7, %p2952_p6 }
  0x70   :  { %2960 = shalt.err (!%p2957_p8)
}
  0x71   :  { %s2961_s4 = scalar_lea.vmem %s93_s14, 512  ;;  %p2966_p10 = scmp.lt.s32.totalorder %s93_s14, %s93_s14 }
  0x72   :  { %p2962_p9 = scmp.ne.s32.totalorder %s93_s14, %s2961_s4  ;;  %p2967_p11 = scmp.lt.s32.totalorder %s2961_s4, %s2961_s4 }
  0x74   :  { %p2968_p12 = por %p2967_p11, %p2966_p10 }
  0x76   :  { %p2969_p13 = pnand %p2968_p12, %p2962_p9 }
  0x78   :  { %2972 = shalt.err (!%p2969_p13)
}
  0x79   :  { %98 = dma.hbm_to_vmem [thread:$0]  %s3526_s6, 512, %s93_s14, [#allocation13], %s3030_s15, %s3030_s15, %s3031_s16  }
  0x7a   :  { %s2973_s30 = scalar_lea.hbm %s3527_s7, 16 }
  0x7b   :  { %p2974_p0 = scmp.ne.s32.totalorder %s3527_s7, %s2973_s30  ;;  %p2977_p1 = scmp.lt.u32.totalorder %s2973_s30, %s3527_s7 }
  0x7d   :  { %p2979_p2 = pnand %p2977_p1, %p2974_p0 }
  0x7f   :  { %2982 = shalt.err (!%p2979_p2)
}
  0x80   :  { %s2983_s22 = scalar_lea.vmem %s106_s19, 16  ;;  %s2987_s11 = scalar_lea.vmem %s106_s19, 32 }
  0x81   :  { %p2984_p3 = scmp.ne.s32.totalorder %s106_s19, %s2983_s22  ;;  %p2988_p4 = scmp.lt.s32.totalorder %s106_s19, %s106_s19 }
  0x82   :  { %p2989_p5 = scmp.lt.s32.totalorder %s2987_s11, %s2983_s22 }
  0x84   :  { %p2990_p6 = por %p2989_p5, %p2988_p4 }
  0x86   :  { %p2991_p7 = pnand %p2990_p6, %p2984_p3 }
  0x88   :  { %2994 = shalt.err (!%p2991_p7)
}
  0x89   :  { %108 = dma.hbm_to_vmem [thread:$0]  %s3527_s7, 16, %s106_s19, [#allocation16]  }
  0x8a   :  { %3017 = dma.done.wait [#allocation4], 256  }
  0x8b   :  { %3018 = vsyncadd [#allocation4], 4294967040 }
  0x8c   :  { %3019 = dma.done.wait [#allocation7], 1024  }
  0x8d   :  { %3020 = vsyncadd [#allocation7], 4294966272 }
  0x8e   :  { %3021 = dma.done.wait [#allocation10], 1040  }
  0x8f   :  { %3022 = vsyncadd [#allocation10], 4294966256 }
  0x90   :  { %3023 = dma.done.wait [#allocation13], 528  }
  0x91   :  { %3024 = vsyncadd [#allocation13], 4294966768 }
  0x92   :  { %3025 = dma.done.wait [#allocation16], 16  }
  0x93   :  { %3026 = vsyncadd [#allocation16], 4294967280  ;;  %v165_v0 = vlaneseq  ;;  %v3041_v1 = vmov 1983009808   ;;  %v3042_v3 = vmov 0.0|0.0   ;;  %vm3043_vm0 = vmmov 0  }
  0x94   :  { %v163_v2 = vunpack.c.l.s4 %v3041_v1  ;;  %2523 = vmatprep.subr.bf16.mxu1 %v3042_v3  ;;  %v3044_v4 = vmov 0.0   ;;  %v141_v7 = vld [vmem:[#allocation6] sm:$0xff]  ;;  %v142_v8 = vld [vmem:[#allocation6 + $0x8] sm:$0xff]  ;;  %v143_v9 = vld [vmem:[#allocation6 + $0x10] sm:$0xff]  ;;  %vm194_vm1 = vcmask 261120   ;;  %s3045_s7 = smov 64  }
  0x95   :  { %2272 = vmatprep.mubr.msk.f32.mxu1 %vm3043_vm0, %v3044_v4  ;;  %v166_v6 = vshrl.u32 %v165_v0, 7  ;;  %v2515_v11 = vpack.c.bf16 %v142_v8, %v141_v7  ;;  %v144_v12 = vld [vmem:[#allocation6 + $0x18] sm:$0xff]  ;;  %v133_v13 = vld [vmem:[#allocation3] sm:$0x3]  ;;  %v134_v14 = vld [vmem:[#allocation3 + $0x2] sm:$0x3] }
  0x96   :  { %v164_v5 = vunpack.c.0.s8 %v163_v2  ;;  %v2519_v15 = vpack.c.bf16 %v144_v12, %v143_v9  ;;  %v135_v16 = vld [vmem:[#allocation3 + $0x4] sm:$0x3]  ;;  %v136_v17 = vld [vmem:[#allocation3 + $0x6] sm:$0x3]  ;;  %v160_v18 = vcombine.low %v133_v13, %v134_v14  ;;  %v137_v19 = vld [vmem:[#allocation3 + $0x8] sm:$0x3] }
  0x97   :  { %2516 = vmatprep.subr.bf16.mxu0 %v2515_v11  ;;  %v161_v20 = vcombine.low %v135_v16, %v136_v17  ;;  %v138_v21 = vld [vmem:[#allocation3 + $0xa] sm:$0x3]  ;;  %v139_v22 = vld [vmem:[#allocation3 + $0xc] sm:$0x3]  ;;  %v140_v23 = vld [vmem:[#allocation3 + $0xe] sm:$0x3] }
  0x98   :  { %v3212_v10 = vsub.s32 %v164_v5, %v166_v6  ;;  %2518 = vmatpush3.bf16.msra.mxu0 %v2515_v11  ;;  %v177_v25 = vcombine.low %v137_v19, %v138_v21  ;;  %v178_v26 = vcombine.low %v139_v22, %v140_v23  ;;  %v326_v27 = vld [vmem:[#allocation8] sm:$0xff]  ;;  %v327_v28 = vld [vmem:[#allocation8 + $0x8] sm:$0xff]  ;;  %v328_v29 = vld [vmem:[#allocation8 + $0x10] sm:$0xff]  ;;  %vm449_vm2 = vcmask 523264   ;;  %s3046_s16 = smov [#allocation17]  }
  0x99   :  { %2520 = vmatprep.subr.bf16.mxu0 %v2519_v15  ;;  %v3216_v31 = vpack.c.bf16 %v327_v28, %v326_v27  ;;  %v329_v32 = vld [vmem:[#allocation8 + $0x18] sm:$0xff]  ;;  %v2089_v38 = vld [vmem:[#allocation9] ss:$0 sm:$0xff]  ;;  %v330_v5 = vld [vmem:[#allocation11] sm:$0xff]  ;;  %s2076_s2 = sshll.u32 %s3046_s16, 4  ;;  %vm2068_vm3 = vcmask 254976   ;;  %s2077_s2 = int_to_ptr.vmem [resolvable:$true] %s2076_s2 }
  0x9a   :  { %v168_v24 = vrot.slane %v160_v18, %v3212_v10  ;;  %v175_v30 = vrot.slane %v161_v20, %v3212_v10  ;;  %v185_v33 = vrot.slane %v177_v25, %v3212_v10  ;;  %v192_v34 = vrot.slane %v178_v26, %v3212_v10  ;;  %v331_v6 = vld [vmem:[#allocation11 + $0x8] sm:$0xff]  ;;  %v332_v7 = vld [vmem:[#allocation11 + $0x10] sm:$0xff]  ;;  %v333_v9 = vld [vmem:[#allocation11 + $0x18] sm:$0xff]  ;;  %s2995_s12 = scalar_lea.vmem %s2077_s2, 32  ;;  %p3000_p9 = scmp.lt.s32.totalorder %s2077_s2, %s2077_s2 }
  0x9b   :  { %2525 = vmatpush3.bf16.msra.mxu1 %v3216_v31  ;;  %v3221_v36 = vpack.c.bf16 %v329_v32, %v328_v29  ;;  %v3247_v8 = vpack.c.bf16 %v331_v6, %v330_v5  ;;  %v334_v11 = vld [vmem:[#allocation11 + $0x20] sm:$0xff]  ;;  %v335_v12 = vld [vmem:[#allocation11 + $0x28] sm:$0xff]  ;;  %v336_v14 = vld [vmem:[#allocation11 + $0x30] sm:$0xff]  ;;  %p2996_p8 = scmp.ne.s32.totalorder %s2077_s2, %s2995_s12  ;;  %p3001_p10 = scmp.lt.s32.totalorder %s2995_s12, %s2995_s12 }
  0x9c   :  { %v176_v35 = vcombine.low %v168_v24, %v175_v30  ;;  %2522 = vmatpush3.bf16.msra.mxu0 %v2519_v15  ;;  %v193_v37 = vcombine.low %v185_v33, %v192_v34  ;;  %2526 = vmatprep.subr.bf16.mxu1 %v3042_v3  ;;  %v3254_v13 = vpack.c.bf16 %v335_v12, %v334_v11  ;;  %v337_v15 = vld [vmem:[#allocation11 + $0x38] sm:$0xff]  ;;  %v3284_v22 = vld [vmem:[#allocation12] ss:$0 sm:$0xff] }
  0x9d   :  { %2529 = vmatprep.subr.bf16.mxu0 %v3042_v3  ;;  %v3259_v17 = vpack.c.bf16 %v337_v15, %v336_v14  ;;  %p3002_p11 = por %p3001_p10, %p3000_p9 }
  0x9e   :  { %2261 = vmatprep.mubr.msk.f32.mxu0 %vm194_vm1, %v176_v35 }
  0x9f   :  { %2262 = vmatmul.mubr.msk.f32.vlgmr.msra.gmra.mrb[0].mxu0 %vm194_vm1, %v193_v37  ;;  %2528 = vmatpush3.bf16.msra.mxu1 %v3221_v36  ;;  %p3003_p12 = pnand %p3002_p11, %p2996_p8 }
  0xa0   :  { %2541 = vmatprep.subr.bf16.mxu1 %v3042_v3  ;;  %2291 = vmatprep.mubr.msk.f32.mxu0 %vm3043_vm0, %v3044_v4 }
  0xa1   :  { %2531 = vmatpush3.bf16.msra.mxu0 %v3247_v8 }
  0xa2   :  { %2273 = vmatmul.mubr.f32.vlgmr.msra.gmra.mrb[0].mxu1 %v3044_v4  ;;  %2532 = vmatprep.subr.bf16.mxu0 %v3042_v3 }
  0xa3   :  { %2543 = vmatpush3.bf16.msra.mxu1 %v3216_v31  ;;  %2302 = vmatprep.mubr.msk.f32.mxu1 %vm3043_vm0, %v3044_v4 }
  0xa4   :  { %2544 = vmatprep.subr.bf16.mxu1 %v3042_v3 }
  0xa7   :  { %2546 = vmatpush3.bf16.msra.mxu1 %v3221_v36 }
  0xa8   :  { %2547 = vmatprep.subr.bf16.mxu1 %v3042_v3 }
 0x172   :  { %v2263_v39 = vpop.f32.mrb[0].mxu0 }
 0x173   :  { %v271_v40 = vadd.f32 %v2263_v39, %v2089_v38  ;;  %v265_v41 = vpop.f32.mrb[1].mxu0 }
 0x174   :  { %v266_v42 = vadd.f32 %v2089_v38, %v265_v41 }
 0x175   :  { %v293_v43 = vcombine.high %v271_v40, %v271_v40  ;;  %v300_v44 = vrot.slane %v271_v40, %v3212_v10  ;;  %2094 = vst.sshfl [vmem:[#allocation2 + $0x8] sm:$0x3 pattern:$0x76325410] %v271_v40  ;;  %v409_v45 = vpop.f32.mrb[0].mxu1 }
 0x176   :  { %v276_v46 = vcombine.high %v266_v42, %v266_v42  ;;  %v283_v47 = vrot.slane %v266_v42, %v3212_v10  ;;  %2092 = vst.sshfl [vmem:[#allocation2] sm:$0x3 pattern:$0x76325410] %v266_v42  ;;  %v2274_v48 = vpop.f32.mrb[1].mxu1 }
 0x177   :  { %v307_v49 = vrot.slane %v293_v43, %v3212_v10  ;;  %v308_v50 = vcombine.high %v300_v44, %v300_v44  ;;  %2095 = vst.sshfl [vmem:[#allocation2 + $0xc] sm:$0x3 pattern:$0x76325410] %v293_v43 }
 0x178   :  { %v290_v51 = vrot.slane %v276_v46, %v3212_v10  ;;  %v291_v52 = vcombine.high %v283_v47, %v283_v47  ;;  %2093 = vst.sshfl [vmem:[#allocation2 + $0x4] sm:$0x3 pattern:$0x76325410] %v276_v46  ;;  %v3250_v10 = vpack.c.bf16 %v333_v9, %v332_v7 }
 0x179   :  { %v309_v53 = vcombine.high %v307_v49, %v307_v49  ;;  %323 = vst [vmem:[#allocation2 + $0xa] sm:$0x3] %v308_v50 }
 0x17a   :  { %v292_v54 = vcombine.high %v290_v51, %v290_v51  ;;  %319 = vst [vmem:[#allocation2 + $0x2] sm:$0x3] %v291_v52  ;;  %2534 = vmatpush3.bf16.msra.mxu0 %v3250_v10 }
 0x17b   :  { %325 = vst [vmem:[#allocation2 + $0xe] sm:$0x3] %v309_v53  ;;  %2535 = vmatprep.subr.bf16.mxu0 %v3042_v3 }
 0x17c   :  { %321 = vst [vmem:[#allocation2 + $0x6] sm:$0x3] %v292_v54 }
 0x17d   :  { %v339_v55 = vld [vmem:[#allocation2] sm:$0x3] }
 0x17e   :  { %v413_v56 = vadd.f32 %v409_v45, %v339_v55  ;;  %2537 = vmatpush3.bf16.msra.mxu0 %v3254_v13 }
 0x17f   :  { %2538 = vmatprep.subr.bf16.mxu0 %v3042_v3 }
 0x180   :  { %2691 = vtanh.f32 %v413_v56  ;;  %v2096_v58 = vmul.f32 -1.442695, %v413_v56 }
 0x181   :  { %v548_v23 = vld [vmem:[#allocation2 + $0x2] sm:$0x3] }
 0x182   :  { %2693 = vpow2.f32 %v2096_v58  ;;  %2540 = vmatpush3.bf16.msra.mxu0 %v3259_v17 }
 0x183   :  { %2559 = vmatprep.subr.bf16.mxu0 %v3042_v3 }
 0x18a   :  { %v2692_v57 = vpop.eup %2691 }
 0x18b   :  { %423 = vrot.lane.b32.xlu0 %v2692_v57, %s3045_s7 }
 0x18c   :  { %v2694_v59 = vpop.eup %2693 }
 0x18d   :  { %v417_v60 = vadd.f32 1.0, %v2694_v59 }
 0x18f   :  { %2695 = vrcp.f32 %v417_v60 }
 0x199   :  { %v2696_v61 = vpop.eup %2695 }
 0x19a   :  { %v421_v0 = vmul.f32 0.0, %v2696_v61 }
 0x1fd   :  { %v424_v62 = vpop.permute.xlu0 %423 }
 0x1fe   :  { %v426_v63 = vmul.f32 %v2696_v61, %v424_v62 }
 0x200   :  { %428 = vrot.lane.b32.xlu0 %v426_v63, %s3035_s5 }
 0x272   :  { %v429_v1 = vpop.permute.xlu0 %428 }
 0x273   :  { %v3244_v2 = vadd.f32 %v429_v1, %v421_v0 }
 0x275   :  { %2697 = vtanh.f32 %v3244_v2 }
 0x27f   :  { %v2698_v16 = vpop.eup %2697 }
 0x280   :  { %434 = vrot.lane.b32.xlu1 %v2698_v16, %s3045_s7 }
 0x2f2   :  { %v435_v18 = vpop.permute.xlu1 %434 }
 0x2f3   :  { %v437_v19 = vmul.f32 %v2696_v61, %v435_v18  ;;  %v753_v61 = vld [vmem:[#allocation2 + $0x4] sm:$0x3] }
 0x2f5   :  { %439 = vrot.lane.b32.xlu1 %v437_v19, %s3035_s5 }
 0x367   :  { %v440_v20 = vpop.permute.xlu1 %439 }
 0x368   :  { %v442_v21 = vsel %vm194_vm1, %v440_v20, 0.0  ;;  %2303 = vmatmul.mubr.msk.f32.vlgmr.msra.gmra.mrb[2].mxu1 %vm194_vm1, %v440_v20 }
 0x369   :  { %2292 = vmatmul.mubr.msk.f32.vlgmr.msra.gmra.mrb[2].mxu0 %vm449_vm2, %v442_v21  ;;  %2549 = vmatpush3.bf16.msra.mxu1 %v3247_v8 }
 0x36a   :  { %2550 = vmatprep.subr.bf16.mxu1 %v3042_v3  ;;  %2561 = vmatpush3.bf16.msra.mxu0 %v3216_v31 }
 0x36b   :  { %2562 = vmatprep.subr.bf16.mxu0 %v3042_v3  ;;  %2332 = vmatprep.mubr.msk.f32.mxu0 %vm3043_vm0, %v3044_v4 }
 0x36c   :  { %2321 = vmatprep.mubr.msk.f32.mxu1 %vm3043_vm0, %v3044_v4 }
 0x36d   :  { %2552 = vmatpush3.bf16.msra.mxu1 %v3250_v10 }
 0x36e   :  { %2553 = vmatprep.subr.bf16.mxu1 %v3042_v3  ;;  %2564 = vmatpush3.bf16.msra.mxu0 %v3221_v36 }
 0x36f   :  { %2565 = vmatprep.subr.bf16.mxu0 %v3042_v3 }
 0x371   :  { %2555 = vmatpush3.bf16.msra.mxu1 %v3254_v13 }
 0x372   :  { %2556 = vmatprep.subr.bf16.mxu1 %v3042_v3 }
 0x375   :  { %2558 = vmatpush3.bf16.msra.mxu1 %v3259_v17 }
 0x376   :  { %2577 = vmatprep.subr.bf16.mxu1 %v3042_v3 }
 0x43b   :  { %v617_v24 = vpop.f32.mrb[2].mxu1 }
 0x43c   :  { %v621_v25 = vadd.f32 %v617_v24, %v548_v23  ;;  %v519_v26 = vpop.f32.mrb[2].mxu0  ;;  %v2304_v27 = vpop.f32.mrb[3].mxu1 }
 0x43d   :  { %v520_v28 = vadd.f32 %v3284_v22, %v519_v26  ;;  %v2293_v29 = vpop.f32.mrb[3].mxu0 }
 0x43e   :  { %2699 = vtanh.f32 %v621_v25  ;;  %v2101_v33 = vmul.f32 -1.442695, %v621_v25 }
 0x43f   :  { %2701 = vtanh.f32 %v520_v28  ;;  %v2099_v34 = vmul.f32 -1.442695, %v520_v28 }
 0x440   :  { %2703 = vpow2.f32 %v2101_v33 }
 0x441   :  { %2705 = vpow2.f32 %v2099_v34 }
 0x448   :  { %v2700_v30 = vpop.eup %2699 }
 0x449   :  { %v2702_v32 = vpop.eup %2701  ;;  %631 = vrot.lane.b32.xlu1 %v2700_v30, %s3045_s7 }
 0x44a   :  { %532 = vrot.lane.b32.xlu0 %v2702_v32, %s3045_s7  ;;  %v2704_v35 = vpop.eup %2703 }
 0x44b   :  { %v2706_v37 = vpop.eup %2705  ;;  %v625_v38 = vadd.f32 1.0, %v2704_v35 }
 0x44c   :  { %v526_v39 = vadd.f32 1.0, %v2706_v37 }
 0x44d   :  { %2707 = vrcp.f32 %v625_v38 }
 0x44e   :  { %2709 = vrcp.f32 %v526_v39 }
 0x457   :  { %v2708_v40 = vpop.eup %2707 }
 0x458   :  { %v2710_v42 = vpop.eup %2709  ;;  %v629_v46 = vmul.f32 %v2708_v40, %v3244_v2 }
 0x459   :  { %v530_v48 = vmul.f32 0.0, %v2710_v42 }
 0x4bb   :  { %v632_v41 = vpop.permute.xlu1 %631 }
 0x4bc   :  { %v634_v43 = vmul.f32 %v2708_v40, %v632_v41  ;;  %v533_v44 = vpop.permute.xlu0 %532 }
 0x4bd   :  { %v535_v45 = vmul.f32 %v2710_v42, %v533_v44 }
 0x4be   :  { %636 = vrot.lane.b32.xlu1 %v634_v43, %s3035_s5 }
 0x4bf   :  { %537 = vrot.lane.b32.xlu0 %v535_v45, %s3035_s5 }
 0x530   :  { %v637_v47 = vpop.permute.xlu1 %636 }
 0x531   :  { %v3292_v49 = vadd.f32 %v637_v47, %v629_v46  ;;  %v538_v50 = vpop.permute.xlu0 %537 }
 0x532   :  { %v3294_v51 = vadd.f32 %v538_v50, %v530_v48 }
 0x533   :  { %2711 = vtanh.f32 %v3292_v49 }
 0x534   :  { %2713 = vtanh.f32 %v3294_v51 }
 0x53d   :  { %v2712_v52 = vpop.eup %2711 }
 0x53e   :  { %v2714_v53 = vpop.eup %2713  ;;  %642 = vrot.lane.b32.xlu1 %v2712_v52, %s3045_s7 }
 0x53f   :  { %543 = vrot.lane.b32.xlu0 %v2714_v53, %s3045_s7 }
 0x5b0   :  { %v643_v54 = vpop.permute.xlu1 %642 }
 0x5b1   :  { %v645_v55 = vmul.f32 %v2708_v40, %v643_v54  ;;  %v544_v56 = vpop.permute.xlu0 %543 }
 0x5b2   :  { %v546_v57 = vmul.f32 %v2710_v42, %v544_v56  ;;  %v958_v42 = vld [vmem:[#allocation2 + $0x6] sm:$0x3] }
 0x5b3   :  { %647 = vrot.lane.b32.xlu0 %v645_v55, %s3035_s5 }
 0x5b4   :  { %651 = vrot.lane.b32.xlu1 %v546_v57, %s3045_s7 }
 0x625   :  { %v648_v58 = vpop.permute.xlu0 %647 }
 0x626   :  { %2333 = vmatmul.mubr.msk.f32.vlgmr.msra.gmra.mrb[4].mxu0 %vm194_vm1, %v648_v58  ;;  %v652_v59 = vpop.permute.xlu1 %651 }
 0x627   :  { %v654_v60 = vsel %vm194_vm1, %v648_v58, %v652_v59  ;;  %2567 = vmatpush3.bf16.msra.mxu0 %v3247_v8  ;;  %2351 = vmatprep.mubr.msk.f32.mxu0 %vm3043_vm0, %v3044_v4 }
 0x628   :  { %2322 = vmatmul.mubr.msk.f32.vlgmr.msra.gmra.mrb[4].mxu1 %vm449_vm2, %v654_v60  ;;  %2568 = vmatprep.subr.bf16.mxu0 %v3042_v3 }
 0x629   :  { %2579 = vmatpush3.bf16.msra.mxu1 %v3216_v31  ;;  %2362 = vmatprep.mubr.msk.f32.mxu1 %vm3043_vm0, %v3044_v4 }
 0x62a   :  { %2580 = vmatprep.subr.bf16.mxu1 %v3042_v3 }
 0x62b   :  { %2570 = vmatpush3.bf16.msra.mxu0 %v3250_v10 }
 0x62c   :  { %2571 = vmatprep.subr.bf16.mxu0 %v3042_v3 }
 0x62d   :  { %2582 = vmatpush3.bf16.msra.mxu1 %v3221_v36 }
 0x62e   :  { %2583 = vmatprep.subr.bf16.mxu1 %v3042_v3 }
 0x62f   :  { %2573 = vmatpush3.bf16.msra.mxu0 %v3254_v13 }
 0x630   :  { %2574 = vmatprep.subr.bf16.mxu0 %v3042_v3 }
 0x633   :  { %2576 = vmatpush3.bf16.msra.mxu0 %v3259_v17 }
 0x634   :  { %2595 = vmatprep.subr.bf16.mxu0 %v3042_v3 }
 0x6f9   :  { %v822_v62 = vpop.f32.mrb[4].mxu0 }
 0x6fa   :  { %v826_v63 = vadd.f32 %v822_v62, %v753_v61  ;;  %v2334_v0 = vpop.f32.mrb[5].mxu0 }
 0x6fb   :  { %v724_v1 = vpop.f32.mrb[4].mxu1 }
 0x6fc   :  { %2715 = vtanh.f32 %v826_v63  ;;  %v725_v2 = vadd.f32 %v3284_v22, %v724_v1  ;;  %v2323_v5 = vpop.f32.mrb[5].mxu1  ;;  %v2105_v9 = vmul.f32 -1.442695, %v826_v63 }
 0x6fe   :  { %2717 = vtanh.f32 %v725_v2  ;;  %v2103_v11 = vmul.f32 -1.442695, %v725_v2 }
 0x6ff   :  { %2719 = vpow2.f32 %v2105_v9 }
 0x700   :  { %2721 = vpow2.f32 %v2103_v11 }
 0x706   :  { %v2716_v6 = vpop.eup %2715 }
 0x707   :  { %836 = vrot.lane.b32.xlu1 %v2716_v6, %s3045_s7 }
 0x708   :  { %v2718_v7 = vpop.eup %2717 }
 0x709   :  { %737 = vrot.lane.b32.xlu0 %v2718_v7, %s3045_s7  ;;  %v2720_v12 = vpop.eup %2719 }
 0x70a   :  { %v2722_v14 = vpop.eup %2721  ;;  %v830_v15 = vadd.f32 1.0, %v2720_v12 }
 0x70b   :  { %v731_v16 = vadd.f32 1.0, %v2722_v14 }
 0x70c   :  { %2723 = vrcp.f32 %v830_v15 }
 0x70d   :  { %2725 = vrcp.f32 %v731_v16 }
 0x716   :  { %v2724_v18 = vpop.eup %2723 }
 0x717   :  { %v2726_v21 = vpop.eup %2725  ;;  %v834_v25 = vmul.f32 %v2724_v18, %v3292_v49 }
 0x718   :  { %v735_v28 = vmul.f32 %v2726_v21, %v3294_v51 }
 0x779   :  { %v837_v19 = vpop.permute.xlu1 %836 }
 0x77a   :  { %v839_v20 = vmul.f32 %v2724_v18, %v837_v19 }
 0x77b   :  { %v738_v23 = vpop.permute.xlu0 %737 }
 0x77c   :  { %841 = vrot.lane.b32.xlu1 %v839_v20, %s3035_s5  ;;  %v740_v24 = vmul.f32 %v2726_v21, %v738_v23  ;;  %v1163_v20 = vld [vmem:[#allocation2 + $0x8] sm:$0x3] }
 0x77e   :  { %742 = vrot.lane.b32.xlu0 %v740_v24, %s3035_s5 }
 0x7ee   :  { %v842_v26 = vpop.permute.xlu1 %841 }
 0x7ef   :  { %v3327_v27 = vadd.f32 %v842_v26, %v834_v25 }
 0x7f0   :  { %v743_v29 = vpop.permute.xlu0 %742 }
 0x7f1   :  { %2727 = vtanh.f32 %v3327_v27  ;;  %v3331_v30 = vadd.f32 %v743_v29, %v735_v28 }
 0x7f3   :  { %2729 = vtanh.f32 %v3331_v30 }
 0x7fb   :  { %v2728_v32 = vpop.eup %2727 }
 0x7fc   :  { %847 = vrot.lane.b32.xlu1 %v2728_v32, %s3045_s7 }
 0x7fd   :  { %v2730_v33 = vpop.eup %2729 }
 0x7fe   :  { %748 = vrot.lane.b32.xlu0 %v2730_v33, %s3045_s7 }
 0x86e   :  { %v848_v34 = vpop.permute.xlu1 %847 }
 0x86f   :  { %v850_v35 = vmul.f32 %v2724_v18, %v848_v34 }
 0x870   :  { %v749_v37 = vpop.permute.xlu0 %748 }
 0x871   :  { %852 = vrot.lane.b32.xlu0 %v850_v35, %s3035_s5  ;;  %v751_v38 = vmul.f32 %v2726_v21, %v749_v37 }
 0x873   :  { %856 = vrot.lane.b32.xlu1 %v751_v38, %s3045_s7 }
 0x8e3   :  { %v853_v39 = vpop.permute.xlu0 %852 }
 0x8e4   :  { %2363 = vmatmul.mubr.msk.f32.vlgmr.msra.gmra.mrb[6].mxu1 %vm194_vm1, %v853_v39 }
 0x8e5   :  { %2585 = vmatpush3.bf16.msra.mxu1 %v3247_v8  ;;  %2381 = vmatprep.mubr.msk.f32.mxu1 %vm3043_vm0, %v3044_v4  ;;  %v857_v40 = vpop.permute.xlu1 %856 }
 0x8e6   :  { %2586 = vmatprep.subr.bf16.mxu1 %v3042_v3  ;;  %v859_v41 = vsel %vm194_vm1, %v853_v39, %v857_v40 }
 0x8e7   :  { %2352 = vmatmul.mubr.msk.f32.vlgmr.msra.gmra.mrb[6].mxu0 %vm449_vm2, %v859_v41 }
 0x8e8   :  { %2597 = vmatpush3.bf16.msra.mxu0 %v3216_v31  ;;  %2392 = vmatprep.mubr.msk.f32.mxu0 %vm3043_vm0, %v3044_v4 }
 0x8e9   :  { %2588 = vmatpush3.bf16.msra.mxu1 %v3250_v10  ;;  %2598 = vmatprep.subr.bf16.mxu0 %v3042_v3 }
 0x8ea   :  { %2589 = vmatprep.subr.bf16.mxu1 %v3042_v3 }
 0x8ec   :  { %2600 = vmatpush3.bf16.msra.mxu0 %v3221_v36 }
 0x8ed   :  { %2591 = vmatpush3.bf16.msra.mxu1 %v3254_v13  ;;  %2601 = vmatprep.subr.bf16.mxu0 %v3042_v3 }
 0x8ee   :  { %2592 = vmatprep.subr.bf16.mxu1 %v3042_v3 }
 0x8f1   :  { %2594 = vmatpush3.bf16.msra.mxu1 %v3259_v17 }
 0x8f2   :  { %2613 = vmatprep.subr.bf16.mxu1 %v3042_v3 }
 0x9b7   :  { %v1027_v43 = vpop.f32.mrb[6].mxu1 }
 0x9b8   :  { %v1031_v44 = vadd.f32 %v1027_v43, %v958_v42  ;;  %v2364_v45 = vpop.f32.mrb[7].mxu1 }
 0x9ba   :  { %2731 = vtanh.f32 %v1031_v44  ;;  %v929_v46 = vpop.f32.mrb[6].mxu0  ;;  %v2109_v51 = vmul.f32 -1.442695, %v1031_v44 }
 0x9bb   :  { %v930_v47 = vadd.f32 %v3284_v22, %v929_v46  ;;  %v2353_v48 = vpop.f32.mrb[7].mxu0 }
 0x9bd   :  { %2733 = vtanh.f32 %v930_v47  ;;  %v2107_v52 = vmul.f32 -1.442695, %v930_v47 }
 0x9be   :  { %2735 = vpow2.f32 %v2109_v51 }
 0x9bf   :  { %2737 = vpow2.f32 %v2107_v52 }
 0x9c4   :  { %v2732_v49 = vpop.eup %2731 }
 0x9c5   :  { %1041 = vrot.lane.b32.xlu1 %v2732_v49, %s3045_s7 }
 0x9c7   :  { %v2734_v50 = vpop.eup %2733 }
 0x9c8   :  { %942 = vrot.lane.b32.xlu0 %v2734_v50, %s3045_s7  ;;  %v2736_v53 = vpop.eup %2735 }
 0x9c9   :  { %v1035_v54 = vadd.f32 1.0, %v2736_v53  ;;  %v2738_v55 = vpop.eup %2737 }
 0x9ca   :  { %v936_v56 = vadd.f32 1.0, %v2738_v55 }
 0x9cb   :  { %2739 = vrcp.f32 %v1035_v54 }
 0x9cc   :  { %2741 = vrcp.f32 %v936_v56 }
 0x9d5   :  { %v2740_v57 = vpop.eup %2739 }
 0x9d6   :  { %v2742_v60 = vpop.eup %2741  ;;  %v1039_v63 = vmul.f32 %v2740_v57, %v3327_v27 }
 0x9d7   :  { %v940_v2 = vmul.f32 %v2742_v60, %v3331_v30 }
 0xa37   :  { %v1042_v58 = vpop.permute.xlu1 %1041 }
 0xa38   :  { %v1044_v59 = vmul.f32 %v2740_v57, %v1042_v58 }
 0xa3a   :  { %1046 = vrot.lane.b32.xlu1 %v1044_v59, %s3035_s5  ;;  %v943_v61 = vpop.permute.xlu0 %942  ;;  %v1368_v59 = vld [vmem:[#allocation2 + $0xa] sm:$0x3] }
 0xa3b   :  { %v945_v62 = vmul.f32 %v2742_v60, %v943_v61 }
 0xa3d   :  { %947 = vrot.lane.b32.xlu0 %v945_v62, %s3035_s5 }
 0xaac   :  { %v1047_v0 = vpop.permute.xlu1 %1046 }
 0xaad   :  { %v3363_v1 = vadd.f32 %v1047_v0, %v1039_v63 }
 0xaaf   :  { %2743 = vtanh.f32 %v3363_v1  ;;  %v948_v5 = vpop.permute.xlu0 %947 }
 0xab0   :  { %v3367_v6 = vadd.f32 %v948_v5, %v940_v2 }
 0xab2   :  { %2745 = vtanh.f32 %v3367_v6 }
 0xab9   :  { %v2744_v7 = vpop.eup %2743 }
 0xaba   :  { %1052 = vrot.lane.b32.xlu1 %v2744_v7, %s3045_s7 }
 0xabc   :  { %v2746_v9 = vpop.eup %2745 }
 0xabd   :  { %953 = vrot.lane.b32.xlu0 %v2746_v9, %s3045_s7 }
 0xb2c   :  { %v1053_v11 = vpop.permute.xlu1 %1052 }
 0xb2d   :  { %v1055_v12 = vmul.f32 %v2740_v57, %v1053_v11 }
 0xb2f   :  { %1057 = vrot.lane.b32.xlu0 %v1055_v12, %s3035_s5  ;;  %v954_v14 = vpop.permute.xlu0 %953 }
 0xb30   :  { %v956_v15 = vmul.f32 %v2742_v60, %v954_v14 }
 0xb32   :  { %1061 = vrot.lane.b32.xlu1 %v956_v15, %s3045_s7 }
 0xba1   :  { %v1058_v16 = vpop.permute.xlu0 %1057 }
 0xba2   :  { %2393 = vmatmul.mubr.msk.f32.vlgmr.msra.gmra.mrb[8].mxu0 %vm194_vm1, %v1058_v16 }
 0xba3   :  { %2603 = vmatpush3.bf16.msra.mxu0 %v3247_v8  ;;  %2411 = vmatprep.mubr.msk.f32.mxu0 %vm3043_vm0, %v3044_v4 }
 0xba4   :  { %2604 = vmatprep.subr.bf16.mxu0 %v3042_v3  ;;  %v1062_v18 = vpop.permute.xlu1 %1061 }
 0xba5   :  { %v1064_v19 = vsel %vm194_vm1, %v1058_v16, %v1062_v18 }
 0xba6   :  { %2382 = vmatmul.mubr.msk.f32.vlgmr.msra.gmra.mrb[8].mxu1 %vm449_vm2, %v1064_v19 }
 0xba7   :  { %2606 = vmatpush3.bf16.msra.mxu0 %v3250_v10  ;;  %2615 = vmatpush3.bf16.msra.mxu1 %v3216_v31 }
 0xba8   :  { %2607 = vmatprep.subr.bf16.mxu0 %v3042_v3  ;;  %2616 = vmatprep.subr.bf16.mxu1 %v3042_v3 }
 0xba9   :  { %2422 = vmatprep.mubr.msk.f32.mxu1 %vm3043_vm0, %v3044_v4 }
 0xbab   :  { %2609 = vmatpush3.bf16.msra.mxu0 %v3254_v13  ;;  %2618 = vmatpush3.bf16.msra.mxu1 %v3221_v36 }
 0xbac   :  { %2610 = vmatprep.subr.bf16.mxu0 %v3042_v3  ;;  %2619 = vmatprep.subr.bf16.mxu1 %v3042_v3 }
 0xbaf   :  { %2612 = vmatpush3.bf16.msra.mxu0 %v3259_v17 }
 0xbb0   :  { %2631 = vmatprep.subr.bf16.mxu0 %v3042_v3 }
 0xc75   :  { %v1232_v21 = vpop.f32.mrb[8].mxu0 }
 0xc76   :  { %v1236_v23 = vadd.f32 %v1232_v21, %v1163_v20  ;;  %v2394_v24 = vpop.f32.mrb[9].mxu0 }
 0xc78   :  { %2747 = vtanh.f32 %v1236_v23  ;;  %v2113_v30 = vmul.f32 -1.442695, %v1236_v23 }
 0xc79   :  { %v1134_v25 = vpop.f32.mrb[8].mxu1 }
 0xc7a   :  { %v1135_v26 = vadd.f32 %v3284_v22, %v1134_v25  ;;  %v2383_v27 = vpop.f32.mrb[9].mxu1 }
 0xc7c   :  { %2749 = vtanh.f32 %v1135_v26  ;;  %v2111_v32 = vmul.f32 -1.442695, %v1135_v26 }
 0xc7d   :  { %2751 = vpow2.f32 %v2113_v30 }
 0xc7e   :  { %2753 = vpow2.f32 %v2111_v32 }
 0xc82   :  { %v2748_v28 = vpop.eup %2747 }
 0xc83   :  { %1246 = vrot.lane.b32.xlu1 %v2748_v28, %s3045_s7 }
 0xc86   :  { %v2750_v29 = vpop.eup %2749 }
 0xc87   :  { %1147 = vrot.lane.b32.xlu0 %v2750_v29, %s3045_s7  ;;  %v2752_v33 = vpop.eup %2751 }
 0xc88   :  { %v1240_v34 = vadd.f32 1.0, %v2752_v33  ;;  %v2754_v35 = vpop.eup %2753 }
 0xc89   :  { %v1141_v37 = vadd.f32 1.0, %v2754_v35 }
 0xc8a   :  { %2755 = vrcp.f32 %v1240_v34 }
 0xc8b   :  { %2757 = vrcp.f32 %v1141_v37 }
 0xc94   :  { %v2756_v38 = vpop.eup %2755 }
 0xc95   :  { %v2758_v41 = vpop.eup %2757  ;;  %v1244_v44 = vmul.f32 %v2756_v38, %v3363_v1 }
 0xc96   :  { %v1145_v47 = vmul.f32 %v2758_v41, %v3367_v6 }
 0xcf5   :  { %v1247_v39 = vpop.permute.xlu1 %1246 }
 0xcf6   :  { %v1249_v40 = vmul.f32 %v2756_v38, %v1247_v39 }
 0xcf8   :  { %1251 = vrot.lane.b32.xlu1 %v1249_v40, %s3035_s5  ;;  %v1573_v40 = vld [vmem:[#allocation2 + $0xc] sm:$0x3] }
 0xcf9   :  { %v1148_v42 = vpop.permute.xlu0 %1147 }
 0xcfa   :  { %v1150_v43 = vmul.f32 %v2758_v41, %v1148_v42 }
 0xcfc   :  { %1152 = vrot.lane.b32.xlu0 %v1150_v43, %s3035_s5 }
 0xd6a   :  { %v1252_v45 = vpop.permute.xlu1 %1251 }
 0xd6b   :  { %v3399_v46 = vadd.f32 %v1252_v45, %v1244_v44 }
 0xd6d   :  { %2759 = vtanh.f32 %v3399_v46 }
 0xd6e   :  { %v1153_v48 = vpop.permute.xlu0 %1152 }
 0xd6f   :  { %v3403_v49 = vadd.f32 %v1153_v48, %v1145_v47 }
 0xd71   :  { %2761 = vtanh.f32 %v3403_v49 }
 0xd77   :  { %v2760_v50 = vpop.eup %2759 }
 0xd78   :  { %1257 = vrot.lane.b32.xlu1 %v2760_v50, %s3045_s7 }
 0xd7b   :  { %v2762_v51 = vpop.eup %2761 }
 0xd7c   :  { %1158 = vrot.lane.b32.xlu0 %v2762_v51, %s3045_s7 }
 0xdea   :  { %v1258_v52 = vpop.permute.xlu1 %1257 }
 0xdeb   :  { %v1260_v53 = vmul.f32 %v2756_v38, %v1258_v52 }
 0xded   :  { %1262 = vrot.lane.b32.xlu0 %v1260_v53, %s3035_s5 }
 0xdee   :  { %v1159_v54 = vpop.permute.xlu0 %1158 }
 0xdef   :  { %v1161_v55 = vmul.f32 %v2758_v41, %v1159_v54 }
 0xdf1   :  { %1266 = vrot.lane.b32.xlu1 %v1161_v55, %s3045_s7 }
 0xe5f   :  { %v1263_v56 = vpop.permute.xlu0 %1262 }
 0xe60   :  { %2423 = vmatmul.mubr.msk.f32.vlgmr.msra.gmra.mrb[10].mxu1 %vm194_vm1, %v1263_v56 }
 0xe61   :  { %2621 = vmatpush3.bf16.msra.mxu1 %v3247_v8  ;;  %2441 = vmatprep.mubr.msk.f32.mxu1 %vm3043_vm0, %v3044_v4 }
 0xe62   :  { %2622 = vmatprep.subr.bf16.mxu1 %v3042_v3 }
 0xe63   :  { %v1267_v57 = vpop.permute.xlu1 %1266 }
 0xe64   :  { %v1269_v58 = vsel %vm194_vm1, %v1263_v56, %v1267_v57 }
 0xe65   :  { %2624 = vmatpush3.bf16.msra.mxu1 %v3250_v10  ;;  %2412 = vmatmul.mubr.msk.f32.vlgmr.msra.gmra.mrb[10].mxu0 %vm449_vm2, %v1269_v58 }
 0xe66   :  { %2625 = vmatprep.subr.bf16.mxu1 %v3042_v3  ;;  %2633 = vmatpush3.bf16.msra.mxu0 %v3216_v31 }
 0xe67   :  { %2452 = vmatprep.mubr.msk.f32.mxu0 %vm3043_vm0, %v3044_v4  ;;  %2634 = vmatprep.subr.bf16.mxu0 %v3042_v3 }
 0xe69   :  { %2627 = vmatpush3.bf16.msra.mxu1 %v3254_v13 }
 0xe6a   :  { %2628 = vmatprep.subr.bf16.mxu1 %v3042_v3  ;;  %2636 = vmatpush3.bf16.msra.mxu0 %v3221_v36 }
 0xe6b   :  { %2637 = vmatprep.subr.bf16.mxu0 %v3042_v3 }
 0xe6d   :  { %2630 = vmatpush3.bf16.msra.mxu1 %v3259_v17 }
 0xe6e   :  { %2649 = vmatprep.subr.bf16.mxu1 %v3042_v3 }
 0xf33   :  { %v1437_v60 = vpop.f32.mrb[10].mxu1 }
 0xf34   :  { %v1441_v61 = vadd.f32 %v1437_v60, %v1368_v59  ;;  %v2424_v62 = vpop.f32.mrb[11].mxu1 }
 0xf36   :  { %2763 = vtanh.f32 %v1441_v61  ;;  %v2117_v6 = vmul.f32 -1.442695, %v1441_v61 }
 0xf38   :  { %v1339_v63 = vpop.f32.mrb[10].mxu0 }
 0xf39   :  { %v1340_v0 = vadd.f32 %v3284_v22, %v1339_v63  ;;  %v2413_v1 = vpop.f32.mrb[11].mxu0 }
 0xf3b   :  { %2765 = vtanh.f32 %v1340_v0  ;;  %v2115_v7 = vmul.f32 -1.442695, %v1340_v0 }
 0xf3c   :  { %2767 = vpow2.f32 %v2117_v6 }
 0xf3d   :  { %2769 = vpow2.f32 %v2115_v7 }
 0xf40   :  { %v2764_v2 = vpop.eup %2763 }
 0xf41   :  { %1451 = vrot.lane.b32.xlu1 %v2764_v2, %s3045_s7 }
 0xf45   :  { %v2766_v5 = vpop.eup %2765 }
 0xf46   :  { %1352 = vrot.lane.b32.xlu0 %v2766_v5, %s3045_s7  ;;  %v2768_v9 = vpop.eup %2767 }
 0xf47   :  { %v1445_v11 = vadd.f32 1.0, %v2768_v9  ;;  %v2770_v12 = vpop.eup %2769 }
 0xf48   :  { %v1346_v14 = vadd.f32 1.0, %v2770_v12 }
 0xf49   :  { %2771 = vrcp.f32 %v1445_v11 }
 0xf4a   :  { %2773 = vrcp.f32 %v1346_v14 }
 0xf53   :  { %v2772_v15 = vpop.eup %2771 }
 0xf54   :  { %v2774_v19 = vpop.eup %2773  ;;  %v1449_v23 = vmul.f32 %v2772_v15, %v3399_v46 }
 0xf55   :  { %v1350_v26 = vmul.f32 %v2774_v19, %v3403_v49 }
 0xfb3   :  { %v1452_v16 = vpop.permute.xlu1 %1451 }
 0xfb4   :  { %v1454_v18 = vmul.f32 %v2772_v15, %v1452_v16 }
 0xfb6   :  { %1456 = vrot.lane.b32.xlu1 %v1454_v18, %s3035_s5 }
 0xfb8   :  { %v1353_v20 = vpop.permute.xlu0 %1352 }
 0xfb9   :  { %v1355_v21 = vmul.f32 %v2774_v19, %v1353_v20 }
 0xfbb   :  { %1357 = vrot.lane.b32.xlu0 %v1355_v21, %s3035_s5 }
0x1028   :  { %v1457_v24 = vpop.permute.xlu1 %1456 }
0x1029   :  { %v3435_v25 = vadd.f32 %v1457_v24, %v1449_v23 }
0x102b   :  { %2775 = vtanh.f32 %v3435_v25 }
0x102d   :  { %v1358_v27 = vpop.permute.xlu0 %1357 }
0x102e   :  { %v3439_v28 = vadd.f32 %v1358_v27, %v1350_v26 }
0x1030   :  { %2777 = vtanh.f32 %v3439_v28 }
0x1035   :  { %v2776_v29 = vpop.eup %2775 }
0x1036   :  { %1462 = vrot.lane.b32.xlu1 %v2776_v29, %s3045_s7 }
0x103a   :  { %v2778_v30 = vpop.eup %2777 }
0x103b   :  { %1363 = vrot.lane.b32.xlu0 %v2778_v30, %s3045_s7 }
0x10a8   :  { %v1463_v32 = vpop.permute.xlu1 %1462 }
0x10a9   :  { %v1465_v33 = vmul.f32 %v2772_v15, %v1463_v32 }
0x10ab   :  { %1467 = vrot.lane.b32.xlu0 %v1465_v33, %s3035_s5 }
0x10ad   :  { %v1364_v34 = vpop.permute.xlu0 %1363 }
0x10ae   :  { %v1366_v35 = vmul.f32 %v2774_v19, %v1364_v34 }
0x10b0   :  { %1471 = vrot.lane.b32.xlu1 %v1366_v35, %s3045_s7 }
0x111d   :  { %v1468_v37 = vpop.permute.xlu0 %1467 }
0x111e   :  { %2453 = vmatmul.mubr.msk.f32.vlgmr.msra.gmra.mrb[12].mxu0 %vm194_vm1, %v1468_v37 }
0x111f   :  { %2639 = vmatpush3.bf16.msra.mxu0 %v3247_v8  ;;  %2471 = vmatprep.mubr.msk.f32.mxu0 %vm3043_vm0, %v3044_v4 }
0x1120   :  { %2640 = vmatprep.subr.bf16.mxu0 %v3042_v3 }
0x1122   :  { %v1472_v38 = vpop.permute.xlu1 %1471 }
0x1123   :  { %2642 = vmatpush3.bf16.msra.mxu0 %v3250_v10  ;;  %v1474_v39 = vsel %vm194_vm1, %v1468_v37, %v1472_v38 }
0x1124   :  { %2643 = vmatprep.subr.bf16.mxu0 %v3042_v3  ;;  %2442 = vmatmul.mubr.msk.f32.vlgmr.msra.gmra.mrb[12].mxu1 %vm449_vm2, %v1474_v39 }
0x1125   :  { %2651 = vmatpush3.bf16.msra.mxu1 %v3216_v31  ;;  %2482 = vmatprep.mubr.msk.f32.mxu1 %vm3043_vm0, %v3044_v4 }
0x1126   :  { %2652 = vmatprep.subr.bf16.mxu1 %v3042_v3 }
0x1127   :  { %2645 = vmatpush3.bf16.msra.mxu0 %v3254_v13 }
0x1128   :  { %2646 = vmatprep.subr.bf16.mxu0 %v3042_v3 }
0x1129   :  { %2654 = vmatpush3.bf16.msra.mxu1 %v3221_v36 }
0x112a   :  { %2655 = vmatprep.subr.bf16.mxu1 %v3042_v3 }
0x112b   :  { %2648 = vmatpush3.bf16.msra.mxu0 %v3259_v17 }
0x112c   :  { %2667 = vmatprep.subr.bf16.mxu0 %v3042_v3 }
0x11f1   :  { %v1642_v41 = vpop.f32.mrb[12].mxu0 }
0x11f2   :  { %v1646_v31 = vadd.f32 %v1642_v41, %v1573_v40  ;;  %v2454_v42 = vpop.f32.mrb[13].mxu0 }
0x11f4   :  { %2779 = vtanh.f32 %v1646_v31  ;;  %v2121_v47 = vmul.f32 -1.442695, %v1646_v31 }
0x11f7   :  { %v1544_v43 = vpop.f32.mrb[12].mxu1 }
0x11f8   :  { %v1545_v44 = vadd.f32 %v3284_v22, %v1544_v43  ;;  %v2443_v45 = vpop.f32.mrb[13].mxu1 }
0x11fa   :  { %2781 = vtanh.f32 %v1545_v44  ;;  %v2119_v48 = vmul.f32 -1.442695, %v1545_v44 }
0x11fb   :  { %2783 = vpow2.f32 %v2121_v47 }
0x11fc   :  { %2785 = vpow2.f32 %v2119_v48 }
0x11fe   :  { %v2780_v46 = vpop.eup %2779 }
0x11ff   :  { %1656 = vrot.lane.b32.xlu1 %v2780_v46, %s3045_s7 }
0x1204   :  { %v2782_v36 = vpop.eup %2781 }
0x1205   :  { %1557 = vrot.lane.b32.xlu0 %v2782_v36, %s3045_s7  ;;  %v2784_v49 = vpop.eup %2783 }
0x1206   :  { %v1650_v50 = vadd.f32 1.0, %v2784_v49  ;;  %v2786_v51 = vpop.eup %2785 }
0x1207   :  { %v1551_v52 = vadd.f32 1.0, %v2786_v51 }
0x1208   :  { %2787 = vrcp.f32 %v1650_v50 }
0x1209   :  { %2789 = vrcp.f32 %v1551_v52 }
0x1212   :  { %v2788_v53 = vpop.eup %2787 }
0x1213   :  { %v2790_v56 = vpop.eup %2789  ;;  %v1654_v59 = vmul.f32 %v2788_v53, %v3435_v25 }
0x1214   :  { %v1555_v62 = vmul.f32 %v2790_v56, %v3439_v28 }
0x1271   :  { %v1657_v54 = vpop.permute.xlu1 %1656 }
0x1272   :  { %v1659_v55 = vmul.f32 %v2788_v53, %v1657_v54 }
0x1274   :  { %1661 = vrot.lane.b32.xlu1 %v1659_v55, %s3035_s5 }
0x1277   :  { %v1558_v57 = vpop.permute.xlu0 %1557 }
0x1278   :  { %v1560_v58 = vmul.f32 %v2790_v56, %v1558_v57 }
0x127a   :  { %1562 = vrot.lane.b32.xlu0 %v1560_v58, %s3035_s5 }
0x12e6   :  { %v1662_v60 = vpop.permute.xlu1 %1661 }
0x12e7   :  { %v1664_v61 = vadd.f32 %v1662_v60, %v1654_v59 }
0x12e9   :  { %2791 = vtanh.f32 %v1664_v61 }
0x12ec   :  { %v1563_v63 = vpop.permute.xlu0 %1562 }
0x12ed   :  { %v1565_v0 = vadd.f32 %v1563_v63, %v1555_v62  ;;  %v1984_v62 = vld [vmem:[#allocation14 + $0x10] sm:$0xff] }
0x12ef   :  { %2793 = vtanh.f32 %v1565_v0 }
0x12f3   :  { %v2792_v1 = vpop.eup %2791 }
0x12f4   :  { %1667 = vrot.lane.b32.xlu1 %v2792_v1, %s3045_s7 }
0x12f9   :  { %v2794_v2 = vpop.eup %2793 }
0x12fa   :  { %1568 = vrot.lane.b32.xlu0 %v2794_v2, %s3045_s7 }
0x1366   :  { %v1668_v5 = vpop.permute.xlu1 %1667 }
0x1367   :  { %v1670_v6 = vmul.f32 %v2788_v53, %v1668_v5 }
0x1369   :  { %1672 = vrot.lane.b32.xlu0 %v1670_v6, %s3035_s5 }
0x136c   :  { %v1569_v7 = vpop.permute.xlu0 %1568 }
0x136d   :  { %v1571_v9 = vmul.f32 %v2790_v56, %v1569_v7 }
0x136f   :  { %1676 = vrot.lane.b32.xlu1 %v1571_v9, %s3045_s7  ;;  %v2128_v9 = vld [vmem:[#allocation15] ss:$0 sm:$0xff] }
0x13db   :  { %v1673_v11 = vpop.permute.xlu0 %1672 }
0x13dc   :  { %2483 = vmatmul.mubr.msk.f32.vlgmr.msra.gmra.mrb[14].mxu1 %vm194_vm1, %v1673_v11 }
0x13dd   :  { %2657 = vmatpush3.bf16.msra.mxu1 %v3247_v8  ;;  %2501 = vmatprep.mubr.msk.f32.mxu1 %vm3043_vm0, %v3044_v4  ;;  %v1778_v8 = vld [vmem:[#allocation2 + $0xe] sm:$0x3] }
0x13de   :  { %2658 = vmatprep.subr.bf16.mxu1 %v3042_v3 }
0x13e1   :  { %2660 = vmatpush3.bf16.msra.mxu1 %v3250_v10  ;;  %v1677_v12 = vpop.permute.xlu1 %1676 }
0x13e2   :  { %2661 = vmatprep.subr.bf16.mxu1 %v3042_v3  ;;  %v1679_v14 = vsel %vm194_vm1, %v1673_v11, %v1677_v12 }
0x13e3   :  { %2472 = vmatmul.mubr.msk.f32.vlgmr.msra.gmra.mrb[14].mxu0 %vm449_vm2, %v1679_v14 }
0x13e4   :  { %2512 = vmatprep.mubr.msk.f32.mxu0 %vm3043_vm0, %v3044_v4 }
0x13e5   :  { %2663 = vmatpush3.bf16.msra.mxu1 %v3254_v13 }
0x13e6   :  { %2664 = vmatprep.subr.bf16.mxu1 %v3042_v3 }
0x13e9   :  { %2666 = vmatpush3.bf16.msra.mxu1 %v3259_v17 }
0x14af   :  { %v1847_v15 = vpop.f32.mrb[14].mxu1 }
0x14b0   :  { %v1851_v16 = vadd.f32 %v1847_v15, %v1778_v8  ;;  %v2484_v10 = vpop.f32.mrb[15].mxu1 }
0x14b2   :  { %2795 = vtanh.f32 %v1851_v16  ;;  %v2125_v4 = vmul.f32 -1.442695, %v1851_v16 }
0x14b6   :  { %v1749_v18 = vpop.f32.mrb[14].mxu0 }
0x14b7   :  { %v1750_v19 = vadd.f32 %v3284_v22, %v1749_v18  ;;  %v2473_v20 = vpop.f32.mrb[15].mxu0 }
0x14b9   :  { %2797 = vtanh.f32 %v1750_v19  ;;  %v2123_v23 = vmul.f32 -1.442695, %v1750_v19 }
0x14ba   :  { %2799 = vpow2.f32 %v2125_v4 }
0x14bb   :  { %2801 = vpow2.f32 %v2123_v23 }
0x14bc   :  { %v2796_v21 = vpop.eup %2795 }
0x14bd   :  { %1861 = vrot.lane.b32.xlu1 %v2796_v21, %s3045_s7 }
0x14c3   :  { %v2798_v13 = vpop.eup %2797 }
0x14c4   :  { %1762 = vrot.lane.b32.xlu0 %v2798_v13, %s3045_s7  ;;  %v2800_v17 = vpop.eup %2799 }
0x14c5   :  { %v1855_v24 = vadd.f32 1.0, %v2800_v17  ;;  %v2802_v25 = vpop.eup %2801 }
0x14c6   :  { %v1756_v26 = vadd.f32 1.0, %v2802_v25 }
0x14c7   :  { %2803 = vrcp.f32 %v1855_v24 }
0x14c8   :  { %2805 = vrcp.f32 %v1756_v26 }
0x14d1   :  { %v2804_v27 = vpop.eup %2803 }
0x14d2   :  { %v2806_v30 = vpop.eup %2805  ;;  %v1859_v34 = vmul.f32 %v2804_v27, %v1664_v61  ;;  %v1983_v61 = vld [vmem:[#allocation14 + $0x8] sm:$0xff] }
0x14d3   :  { %v1760_v38 = vmul.f32 %v2806_v30, %v1565_v0  ;;  %v1985_v0 = vld [vmem:[#allocation14 + $0x18] sm:$0xff] }
0x14d4   :  { %v2671_v1 = vpack.c.bf16 %v1985_v0, %v1984_v62 }
0x152f   :  { %v1862_v28 = vpop.permute.xlu1 %1861 }
0x1530   :  { %v1864_v29 = vmul.f32 %v2804_v27, %v1862_v28 }
0x1532   :  { %1866 = vrot.lane.b32.xlu1 %v1864_v29, %s3035_s5 }
0x1536   :  { %v1763_v32 = vpop.permute.xlu0 %1762 }
0x1537   :  { %v1765_v33 = vmul.f32 %v2806_v30, %v1763_v32 }
0x1539   :  { %1767 = vrot.lane.b32.xlu0 %v1765_v33, %s3035_s5 }
0x15a4   :  { %v1867_v35 = vpop.permute.xlu1 %1866 }
0x15a5   :  { %v1869_v37 = vadd.f32 %v1867_v35, %v1859_v34 }
0x15a7   :  { %2807 = vtanh.f32 %v1869_v37 }
0x15ab   :  { %v1768_v39 = vpop.permute.xlu0 %1767 }
0x15ac   :  { %v1770_v40 = vadd.f32 %v1768_v39, %v1760_v38 }
0x15ae   :  { %2809 = vtanh.f32 %v1770_v40 }
0x15b1   :  { %v2808_v41 = vpop.eup %2807 }
0x15b2   :  { %1872 = vrot.lane.b32.xlu1 %v2808_v41, %s3045_s7 }
0x15b8   :  { %v2810_v31 = vpop.eup %2809 }
0x15b9   :  { %1773 = vrot.lane.b32.xlu0 %v2810_v31, %s3045_s7 }
0x1624   :  { %v1873_v42 = vpop.permute.xlu1 %1872 }
0x1625   :  { %v1875_v43 = vmul.f32 %v2804_v27, %v1873_v42 }
0x1627   :  { %1877 = vrot.lane.b32.xlu0 %v1875_v43, %s3035_s5 }
0x162b   :  { %v1774_v44 = vpop.permute.xlu0 %1773 }
0x162c   :  { %v1776_v45 = vmul.f32 %v2806_v30, %v1774_v44 }
0x162e   :  { %1881 = vrot.lane.b32.xlu1 %v1776_v45, %s3045_s7 }
0x1699   :  { %v1878_v46 = vpop.permute.xlu0 %1877 }
0x16a0   :  { %v1882_v36 = vpop.permute.xlu1 %1881 }
0x16a1   :  { %v1884_v47 = vsel %vm194_vm1, %v1878_v46, %v1882_v36 }
0x16a2   :  { %2502 = vmatmul.mubr.msk.f32.vlgmr.msra.gmra.mrb[16].mxu1 %vm449_vm2, %v1884_v47 }
0x1775   :  { %v1954_v48 = vpop.f32.mrb[16].mxu1 }
0x1776   :  { %v1955_v49 = vadd.f32 %v3284_v22, %v1954_v48  ;;  %v2503_v50 = vpop.f32.mrb[17].mxu1  ;;  %v1982_v22 = vld [vmem:[#allocation14] sm:$0xff] }
0x1777   :  { %v2668_v63 = vpack.c.bf16 %v1983_v61, %v1982_v22 }
0x1778   :  { %2811 = vtanh.f32 %v1955_v49  ;;  %v2127_v52 = vmul.f32 -1.442695, %v1955_v49 }
0x1779   :  { %2669 = vmatpush3.bf16.msra.mxu0 %v2668_v63 }
0x177a   :  { %2813 = vpow2.f32 %v2127_v52  ;;  %2670 = vmatprep.subr.bf16.mxu0 %v3042_v3 }
0x177d   :  { %2672 = vmatpush3.bf16.msra.mxu0 %v2671_v1 }
0x1782   :  { %v2812_v51 = vpop.eup %2811 }
0x1783   :  { %1967 = vrot.lane.b32.xlu0 %v2812_v51, %s3045_s7 }
0x1784   :  { %v2814_v53 = vpop.eup %2813 }
0x1785   :  { %v1961_v54 = vadd.f32 1.0, %v2814_v53 }
0x1787   :  { %2815 = vrcp.f32 %v1961_v54 }
0x1791   :  { %v2816_v55 = vpop.eup %2815 }
0x1792   :  { %v1965_v58 = vmul.f32 %v2816_v55, %v1770_v40 }
0x17f5   :  { %v1968_v56 = vpop.permute.xlu0 %1967 }
0x17f6   :  { %v1970_v57 = vmul.f32 %v2816_v55, %v1968_v56 }
0x17f8   :  { %1972 = vrot.lane.b32.xlu1 %v1970_v57, %s3035_s5 }
0x186a   :  { %v1973_v59 = vpop.permute.xlu1 %1972 }
0x186b   :  { %v1975_v60 = vadd.f32 %v1973_v59, %v1965_v58 }
0x186d   :  { %2817 = vtanh.f32 %v1975_v60 }
0x1877   :  { %v2818_v2 = vpop.eup %2817 }
0x1878   :  { %1978 = vrot.lane.b32.xlu0 %v2818_v2, %s3045_s7 }
0x18ea   :  { %v1979_v5 = vpop.permute.xlu0 %1978 }
0x18eb   :  { %v1981_v6 = vmul.f32 %v2816_v55, %v1979_v5 }
0x18ed   :  { %1994 = vrot.lane.b32.xlu1 %v1981_v6, %s3035_s5 }
0x195f   :  { %v1995_v7 = vpop.permute.xlu1 %1994 }
0x1960   :  { %2513 = vmatmul.mubr.msk.f32.vlgmr.msra.gmra.mrb[16].mxu0 %vm194_vm1, %v1995_v7 }
0x1a33   :  { %v2064_v11 = vpop.f32.mrb[16].mxu0 }
0x1a34   :  { %v2065_v12 = vadd.f32 %v2128_v9, %v2064_v11  ;;  %v2514_v14 = vpop.f32.mrb[17].mxu0 }
0x1a36   :  { %2069 = vst.msk [vmem:[#allocation17] sm:$0x3] %vm2068_vm3, %v2065_v12 }
0x1a37   :  { %3006 = shalt.err (!%p3003_p12)
}
0x1a38   :  { %s3007_s14 = scalar_lea.hbm %s3528_s8, 32 }
0x1a39   :  { %p3008_p13 = scmp.ne.s32.totalorder %s3528_s8, %s3007_s14  ;;  %p3011_p0 = scmp.lt.u32.totalorder %s3007_s14, %s3528_s8 }
0x1a3b   :  { %p3013_p1 = pnand %p3011_p0, %p3008_p13 }
0x1a3d   :  { %3016 = shalt.err (!%p3013_p1)
}
0x1a3e   :  { %2079 = dma.vmem_to_hbm [thread:$0]  %s2077_s2, 32, %s3528_s8, [#allocation5]  }
0x1a3f   :  { %3027 = dma.done.wait [#allocation5], 32  }
0x1a40   :  { %3028 = vsyncadd [#allocation5], 4294967264 }
0x1a41   :  { %2083 = vsyncpa [#allocation4], 1 }
0x1a42   :  { %2084 = vsyncpa [#allocation7], 1 }
0x1a43   :  { %2085 = vsyncpa [#allocation10], 1 }
0x1a44   :  { %2086 = vsyncpa [#allocation13], 1 }
0x1a45   :  { %2087 = vsyncpa [#allocation16], 1 }
0x1a46   :  { %2088 = vsyncpa [#allocation5], 1 }

// kernel: sar_head_forward.5
= control target key start
LH: loop header
LB: loop body
LE: loop exit
PB: predicated region body
PF: predicated region fallthrough
CT: control target
= control target key end

     0   :  { %s3240_s0 = inlined_call_operand.hbm [shape: f32[2,32,32], index: 0, kind: input, shape index: {}]   ;;  %s3241_s1 = inlined_call_operand.hbm [shape: f32[2,32,16], index: 1, kind: input, shape index: {}]   ;;  %s3242_s2 = inlined_call_operand.hbm [shape: f32[2,32], index: 2, kind: input, shape index: {}]   ;;  %s3243_s3 = inlined_call_operand.hbm [shape: f32[2,32], index: 3, kind: input, shape index: {}]   ;;  %s3244_s4 = inlined_call_operand.hbm [shape: f32[10,32], index: 4, kind: input, shape index: {}]   ;;  %s3245_s5 = inlined_call_operand.hbm [shape: f32[64,128], index: 5, kind: input, shape index: {}]   ;;  %s3246_s6 = inlined_call_operand.hbm [shape: f32[1,128], index: 6, kind: input, shape index: {}]   ;;  %s3247_s7 = inlined_call_operand.hbm [shape: f32[64,128], index: 7, kind: input, shape index: {}]   ;;  %s3248_s8 = inlined_call_operand.hbm [shape: f32[1,128], index: 8, kind: input, shape index: {}]   ;;  %s3249_s9 = inlined_call_operand.hbm [shape: f32[32,16], index: 9, kind: input, shape index: {}]   ;;  %s3250_s10 = inlined_call_operand.hbm [shape: f32[1,16], index: 10, kind: input, shape index: {}]   ;;  %s3251_s11 = inlined_call_operand.hbm [shape: f32[1,1,16], index: 11, kind: input, shape index: {}]   ;;  %s3252_s12 = inlined_call_operand.<no memory space> [shape: f32[1,1], index: 12, kind: input, shape index: {}]   ;;  %s3253_s13 = inlined_call_operand.hbm [shape: f32[32,128], index: 13, kind: input, shape index: {}]   ;;  %s3254_s14 = inlined_call_operand.hbm [shape: f32[32,128], index: 14, kind: input, shape index: {}]   ;;  %s3255_s15 = inlined_call_operand.hbm [shape: f32[32,128], index: 15, kind: input, shape index: {}]   ;;  %s3256_s16 = inlined_call_operand.hbm [shape: f32[1,128], index: 16, kind: input, shape index: {}]   ;;  %s3257_s17 = inlined_call_operand.hbm [shape: f32[5,2,128], index: 17, kind: output, shape index: {}]  }
   0x1   :  { %3267 = sst [smem:[#allocation58_spill]] %s3240_s0  ;;  %v22_v0 = vstv %s3252_s12 }
   0x2   :  { %3268 = sst [smem:[#allocation59_spill]] %s3241_s1  ;;  %23 = vst [vmem:[#allocation2] sm:$0x1] %v22_v0 }
   0x3   :  { %24 = vsyncpa [#allocation4], 0 }
   0x4   :  { %25 = vsyncpa [#allocation7], 0 }
   0x5   :  { %26 = vsyncpa [#allocation10], 0 }
   0x6   :  { %27 = vsyncpa [#allocation13], 0 }
   0x7   :  { %28 = vsyncpa [#allocation16], 0 }
   0x8   :  { %29 = vsyncpa [#allocation19], 0 }
   0x9   :  { %30 = vsyncpa [#allocation22], 0 }
   0xa   :  { %31 = vsyncpa [#allocation25], 0 }
   0xb   :  { %32 = vsyncpa [#allocation28], 0 }
   0xc   :  { %33 = vsyncpa [#allocation5], 0  ;;  %s2473_s26 = smov [#allocation6]   ;;  %s2474_s28 = smov [#allocation9]  }
   0xd   :  { %s51_s27 = sshll.u32 %s2473_s26, 4  ;;  %s74_s29 = sshll.u32 %s2474_s28, 4  ;;  %s52_s27 = int_to_ptr.vmem [resolvable:$true] %s51_s27  ;;  %s75_s29 = int_to_ptr.vmem [resolvable:$true] %s74_s29 }
   0xe   :  { %s3269_s12 = sld [smem:[#allocation59_spill]] }
  0x14   :  { %s2031_s18 = scalar_lea.hbm %s3269_s12, 1024 }
  0x15   :  { %p2032_p0 = scmp.ne.s32.totalorder %s3269_s12, %s2031_s18  ;;  %p2035_p1 = scmp.lt.u32.totalorder %s2031_s18, %s3269_s12 }
  0x17   :  { %p2037_p2 = pnand %p2035_p1, %p2032_p0 }
  0x19   :  { %2040 = shalt.err (!%p2037_p2)
}
  0x1a   :  { %s2041_s22 = scalar_lea.vmem %s52_s27, 1024  ;;  %p2046_p4 = scmp.lt.s32.totalorder %s52_s27, %s52_s27 }
  0x1b   :  { %p2042_p3 = scmp.ne.s32.totalorder %s52_s27, %s2041_s22  ;;  %p2047_p5 = scmp.lt.s32.totalorder %s2041_s22, %s2041_s22 }
  0x1d   :  { %p2048_p6 = por %p2047_p5, %p2046_p4 }
  0x1f   :  { %p2049_p7 = pnand %p2048_p6, %p2042_p3 }
  0x21   :  { %2052 = shalt.err (!%p2049_p7)
}
  0x22   :  { %s2475_s23 = smov 128   ;;  %s2476_s24 = smov 8  }
  0x23   :  { %57 = dma.hbm_to_vmem [thread:$0]  %s3269_s12, 1024, %s52_s27, [#allocation7], %s2475_s23, %s2475_s23, %s2476_s24  }
  0x24   :  { %s2053_s30 = scalar_lea.hbm %s3243_s3, 32 }
  0x25   :  { %p2054_p8 = scmp.ne.s32.totalorder %s3243_s3, %s2053_s30  ;;  %p2057_p9 = scmp.lt.u32.totalorder %s2053_s30, %s3243_s3 }
  0x27   :  { %p2059_p10 = pnand %p2057_p9, %p2054_p8 }
  0x29   :  { %2062 = shalt.err (!%p2059_p10)
}
  0x2a   :  { %s2063_s21 = scalar_lea.vmem %s75_s29, 32  ;;  %p2068_p12 = scmp.lt.s32.totalorder %s75_s29, %s75_s29 }
  0x2b   :  { %p2064_p11 = scmp.ne.s32.totalorder %s75_s29, %s2063_s21  ;;  %p2069_p13 = scmp.lt.s32.totalorder %s2063_s21, %s2063_s21 }
  0x2d   :  { %p2070_p0 = por %p2069_p13, %p2068_p12 }
  0x2f   :  { %p2071_p1 = pnand %p2070_p0, %p2064_p11 }
  0x31   :  { %2074 = shalt.err (!%p2071_p1)
}
  0x32   :  { %77 = dma.hbm_to_vmem [thread:$0]  %s3243_s3, 32, %s75_s29, [#allocation10]  }
  0x33   :  { %s2477_s22 = smov [#allocation12]   ;;  %s2478_s26 = smov [#allocation15]  }
  0x34   :  { %s95_s25 = sshll.u32 %s2477_s22, 4  ;;  %s117_s28 = sshll.u32 %s2478_s26, 4  ;;  %s96_s25 = int_to_ptr.vmem [resolvable:$true] %s95_s25  ;;  %s2626_s28 = int_to_ptr.vmem [resolvable:$true] %s117_s28 }
  0x35   :  { %s2075_s18 = scalar_lea.hbm %s3245_s5, 1024 }
  0x36   :  { %p2076_p2 = scmp.ne.s32.totalorder %s3245_s5, %s2075_s18  ;;  %p2079_p3 = scmp.lt.u32.totalorder %s2075_s18, %s3245_s5 }
  0x38   :  { %p2081_p4 = pnand %p2079_p3, %p2076_p2 }
  0x3a   :  { %2084 = shalt.err (!%p2081_p4)
}
  0x3b   :  { %s2085_s3 = scalar_lea.vmem %s96_s25, 1024  ;;  %p2090_p6 = scmp.lt.s32.totalorder %s96_s25, %s96_s25 }
  0x3c   :  { %p2086_p5 = scmp.ne.s32.totalorder %s96_s25, %s2085_s3  ;;  %p2091_p7 = scmp.lt.s32.totalorder %s2085_s3, %s2085_s3 }
  0x3e   :  { %p2092_p8 = por %p2091_p7, %p2090_p6 }
  0x40   :  { %p2093_p9 = pnand %p2092_p8, %p2086_p5 }
  0x42   :  { %2096 = shalt.err (!%p2093_p9)
}
  0x43   :  { %101 = dma.hbm_to_vmem [thread:$0]  %s3245_s5, 1024, %s96_s25, [#allocation13], %s2475_s23, %s2475_s23, %s2476_s24  }
  0x44   :  { %s2097_s26 = scalar_lea.hbm %s3247_s7, 1024 }
  0x45   :  { %p2098_p10 = scmp.ne.s32.totalorder %s3247_s7, %s2097_s26  ;;  %p2101_p11 = scmp.lt.u32.totalorder %s2097_s26, %s3247_s7 }
  0x47   :  { %p2103_p12 = pnand %p2101_p11, %p2098_p10 }
  0x49   :  { %2106 = shalt.err (!%p2103_p12)
}
  0x4a   :  { %s2107_s1 = scalar_lea.vmem %s2626_s28, 1024  ;;  %p2112_p0 = scmp.lt.s32.totalorder %s2626_s28, %s2626_s28 }
  0x4b   :  { %p2108_p13 = scmp.ne.s32.totalorder %s2626_s28, %s2107_s1  ;;  %p2113_p1 = scmp.lt.s32.totalorder %s2107_s1, %s2107_s1 }
  0x4d   :  { %p2114_p2 = por %p2113_p1, %p2112_p0 }
  0x4f   :  { %p2115_p3 = pnand %p2114_p2, %p2108_p13 }
  0x51   :  { %2118 = shalt.err (!%p2115_p3)
}
  0x52   :  { %123 = dma.hbm_to_vmem [thread:$0]  %s3247_s7, 1024, %s2626_s28, [#allocation16], %s2475_s23, %s2475_s23, %s2476_s24  }
  0x53   :  { %s2479_s20 = smov [#allocation18]   ;;  %s2480_s3 = smov [#allocation21]  }
  0x54   :  { %s139_s21 = sshll.u32 %s2479_s20, 4  ;;  %s162_s29 = sshll.u32 %s2480_s3, 4  ;;  %s140_s21 = int_to_ptr.vmem [resolvable:$true] %s139_s21  ;;  %s163_s29 = int_to_ptr.vmem [resolvable:$true] %s162_s29 }
  0x55   :  { %s2119_s22 = scalar_lea.hbm %s3249_s9, 512 }
  0x56   :  { %p2120_p4 = scmp.ne.s32.totalorder %s3249_s9, %s2119_s22  ;;  %p2123_p5 = scmp.lt.u32.totalorder %s2119_s22, %s3249_s9 }
  0x58   :  { %p2125_p6 = pnand %p2123_p5, %p2120_p4 }
  0x5a   :  { %2128 = shalt.err (!%p2125_p6)
}
  0x5b   :  { %s2129_s7 = scalar_lea.vmem %s140_s21, 512  ;;  %p2134_p8 = scmp.lt.s32.totalorder %s140_s21, %s140_s21 }
  0x5c   :  { %p2130_p7 = scmp.ne.s32.totalorder %s140_s21, %s2129_s7  ;;  %p2135_p9 = scmp.lt.s32.totalorder %s2129_s7, %s2129_s7 }
  0x5e   :  { %p2136_p10 = por %p2135_p9, %p2134_p8 }
  0x60   :  { %p2137_p11 = pnand %p2136_p10, %p2130_p7 }
  0x62   :  { %2140 = shalt.err (!%p2137_p11)
}
  0x63   :  { %145 = dma.hbm_to_vmem [thread:$0]  %s3249_s9, 512, %s140_s21, [#allocation19], %s2475_s23, %s2475_s23, %s2476_s24  }
  0x64   :  { %s2141_s25 = scalar_lea.hbm %s3251_s11, 16 }
  0x65   :  { %p2142_p12 = scmp.ne.s32.totalorder %s3251_s11, %s2141_s25  ;;  %p2145_p13 = scmp.lt.u32.totalorder %s2141_s25, %s3251_s11 }
  0x67   :  { %p2147_p0 = pnand %p2145_p13, %p2142_p12 }
  0x69   :  { %2150 = shalt.err (!%p2147_p0)
}
  0x6a   :  { %s2151_s22 = scalar_lea.vmem %s163_s29, 16  ;;  %s2155_s26 = scalar_lea.vmem %s163_s29, 32 }
  0x6b   :  { %p2152_p1 = scmp.ne.s32.totalorder %s163_s29, %s2151_s22  ;;  %p2156_p2 = scmp.lt.s32.totalorder %s163_s29, %s163_s29 }
  0x6c   :  { %p2157_p3 = scmp.lt.s32.totalorder %s2155_s26, %s2151_s22 }
  0x6e   :  { %p2158_p4 = por %p2157_p3, %p2156_p2 }
  0x70   :  { %p2159_p5 = pnand %p2158_p4, %p2152_p1 }
  0x72   :  { %2162 = shalt.err (!%p2159_p5)
}
  0x73   :  { %165 = dma.hbm_to_vmem [thread:$0]  %s3251_s11, 16, %s163_s29, [#allocation22]  }
  0x74   :  { %s2481_s0 = smov [#allocation24]   ;;  %s2482_s18 = smov [#allocation3]  }
  0x75   :  { %s185_s30 = sshll.u32 %s2481_s0, 4  ;;  %s39_s7 = sshll.u32 %s2482_s18, 4  ;;  %s186_s30 = int_to_ptr.vmem [resolvable:$true] %s185_s30  ;;  %s2690_s7 = int_to_ptr.vmem [resolvable:$true] %s39_s7 }
  0x76   :  { %s2163_s1 = scalar_lea.hbm %s3254_s14, 512 }
  0x77   :  { %p2164_p6 = scmp.ne.s32.totalorder %s3254_s14, %s2163_s1  ;;  %p2167_p7 = scmp.lt.u32.totalorder %s2163_s1, %s3254_s14 }
  0x79   :  { %p2169_p8 = pnand %p2167_p7, %p2164_p6 }
  0x7b   :  { %2172 = shalt.err (!%p2169_p8)
}
  0x7c   :  { %s2173_s11 = scalar_lea.vmem %s186_s30, 512  ;;  %p2178_p10 = scmp.lt.s32.totalorder %s186_s30, %s186_s30 }
  0x7d   :  { %p2174_p9 = scmp.ne.s32.totalorder %s186_s30, %s2173_s11  ;;  %p2179_p11 = scmp.lt.s32.totalorder %s2173_s11, %s2173_s11 }
  0x7f   :  { %p2180_p12 = por %p2179_p11, %p2178_p10 }
  0x81   :  { %p2181_p13 = pnand %p2180_p12, %p2174_p9 }
  0x83   :  { %2184 = shalt.err (!%p2181_p13)
}
  0x84   :  { %191 = dma.hbm_to_vmem [thread:$0]  %s3254_s14, 512, %s186_s30, [#allocation25], %s2475_s23, %s2475_s23, %s2476_s24  }
  0x85   :  { %s3270_s26 = sld [smem:[#allocation58_spill]] }
  0x8b   :  { %s2185_s9 = scalar_lea.hbm %s3270_s26, 1024 }
  0x8c   :  { %p2186_p0 = scmp.ne.s32.totalorder %s3270_s26, %s2185_s9  ;;  %p2189_p1 = scmp.lt.u32.totalorder %s2185_s9, %s3270_s26 }
  0x8e   :  { %p2191_p2 = pnand %p2189_p1, %p2186_p0 }
  0x90   :  { %2194 = shalt.err (!%p2191_p2)
}
  0x91   :  { %s2195_s19 = scalar_lea.vmem %s2690_s7, 1024  ;;  %p2200_p4 = scmp.lt.s32.totalorder %s2690_s7, %s2690_s7 }
  0x92   :  { %p2196_p3 = scmp.ne.s32.totalorder %s2690_s7, %s2195_s19  ;;  %p2201_p5 = scmp.lt.s32.totalorder %s2195_s19, %s2195_s19 }
  0x94   :  { %p2202_p6 = por %p2201_p5, %p2200_p4 }
  0x96   :  { %p2203_p7 = pnand %p2202_p6, %p2196_p3 }
  0x98   :  { %2206 = shalt.err (!%p2203_p7)
}
  0x99   :  { %45 = dma.hbm_to_vmem [thread:$0]  %s3270_s26, 1024, %s2690_s7, [#allocation4], %s2475_s23, %s2475_s23, %s2476_s24  }
  0x9a   :  { %s2483_s1 = smov [#allocation8]   ;;  %s2484_s25 = smov [#allocation11]  }
  0x9b   :  { %s64_s5 = sshll.u32 %s2483_s1, 4  ;;  %s83_s20 = sshll.u32 %s2484_s25, 4  ;;  %s65_s5 = int_to_ptr.vmem [resolvable:$true] %s64_s5  ;;  %s2727_s20 = int_to_ptr.vmem [resolvable:$true] %s83_s20 }
  0x9c   :  { %s2207_s29 = scalar_lea.hbm %s3242_s2, 32 }
  0x9d   :  { %p2208_p8 = scmp.ne.s32.totalorder %s3242_s2, %s2207_s29  ;;  %p2211_p9 = scmp.lt.u32.totalorder %s2207_s29, %s3242_s2 }
  0x9f   :  { %p2213_p10 = pnand %p2211_p9, %p2208_p8 }
  0xa1   :  { %2216 = shalt.err (!%p2213_p10)
}
  0xa2   :  { %s2217_s7 = scalar_lea.vmem %s65_s5, 32  ;;  %p2222_p12 = scmp.lt.s32.totalorder %s65_s5, %s65_s5 }
  0xa3   :  { %p2218_p11 = scmp.ne.s32.totalorder %s65_s5, %s2217_s7  ;;  %p2223_p13 = scmp.lt.s32.totalorder %s2217_s7, %s2217_s7 }
  0xa5   :  { %p2224_p0 = por %p2223_p13, %p2222_p12 }
  0xa7   :  { %p2225_p1 = pnand %p2224_p0, %p2218_p11 }
  0xa9   :  { %2228 = shalt.err (!%p2225_p1)
}
  0xaa   :  { %67 = dma.hbm_to_vmem [thread:$0]  %s3242_s2, 32, %s65_s5, [#allocation7]  }
  0xab   :  { %s2229_s28 = scalar_lea.hbm %s3244_s4, 256 }
  0xac   :  { %p2230_p2 = scmp.ne.s32.totalorder %s3244_s4, %s2229_s28  ;;  %p2233_p3 = scmp.lt.u32.totalorder %s2229_s28, %s3244_s4 }
  0xae   :  { %p2235_p4 = pnand %p2233_p3, %p2230_p2 }
  0xb0   :  { %2238 = shalt.err (!%p2235_p4)
}
  0xb1   :  { %s2239_s25 = scalar_lea.vmem %s2727_s20, 256  ;;  %p2244_p6 = scmp.lt.s32.totalorder %s2727_s20, %s2727_s20 }
  0xb2   :  { %p2240_p5 = scmp.ne.s32.totalorder %s2727_s20, %s2239_s25  ;;  %p2245_p7 = scmp.lt.s32.totalorder %s2239_s25, %s2239_s25 }
  0xb4   :  { %p2246_p8 = por %p2245_p7, %p2244_p6 }
  0xb6   :  { %p2247_p9 = pnand %p2246_p8, %p2240_p5 }
  0xb8   :  { %2250 = shalt.err (!%p2247_p9)
}
  0xb9   :  { %89 = dma.hbm_to_vmem [thread:$0]  %s3244_s4, 256, %s2727_s20, [#allocation10], %s2475_s23, %s2475_s23, %s2476_s24  }
  0xba   :  { %s2485_s3 = smov [#allocation14]   ;;  %s2486_s29 = smov [#allocation17]  }
  0xbb   :  { %s108_s11 = sshll.u32 %s2485_s3, 4  ;;  %s130_s27 = sshll.u32 %s2486_s29, 4  ;;  %s109_s11 = int_to_ptr.vmem [resolvable:$true] %s108_s11  ;;  %s131_s27 = int_to_ptr.vmem [resolvable:$true] %s130_s27 }
  0xbc   :  { %s2251_s9 = scalar_lea.hbm %s3246_s6, 16 }
  0xbd   :  { %p2252_p10 = scmp.ne.s32.totalorder %s3246_s6, %s2251_s9  ;;  %p2255_p11 = scmp.lt.u32.totalorder %s2251_s9, %s3246_s6 }
  0xbf   :  { %p2257_p12 = pnand %p2255_p11, %p2252_p10 }
  0xc1   :  { %2260 = shalt.err (!%p2257_p12)
}
  0xc2   :  { %s2261_s4 = scalar_lea.vmem %s109_s11, 16  ;;  %s2265_s20 = scalar_lea.vmem %s109_s11, 32 }
  0xc3   :  { %p2262_p13 = scmp.ne.s32.totalorder %s109_s11, %s2261_s4  ;;  %p2266_p0 = scmp.lt.s32.totalorder %s109_s11, %s109_s11 }
  0xc4   :  { %p2267_p1 = scmp.lt.s32.totalorder %s2265_s20, %s2261_s4 }
  0xc6   :  { %p2268_p2 = por %p2267_p1, %p2266_p0 }
  0xc8   :  { %p2269_p3 = pnand %p2268_p2, %p2262_p13 }
  0xca   :  { %2272 = shalt.err (!%p2269_p3)
}
  0xcb   :  { %111 = dma.hbm_to_vmem [thread:$0]  %s3246_s6, 16, %s109_s11, [#allocation13]  }
  0xcc   :  { %s2273_s30 = scalar_lea.hbm %s3248_s8, 16 }
  0xcd   :  { %p2274_p4 = scmp.ne.s32.totalorder %s3248_s8, %s2273_s30  ;;  %p2277_p5 = scmp.lt.u32.totalorder %s2273_s30, %s3248_s8 }
  0xcf   :  { %p2279_p6 = pnand %p2277_p5, %p2274_p4 }
  0xd1   :  { %2282 = shalt.err (!%p2279_p6)
}
  0xd2   :  { %s2283_s3 = scalar_lea.vmem %s131_s27, 16  ;;  %s2287_s29 = scalar_lea.vmem %s131_s27, 32 }
  0xd3   :  { %p2284_p7 = scmp.ne.s32.totalorder %s131_s27, %s2283_s3  ;;  %p2288_p8 = scmp.lt.s32.totalorder %s131_s27, %s131_s27 }
  0xd4   :  { %p2289_p9 = scmp.lt.s32.totalorder %s2287_s29, %s2283_s3 }
  0xd6   :  { %p2290_p10 = por %p2289_p9, %p2288_p8 }
  0xd8   :  { %p2291_p11 = pnand %p2290_p10, %p2284_p7 }
  0xda   :  { %2294 = shalt.err (!%p2291_p11)
}
  0xdb   :  { %133 = dma.hbm_to_vmem [thread:$0]  %s3248_s8, 16, %s131_s27, [#allocation16]  }
  0xdc   :  { %s2487_s12 = smov [#allocation20]   ;;  %s2488_s9 = smov [#allocation23]  }
  0xdd   :  { %s152_s22 = sshll.u32 %s2487_s12, 4  ;;  %s173_s7 = sshll.u32 %s2488_s9, 4  ;;  %s153_s22 = int_to_ptr.vmem [resolvable:$true] %s152_s22  ;;  %s2785_s7 = int_to_ptr.vmem [resolvable:$true] %s173_s7 }
  0xde   :  { %s2295_s0 = scalar_lea.hbm %s3250_s10, 16 }
  0xdf   :  { %p2296_p12 = scmp.ne.s32.totalorder %s3250_s10, %s2295_s0  ;;  %p2299_p13 = scmp.lt.u32.totalorder %s2295_s0, %s3250_s10 }
  0xe1   :  { %p2301_p0 = pnand %p2299_p13, %p2296_p12 }
  0xe3   :  { %2304 = shalt.err (!%p2301_p0)
}
  0xe4   :  { %s2305_s8 = scalar_lea.vmem %s153_s22, 16  ;;  %s2309_s27 = scalar_lea.vmem %s153_s22, 32 }
  0xe5   :  { %p2306_p1 = scmp.ne.s32.totalorder %s153_s22, %s2305_s8  ;;  %p2310_p2 = scmp.lt.s32.totalorder %s153_s22, %s153_s22 }
  0xe6   :  { %p2311_p3 = scmp.lt.s32.totalorder %s2309_s27, %s2305_s8 }
  0xe8   :  { %p2312_p4 = por %p2311_p3, %p2310_p2 }
  0xea   :  { %p2313_p5 = pnand %p2312_p4, %p2306_p1 }
  0xec   :  { %2316 = shalt.err (!%p2313_p5)
}
  0xed   :  { %155 = dma.hbm_to_vmem [thread:$0]  %s3250_s10, 16, %s153_s22, [#allocation19]  }
  0xee   :  { %s2317_s25 = scalar_lea.hbm %s3253_s13, 512 }
  0xef   :  { %p2318_p6 = scmp.ne.s32.totalorder %s3253_s13, %s2317_s25  ;;  %p2321_p7 = scmp.lt.u32.totalorder %s2317_s25, %s3253_s13 }
  0xf1   :  { %p2323_p8 = pnand %p2321_p7, %p2318_p6 }
  0xf3   :  { %2326 = shalt.err (!%p2323_p8)
}
  0xf4   :  { %s2327_s6 = scalar_lea.vmem %s2785_s7, 512  ;;  %p2332_p10 = scmp.lt.s32.totalorder %s2785_s7, %s2785_s7 }
  0xf5   :  { %p2328_p9 = scmp.ne.s32.totalorder %s2785_s7, %s2327_s6  ;;  %p2333_p11 = scmp.lt.s32.totalorder %s2327_s6, %s2327_s6 }
  0xf7   :  { %p2334_p12 = por %p2333_p11, %p2332_p10 }
  0xf9   :  { %p2335_p13 = pnand %p2334_p12, %p2328_p9 }
  0xfb   :  { %2338 = shalt.err (!%p2335_p13)
}
  0xfc   :  { %179 = dma.hbm_to_vmem [thread:$0]  %s3253_s13, 512, %s2785_s7, [#allocation22], %s2475_s23, %s2475_s23, %s2476_s24  }
  0xfd   :  { %s2489_s12 = smov [#allocation26]   ;;  %s2490_s9 = smov [#allocation27]  }
  0xfe   :  { %s197_s22 = sshll.u32 %s2489_s12, 4  ;;  %s210_s26 = sshll.u32 %s2490_s9, 4  ;;  %s198_s22 = int_to_ptr.vmem [resolvable:$true] %s197_s22  ;;  %s211_s26 = int_to_ptr.vmem [resolvable:$true] %s210_s26 }
  0xff   :  { %s2339_s4 = scalar_lea.hbm %s3255_s15, 512 }
 0x100   :  { %p2340_p0 = scmp.ne.s32.totalorder %s3255_s15, %s2339_s4  ;;  %p2343_p1 = scmp.lt.u32.totalorder %s2339_s4, %s3255_s15 }
 0x102   :  { %p2345_p2 = pnand %p2343_p1, %p2340_p0 }
 0x104   :  { %2348 = shalt.err (!%p2345_p2)
}
 0x105   :  { %s2349_s13 = scalar_lea.vmem %s198_s22, 512  ;;  %p2354_p4 = scmp.lt.s32.totalorder %s198_s22, %s198_s22 }
 0x106   :  { %p2350_p3 = scmp.ne.s32.totalorder %s198_s22, %s2349_s13  ;;  %p2355_p5 = scmp.lt.s32.totalorder %s2349_s13, %s2349_s13 }
 0x108   :  { %p2356_p6 = por %p2355_p5, %p2354_p4 }
 0x10a   :  { %p2357_p7 = pnand %p2356_p6, %p2350_p3 }
 0x10c   :  { %2360 = shalt.err (!%p2357_p7)
}
 0x10d   :  { %203 = dma.hbm_to_vmem [thread:$0]  %s3255_s15, 512, %s198_s22, [#allocation25], %s2475_s23, %s2475_s23, %s2476_s24  }
 0x10e   :  { %s2361_s30 = scalar_lea.hbm %s3256_s16, 16 }
 0x10f   :  { %p2362_p8 = scmp.ne.s32.totalorder %s3256_s16, %s2361_s30  ;;  %p2365_p9 = scmp.lt.u32.totalorder %s2361_s30, %s3256_s16 }
 0x111   :  { %p2367_p10 = pnand %p2365_p9, %p2362_p8 }
 0x113   :  { %2370 = shalt.err (!%p2367_p10)
}
 0x114   :  { %s2371_s3 = scalar_lea.vmem %s211_s26, 16  ;;  %s2375_s29 = scalar_lea.vmem %s211_s26, 32 }
 0x115   :  { %p2372_p11 = scmp.ne.s32.totalorder %s211_s26, %s2371_s3  ;;  %p2376_p12 = scmp.lt.s32.totalorder %s211_s26, %s211_s26 }
 0x116   :  { %p2377_p13 = scmp.lt.s32.totalorder %s2375_s29, %s2371_s3 }
 0x118   :  { %p2378_p0 = por %p2377_p13, %p2376_p12 }
 0x11a   :  { %p2379_p1 = pnand %p2378_p0, %p2372_p11 }
 0x11c   :  { %2382 = shalt.err (!%p2379_p1)
}
 0x11d   :  { %213 = dma.hbm_to_vmem [thread:$0]  %s3256_s16, 16, %s211_s26, [#allocation28]  }
 0x11e   :  { %2429 = dma.done.wait [#allocation4], 1024  }
 0x11f   :  { %2430 = vsyncadd [#allocation4], 4294966272 }
 0x120   :  { %2431 = dma.done.wait [#allocation7], 1056  }
 0x121   :  { %2432 = vsyncadd [#allocation7], 4294966240 }
 0x122   :  { %2433 = dma.done.wait [#allocation10], 288  }
 0x123   :  { %2434 = vsyncadd [#allocation10], 4294967008 }
 0x124   :  { %2435 = dma.done.wait [#allocation13], 1040  }
 0x125   :  { %2436 = vsyncadd [#allocation13], 4294966256 }
 0x126   :  { %2437 = dma.done.wait [#allocation16], 1040  }
 0x127   :  { %2438 = vsyncadd [#allocation16], 4294966256 }
 0x128   :  { %2439 = dma.done.wait [#allocation19], 528  }
 0x129   :  { %2440 = vsyncadd [#allocation19], 4294966768 }
 0x12a   :  { %2441 = dma.done.wait [#allocation22], 528  }
 0x12b   :  { %2442 = vsyncadd [#allocation22], 4294966768 }
 0x12c   :  { %2443 = dma.done.wait [#allocation25], 1024  }
 0x12d   :  { %2444 = vsyncadd [#allocation25], 4294966272 }
 0x12e   :  { %2445 = dma.done.wait [#allocation28], 16  }
 0x12f   :  { %2446 = vsyncadd [#allocation28], 4294967280  ;;  %v2491_v1 = vmov 0.0|0.0   ;;  %vm2492_vm0 = vmmov 0   ;;  %v2493_v2 = vmov 0.0   ;;  %v2852_v3 = vld [vmem:[#allocation3] sm:$0xff] }
 0x130   :  { %1800 = vmatprep.subr.bf16.mxu0 %v2491_v1  ;;  %1689 = vmatprep.mubr.msk.f32.mxu0 %vm2492_vm0, %v2493_v2  ;;  %v2854_v4 = vld [vmem:[#allocation3 + $0x8] sm:$0xff]  ;;  %v2856_v5 = vld [vmem:[#allocation3 + $0x10] sm:$0xff]  ;;  %v2858_v6 = vld [vmem:[#allocation3 + $0x18] sm:$0xff]  ;;  %vm314_vm1 = vcmask 261120   ;;  %vm322_vm2 = vcmask 523264   ;;  %s2494_s16 = smov 64  }
 0x131   :  { %1812 = vmatprep.subr.bf16.mxu1 %v2491_v1  ;;  %1708 = vmatprep.mubr.msk.f32.mxu1 %vm2492_vm0, %v2493_v2  ;;  %v2860_v7 = vld [vmem:[#allocation3 + $0x20] sm:$0xff]  ;;  %v2862_v8 = vld [vmem:[#allocation3 + $0x28] sm:$0xff]  ;;  %v2864_v9 = vld [vmem:[#allocation3 + $0x30] sm:$0xff]  ;;  %s2495_s24 = smov 32   ;;  %s2993_s6 = smov 0  }
 0x132   :  { %v2866_v10 = vld [vmem:[#allocation3 + $0x38] sm:$0xff]  ;;  %v2868_v11 = vld [vmem:[#allocation6] sm:$0xff]  ;;  %v2870_v12 = vld [vmem:[#allocation6 + $0x8] sm:$0xff] }
 0x133   :  { %3271 = vst [vmem:[#allocation40_spill] sm:$0xff] %v2868_v11  ;;  %3272 = vst [vmem:[#allocation41_spill] sm:$0xff] %v2870_v12  ;;  %v2872_v13 = vld [vmem:[#allocation6 + $0x10] sm:$0xff]  ;;  %v2874_v14 = vld [vmem:[#allocation6 + $0x18] sm:$0xff] }
 0x134   :  { %3273 = vst [vmem:[#allocation42_spill] sm:$0xff] %v2872_v13  ;;  %3274 = vst [vmem:[#allocation43_spill] sm:$0xff] %v2874_v14  ;;  %v2876_v15 = vld [vmem:[#allocation6 + $0x20] sm:$0xff]  ;;  %v2878_v16 = vld [vmem:[#allocation6 + $0x28] sm:$0xff] }
 0x135   :  { %3275 = vst [vmem:[#allocation44_spill] sm:$0xff] %v2876_v15  ;;  %3276 = vst [vmem:[#allocation45_spill] sm:$0xff] %v2878_v16  ;;  %v2880_v17 = vld [vmem:[#allocation6 + $0x30] sm:$0xff]  ;;  %v2882_v18 = vld [vmem:[#allocation6 + $0x38] sm:$0xff] }
 0x136   :  { %3277 = vst [vmem:[#allocation46_spill] sm:$0xff] %v2880_v17  ;;  %3278 = vst [vmem:[#allocation47_spill] sm:$0xff] %v2882_v18  ;;  %v2884_v19 = vld [vmem:[#allocation11] sm:$0xff]  ;;  %v2886_v20 = vld [vmem:[#allocation11 + $0x8] sm:$0x3] }
 0x137   :  { %v2888_v21 = vld [vmem:[#allocation18] sm:$0xff]  ;;  %v2890_v22 = vld [vmem:[#allocation18 + $0x8] sm:$0xff]  ;;  %v2892_v23 = vld [vmem:[#allocation18 + $0x10] sm:$0xff] }
 0x138   :  { %3279 = vst [vmem:[#allocation48_spill] sm:$0xff] %v2888_v21  ;;  %3280 = vst [vmem:[#allocation49_spill] sm:$0xff] %v2890_v22  ;;  %v2894_v24 = vld [vmem:[#allocation18 + $0x18] sm:$0xff]  ;;  %v2896_v25 = vld [vmem:[#allocation20] ss:$0 sm:$0xff] }
 0x139   :  { %3281 = vst [vmem:[#allocation50_spill] sm:$0xff] %v2892_v23  ;;  %3282 = vst [vmem:[#allocation51_spill] sm:$0xff] %v2894_v24  ;;  %v2898_v26 = vld [vmem:[#allocation21] ss:$0 sm:$0xff]  ;;  %v2900_v27 = vld [vmem:[#allocation2] ss:$0 sm:$0xff] }
 0x13a   :  { %3283 = vst [vmem:[#allocation52_spill] sm:$0xff] %v2896_v25  ;;  %3284 = vst [vmem:[#allocation53_spill] sm:$0xff] %v2898_v26  ;;  %v2902_v28 = vld [vmem:[#allocation23] sm:$0xff]  ;;  %v2904_v29 = vld [vmem:[#allocation23 + $0x8] sm:$0xff] }
 0x13b   :  { %3285 = vst [vmem:[#allocation54_spill] sm:$0xff] %v2900_v27  ;;  %3286 = vst [vmem:[#allocation55_spill] sm:$0xff] %v2902_v28  ;;  %v2906_v30 = vld [vmem:[#allocation23 + $0x10] sm:$0xff]  ;;  %v2908_v31 = vld [vmem:[#allocation23 + $0x18] sm:$0xff] }
 0x13c   :  { %3287 = vst [vmem:[#allocation56_spill] sm:$0xff] %v2904_v29  ;;  %3288 = vst [vmem:[#allocation57_spill] sm:$0xff] %v2906_v30  ;;  %v2910_v32 = vld [vmem:[#allocation24] sm:$0xff]  ;;  %v2912_v33 = vld [vmem:[#allocation24 + $0x8] sm:$0xff] }
 0x13d   :  { %v2914_v34 = vld [vmem:[#allocation24 + $0x10] sm:$0xff]  ;;  %v2916_v35 = vld [vmem:[#allocation24 + $0x18] sm:$0xff]  ;;  %v2918_v36 = vld [vmem:[#allocation9] sm:$0x3]  }
 0x13e   :  { %v281_v37 = vld [vmem:[#allocation12] sm:$0xff]  ;;  %v282_v38 = vld [vmem:[#allocation12 + $0x8] sm:$0xff]  ;;  %v283_v40 = vld [vmem:[#allocation12 + $0x10] sm:$0xff] }
 0x13f   :  { %v2920_v39 = vpack.c.bf16 %v282_v38, %v281_v37  ;;  %v284_v41 = vld [vmem:[#allocation12 + $0x18] sm:$0xff]  ;;  %v285_v43 = vld [vmem:[#allocation12 + $0x20] sm:$0xff]  ;;  %v286_v44 = vld [vmem:[#allocation12 + $0x28] sm:$0xff] }
 0x140   :  { %v2923_v42 = vpack.c.bf16 %v284_v41, %v283_v40  ;;  %v2927_v45 = vpack.c.bf16 %v286_v44, %v285_v43  ;;  %v287_v46 = vld [vmem:[#allocation12 + $0x30] sm:$0xff]  ;;  %v288_v47 = vld [vmem:[#allocation12 + $0x38] sm:$0xff]  ;;  %v2934_v49 = vld [vmem:[#allocation8] sm:$0x3] }
 0x141   :  { %1802 = vmatpush3.bf16.msra.mxu0 %v2920_v39  ;;  %v2931_v48 = vpack.c.bf16 %v288_v47, %v287_v46  ;;  %v315_v50 = vsel %vm314_vm1, %v2934_v49, 0.0  ;;  %v2943_v51 = vld [vmem:[#allocation14] ss:$0 sm:$0xff]  ;;  %v291_v37 = vld [vmem:[#allocation15 + $0x8] sm:$0xff]  ;;  %v292_v38 = vld [vmem:[#allocation15 + $0x10] sm:$0xff] }
 0x142   :  { %1803 = vmatprep.subr.bf16.mxu0 %v2491_v1  ;;  %v293_v41 = vld [vmem:[#allocation15 + $0x18] sm:$0xff]  ;;  %v294_v44 = vld [vmem:[#allocation15 + $0x20] sm:$0xff]  ;;  %v295_v46 = vld [vmem:[#allocation15 + $0x28] sm:$0xff] }
 0x143   :  { %v2954_v43 = vpack.c.bf16 %v293_v41, %v292_v38  ;;  %v2958_v47 = vpack.c.bf16 %v295_v46, %v294_v44  ;;  %v530_v38 = vld [vmem:[#allocation26 + $0x10] sm:$0xff]  ;;  %v531_v44 = vld [vmem:[#allocation26 + $0x18] sm:$0xff] }
 0x145   :  { %1805 = vmatpush3.bf16.msra.mxu0 %v2923_v42 }
 0x146   :  { %1806 = vmatprep.subr.bf16.mxu0 %v2491_v1 }
 0x149   :  { %1808 = vmatpush3.bf16.msra.mxu0 %v2927_v45 }
 0x14a   :  { %1809 = vmatprep.subr.bf16.mxu0 %v2491_v1 }
 0x14d   :  { %1811 = vmatpush3.bf16.msra.mxu0 %v2931_v48 }
 0x14e   :  { %1824 = vmatprep.subr.bf16.mxu0 %v2491_v1 }
 0x150   :  { %1690 = vmatmul.mubr.msk.f32.vlgmr.msra.gmra.mrb[0].mxu0 %vm322_vm2, %v315_v50  ;;  %v296_v50 = vld [vmem:[#allocation15 + $0x30] sm:$0xff] }
 0x151   :  { %1719 = vmatprep.mubr.msk.f32.mxu0 %vm2492_vm0, %v2493_v2  ;;  %v290_v2 = vld [vmem:[#allocation15] sm:$0xff] }
 0x152   :  { %v2951_v40 = vpack.c.bf16 %v291_v37, %v290_v2  ;;  %v528_v2 = vld [vmem:[#allocation26] sm:$0xff]  ;;  %v529_v37 = vld [vmem:[#allocation26 + $0x8] sm:$0xff] }
 0x153   :  { %v1825_v41 = vpack.c.bf16 %v529_v37, %v528_v2 }
 0x154   :  { %1814 = vmatpush3.bf16.msra.mxu1 %v2951_v40 }
 0x155   :  { %1815 = vmatprep.subr.bf16.mxu1 %v2491_v1  ;;  %1826 = vmatpush3.bf16.msra.mxu0 %v1825_v41 }
 0x156   :  { %1827 = vmatprep.subr.bf16.mxu0 %v2491_v1 }
 0x158   :  { %1817 = vmatpush3.bf16.msra.mxu1 %v2954_v43 }
 0x159   :  { %1818 = vmatprep.subr.bf16.mxu1 %v2491_v1 }
 0x15c   :  { %1820 = vmatpush3.bf16.msra.mxu1 %v2958_v47 }
 0x15d   :  { %1821 = vmatprep.subr.bf16.mxu1 %v2491_v1 }
 0x223   :  { %v392_v52 = vpop.f32.mrb[0].mxu0 }
 0x224   :  { %v393_v53 = vadd.f32 %v2943_v51, %v392_v52  ;;  %v1691_v54 = vpop.f32.mrb[1].mxu0  ;;  %v297_v52 = vld [vmem:[#allocation15 + $0x38] sm:$0xff] }
 0x225   :  { %v2963_v54 = vpack.c.bf16 %v297_v52, %v296_v50 }
 0x226   :  { %1957 = vtanh.f32 %v393_v53  ;;  %v1594_v56 = vmul.f32 -1.442695, %v393_v53 }
 0x227   :  { %1823 = vmatpush3.bf16.msra.mxu1 %v2963_v54 }
 0x228   :  { %1959 = vpow2.f32 %v1594_v56 }
 0x230   :  { %v1958_v55 = vpop.eup %1957 }
 0x231   :  { %405 = vrot.lane.b32.xlu0 %v1958_v55, %s2494_s16 }
 0x232   :  { %v1960_v57 = vpop.eup %1959 }
 0x233   :  { %v399_v58 = vadd.f32 1.0, %v1960_v57 }
 0x235   :  { %1961 = vrcp.f32 %v399_v58 }
 0x23f   :  { %v1962_v59 = vpop.eup %1961 }
 0x240   :  { %v403_v62 = vmul.f32 0.0, %v1962_v59 }
 0x2a3   :  { %v406_v60 = vpop.permute.xlu0 %405 }
 0x2a4   :  { %v408_v61 = vmul.f32 %v1962_v59, %v406_v60  ;;  %v2970_v60 = vld [vmem:[#allocation17] ss:$0 sm:$0xff] }
 0x2a6   :  { %410 = vrot.lane.b32.xlu0 %v408_v61, %s2495_s24 }
 0x318   :  { %v411_v63 = vpop.permute.xlu0 %410 }
 0x319   :  { %v2948_v0 = vadd.f32 %v411_v63, %v403_v62  }
 0x31b   :  { %1963 = vtanh.f32 %v2948_v0 }
 0x325   :  { %v1964_v53 = vpop.eup %1963 }
 0x326   :  { %416 = vrot.lane.b32.xlu1 %v1964_v53, %s2494_s16 }
 0x398   :  { %v417_v55 = vpop.permute.xlu1 %416 }
 0x399   :  { %v419_v56 = vmul.f32 %v1962_v59, %v417_v55   ;;  %v1828_v59 = vpack.c.bf16 %v531_v44, %v530_v38 }
 0x39b   :  { %421 = vrot.lane.b32.xlu1 %v419_v56, %s2495_s24  ;;  %1829 = vmatpush3.bf16.msra.mxu0 %v1828_v59 }
 0x39e   :  { %1720 = vmatmul.mubr.msk.f32.vlgmr.msra.gmra.mrb[2].mxu0 %vm314_vm1, %v2934_v49 }
 0x40d   :  { %v422_v57 = vpop.permute.xlu1 %421 }
 0x40e   :  { %v424_v58 = vsel %vm314_vm1, %v422_v57, 0.0 }
 0x40f   :  { %1709 = vmatmul.mubr.msk.f32.vlgmr.msra.gmra.mrb[0].mxu1 %vm322_vm2, %v424_v58 }
 0x4e2   :  { %v500_v61 = vpop.f32.mrb[0].mxu1 }
 0x4e3   :  { %v501_v62 = vadd.f32 %v2970_v60, %v500_v61  ;;  %v1710_v63 = vpop.f32.mrb[1].mxu1  ;;  %v1598_v61 = vld [vmem:[#allocation27] ss:$0 sm:$0xff] }
 0x4e4   :  { %v608_v63 = vpop.f32.mrb[2].mxu0 }
 0x4e5   :  { %1965 = vtanh.f32 %v501_v62  ;;  %v1597_v50 = vmul.f32 -1.442695, %v501_v62  ;;  %v2978_v1 = vadd.f32 %v1598_v61, %v608_v63  ;;  %v1721_v2 = vpop.f32.mrb[3].mxu0 }
 0x4e7   :  { %1967 = vpow2.f32 %v1597_v50 }
 0x4ef   :  { %v1966_v46 = vpop.eup %1965 }
 0x4f0   :  { %513 = vrot.lane.b32.xlu0 %v1966_v46, %s2494_s16 }
 0x4f1   :  { %v1968_v52 = vpop.eup %1967 }
 0x4f2   :  { %v507_v53 = vadd.f32 1.0, %v1968_v52 }
 0x4f4   :  { %1969 = vrcp.f32 %v507_v53 }
 0x4fe   :  { %v1970_v55 = vpop.eup %1969 }
 0x4ff   :  { %v511_v37 = vmul.f32 0.0, %v1970_v55 }
 0x562   :  { %v514_v57 = vpop.permute.xlu0 %513 }
 0x563   :  { %v516_v58 = vmul.f32 %v1970_v55, %v514_v57 }
 0x565   :  { %518 = vrot.lane.b32.xlu1 %v516_v58, %s2495_s24 }
 0x5d7   :  { %v519_v38 = vpop.permute.xlu1 %518 }
 0x5d8   :  { %v521_v49 = vadd.f32 %v519_v38, %v511_v37  }
 0x5da   :  { %1971 = vtanh.f32 %v521_v49 }
 0x5e4   :  { %v1972_v41 = vpop.eup %1971 }
 0x5e5   :  { %524 = vrot.lane.b32.xlu0 %v1972_v41, %s2494_s16 }
 0x657   :  { %v525_v62 = vpop.permute.xlu0 %524 }
 0x658   :  { %v527_v44 = vmul.f32 %v1970_v55, %v525_v62  }
 0x659 LB: > { %v3289_v26 = vld [vmem:[#allocation53_spill] sm:$0xff]  ;;  %v3262_v59 = vmov 0.0|0.0   ;;  %s2497_s10 = smov 64   ;;  %vm2498_vm3 = vmmov 0   ;;  %v3260_v46 = vmov 0.0   ;;  %s2500_s11 = smov 32   ;;  %v2451_v36 = vphi %v2918_v36, %v1541_v36   ;;  %s2471_s6 = sphi %s2993_s6, %s618_s6   ;;  %v2467_v56 = vphi %v419_v56, %v3040_v56   ;;  %v2463_v0 = vphi %v2948_v0, %v3035_v0   ;;  %v2459_v44 = vphi %v527_v44, %v3062_v44   ;;  %v2455_v49 = vphi %v521_v49, %v3052_v49  }
 0x65a   : > { %1830 = vmatprep.subr.bf16.mxu0 %v3262_v59  ;;  %1842 = vmatprep.subr.bf16.mxu1 %v3262_v59  ;;  %v3290_v21 = vld [vmem:[#allocation48_spill] sm:$0xff]  ;;  %v3291_v22 = vld [vmem:[#allocation49_spill] sm:$0xff]  ;;  %v3292_v23 = vld [vmem:[#allocation50_spill] sm:$0xff]  ;;  %vm976_vm4 = vcmask 130048   ;;  %vm1037_vm5 = vcmask 130112   ;;  %vm1044_vm6 = vcmask 195712  }
 0x65b   : > { %625 = vrot.lane.b32.xlu0 %v2467_v56, %s2497_s10  ;;  %1832 = vmatpush3.bf16.msra.mxu0 %v2920_v39  ;;  %v3293_v24 = vld [vmem:[#allocation51_spill] sm:$0xff]  ;;  %v3295_v29 = vld [vmem:[#allocation56_spill] sm:$0xff]  ;;  %v3296_v30 = vld [vmem:[#allocation57_spill] sm:$0xff]  ;;  %vm1051_vm7 = vcmask 261312   ;;  %vm1072_vm8 = vcmask 1041409   ;;  %vm1075_vm9 = vcmask 254976  }
 0x65c   : > { %1833 = vmatprep.subr.bf16.mxu0 %v3262_v59  ;;  %1738 = vmatprep.mubr.msk.f32.mxu0 %vm2498_vm3, %v3260_v46  ;;  %v3294_v28 = vld [vmem:[#allocation55_spill] sm:$0xff]  ;;  %v3297_v25 = vld [vmem:[#allocation52_spill] sm:$0xff]  ;;  %v3298_v12 = vld [vmem:[#allocation41_spill] sm:$0xff]  ;;  %vm1430_vm10 = vcmask 1041408   ;;  %s1610_s12 = sshll.u32 %s2471_s6, 1  ;;  %vm2503_vm13 = vmmov 1  }
 0x65d   : > { %1844 = vmatpush3.bf16.msra.mxu1 %v2951_v40  ;;  %1757 = vmatprep.mubr.msk.f32.mxu1 %vm2498_vm3, %v3260_v46  ;;  %v3299_v11 = vld [vmem:[#allocation40_spill] sm:$0xff]  ;;  %v3300_v13 = vld [vmem:[#allocation42_spill] sm:$0xff]  ;;  %v3302_v14 = vld [vmem:[#allocation43_spill] sm:$0xff]  ;;  %s1443_s22 = scalar_lea.vmem [#allocation29], %s1610_s12  ;;  %vm1468_vm15 = vcmask 80896   ;;  %s618_s6 = sadd.s32 1, %s2471_s6  }
 0x65e   : > { %1845 = vmatprep.subr.bf16.mxu1 %v3262_v59  ;;  %v3301_v15 = vld [vmem:[#allocation44_spill] sm:$0xff]  ;;  %v3303_v16 = vld [vmem:[#allocation45_spill] sm:$0xff]  ;;  %v3304_v17 = vld [vmem:[#allocation46_spill] sm:$0xff]  ;;  %p615_p2 = scmp.ge.s32.totalorder %s618_s6, 5  }
 0x65f   : > { %1835 = vmatpush3.bf16.msra.mxu0 %v2923_v42  ;;  %v3305_v18 = vld [vmem:[#allocation47_spill] sm:$0xff]  ;;  %v3306_v27 = vld [vmem:[#allocation54_spill] sm:$0xff]  ;;  %vm1874_vm14 = vmpackc.low %vm1430_vm10, %vm2503_vm13  ;;  %s2504_s9 = smov (%p615_p2), [#allocation29]  }
 0x660   : > { %1836 = vmatprep.subr.bf16.mxu0 %v3262_v59  ;;  %s1550_s26 = sshll.u32 (%p615_p2), %s2504_s9, 4  ;;  %s1551_s26 = int_to_ptr.vmem [resolvable:$true] %s1550_s26 }
 0x661   : > { %1847 = vmatpush3.bf16.msra.mxu1 %v2954_v43  ;;  %s2383_s21 = scalar_lea.vmem (%p615_p2), %s1551_s26, 160  ;;  %p2388_p4 = scmp.lt.s32.totalorder (%p615_p2), %s1551_s26, %s1551_s26 }
 0x662   : > { %1848 = vmatprep.subr.bf16.mxu1 %v3262_v59  ;;  %p2384_p3 = scmp.ne.s32.totalorder (%p615_p2), %s1551_s26, %s2383_s21  ;;  %p2389_p5 = scmp.lt.s32.totalorder (%p615_p2), %s2383_s21, %s2383_s21 }
 0x663   : > { %1838 = vmatpush3.bf16.msra.mxu0 %v2927_v45 }
 0x664   : > { %1839 = vmatprep.subr.bf16.mxu0 %v3262_v59  ;;  %p2390_p6 = por (%p615_p2), %p2389_p5, %p2388_p4 }
 0x665   : > { %1850 = vmatpush3.bf16.msra.mxu1 %v2958_v47 }
 0x666   : > { %1851 = vmatprep.subr.bf16.mxu1 %v3262_v59  ;;  %p2391_p7 = pnand (%p615_p2), %p2390_p6, %p2384_p3 }
 0x667   : > { %1841 = vmatpush3.bf16.msra.mxu0 %v2931_v48 }
 0x668   : > { %1854 = vmatprep.subr.bf16.mxu0 %v3262_v59 }
 0x669   : > { %1853 = vmatpush3.bf16.msra.mxu1 %v2963_v54 }
 0x66a   : > { %1860 = vmatprep.subr.bf16.mxu1 %v3262_v59 }
 0x6cd   : > { %v626_v56 = vpop.permute.xlu0 %625 }
 0x6ce   : > { %v628_v50 = vsel %vm314_vm1, %v2451_v36, %v626_v56 }
 0x6cf   : > { %1739 = vmatmul.mubr.msk.f32.vlgmr.msra.gmra.mrb[0].mxu0 %vm322_vm2, %v628_v50 }
 0x6d0   : > { %1768 = vmatprep.mubr.msk.f32.mxu0 %vm2498_vm3, %v3260_v46 }
 0x7a2   : > { %v698_v52 = vpop.f32.mrb[0].mxu0 }
 0x7a3   : > { %v699_v53 = vadd.f32 %v2943_v51, %v698_v52  ;;  %v1740_v55 = vpop.f32.mrb[1].mxu0 }
 0x7a5   : > { %1975 = vtanh.f32 %v699_v53  ;;  %v1601_v58 = vmul.f32 -1.442695, %v699_v53 }
 0x7a7   : > { %1977 = vpow2.f32 %v1601_v58 }
 0x7af   : > { %v1976_v57 = vpop.eup %1975 }
 0x7b0   : > { %711 = vrot.lane.b32.xlu0 %v1976_v57, %s2497_s10 }
 0x7b1   : > { %v1978_v61 = vpop.eup %1977 }
 0x7b2   : > { %v705_v63 = vadd.f32 1.0, %v1978_v61 }
 0x7b4   : > { %1979 = vrcp.f32 %v705_v63 }
 0x7be   : > { %v1980_v2 = vpop.eup %1979 }
 0x7bf   : > { %v709_v38 = vmul.f32 %v2463_v0, %v1980_v2 }
 0x822   : > { %v712_v36 = vpop.permute.xlu0 %711 }
 0x823   : > { %v714_v37 = vmul.f32 %v1980_v2, %v712_v36 }
 0x825   : > { %716 = vrot.lane.b32.xlu1 %v714_v37, %s2500_s11 }
 0x897   : > { %v717_v41 = vpop.permute.xlu1 %716 }
 0x898   : > { %v3035_v0 = vadd.f32 %v717_v41, %v709_v38  }
 0x89a   : > { %1981 = vtanh.f32 %v3035_v0 }
 0x8a4   : > { %v1982_v62 = vpop.eup %1981 }
 0x8a5   : > { %722 = vrot.lane.b32.xlu1 %v1982_v62, %s2497_s10 }
 0x8a9   : > { %731 = vrot.lane.b32.xlu1 %v2459_v44, %s2497_s10 }
 0x917   : > { %v723_v56 = vpop.permute.xlu1 %722 }
 0x918   : > { %v3040_v56 = vmul.f32 %v1980_v2, %v723_v56  }
 0x91a   : > { %727 = vrot.lane.b32.xlu0 %v3040_v56, %s2500_s11 }
 0x91b   : > { %v732_v50 = vpop.permute.xlu1 %731 }
 0x98c   : > { %v728_v52 = vpop.permute.xlu0 %727 }
 0x98d   : > { %v734_v53 = vsel %vm314_vm1, %v728_v52, %v732_v50  ;;  %v1855_v50 = vpack.c.bf16 %v3291_v22, %v3290_v21  ;;  %v1858_v52 = vpack.c.bf16 %v3293_v24, %v3292_v23 }
 0x98e   : > { %1758 = vmatmul.mubr.msk.f32.vlgmr.msra.gmra.mrb[0].mxu1 %vm322_vm2, %v734_v53 }
 0x98f   : > { %1779 = vmatprep.mubr.msk.f32.mxu1 %vm2498_vm3, %v3260_v46  ;;  %1856 = vmatpush3.bf16.msra.mxu0 %v1855_v50 }
 0x990   : > { %1857 = vmatprep.subr.bf16.mxu0 %v3262_v59 }
 0x993   : > { %1859 = vmatpush3.bf16.msra.mxu0 %v1858_v52 }
 0x994   : > { %1866 = vmatprep.subr.bf16.mxu0 %v3262_v59 }
 0xa61   : > { %v804_v55 = vpop.f32.mrb[0].mxu1 }
 0xa62   : > { %v805_v57 = vadd.f32 %v2970_v60, %v804_v55  ;;  %v1759_v58 = vpop.f32.mrb[1].mxu1 }
 0xa64   : > { %1983 = vtanh.f32 %v805_v57  ;;  %v1603_v61 = vmul.f32 -1.442695, %v805_v57  ;;  %v1867_v57 = vpack.c.bf16 %v3295_v29, %v3294_v28 }
 0xa66   : > { %1985 = vpow2.f32 %v1603_v61  ;;  %v1870_v61 = vpack.c.bf16 %v2908_v31, %v3296_v30 }
 0xa6e   : > { %v1984_v44 = vpop.eup %1983 }
 0xa6f   : > { %817 = vrot.lane.b32.xlu0 %v1984_v44, %s2497_s10 }
 0xa70   : > { %v1986_v63 = vpop.eup %1985 }
 0xa71   : > { %v811_v2 = vadd.f32 1.0, %v1986_v63  ;;  %v2501_v63 = vmov 0  }
 0xa72   : > { %1973 = vset.pattern.permute.xlu1 %v2501_v63  ;;  %1974 = vset.pattern.permute.xlu0 %v2501_v63 }
 0xa73   : > { %1987 = vrcp.f32 %v811_v2  ;;  %v2502_v2 = vmov 1966171168  }
 0xa7d   : > { %v1988_v36 = vpop.eup %1987 }
 0xa7e   : > { %v815_v41 = vmul.f32 %v2455_v49, %v1988_v36 }
 0xae1   : > { %v818_v37 = vpop.permute.xlu0 %817 }
 0xae2   : > { %v820_v38 = vmul.f32 %v1988_v36, %v818_v37  ;;  %v3264_v37 = vlaneseq }
 0xae4   : > { %822 = vrot.lane.b32.xlu1 %v820_v38, %s2500_s11 }
 0xb56   : > { %v823_v62 = vpop.permute.xlu1 %822 }
 0xb57   : > { %v3052_v49 = vadd.f32 %v823_v62, %v815_v41   ;;  %v3076_v41 = vshrl.u32 %v3264_v37, 7 }
 0xb59   : > { %1989 = vtanh.f32 %v3052_v49 }
 0xb63   : > { %v1990_v53 = vpop.eup %1989 }
 0xb64   : > { %828 = vrot.lane.b32.xlu0 %v1990_v53, %s2497_s10 }
 0xbd6   : > { %v829_v55 = vpop.permute.xlu0 %828 }
 0xbd7   : > { %v3062_v44 = vmul.f32 %v1988_v36, %v829_v55   ;;  %v915_v36 = vunpack.c.l.s4 %v2502_v2 }
 0xbd9   : > { %839 = vrot.lane.b32.xlu1 %v3062_v44, %s2500_s11  ;;  %v916_v38 = vunpack.c.0.s8 %v915_v36 }
 0xbdb   : > { %v919_v62 = vsub.s32 %v916_v38, %v3076_v41 }
 0xc4b   : > { %v840_v58 = vpop.permute.xlu1 %839 }
 0xc4c   : > { %1769 = vmatmul.mubr.msk.f32.vlgmr.msra.gmra.mrb[2].mxu0 %vm314_vm1, %v840_v58 }
 0xc4d   : > { %1868 = vmatpush3.bf16.msra.mxu0 %v1867_v57  ;;  %1790 = vmatprep.mubr.msk.f32.mxu0 %vm2498_vm3, %v3260_v46  ;;  %v3081_v57 = vsub.s32 0, %v3076_v41 }
 0xc4e   : > { %1869 = vmatprep.subr.bf16.mxu0 %v3262_v59 }
 0xc51   : > { %1871 = vmatpush3.bf16.msra.mxu0 %v1870_v61 }
 0xc54   : > { %1791 = vmatmul.mubr.msk.f32.vlgmr.msra.gmra.mrb[4].mxu0 %vm314_vm1, %v840_v58 }
 0xd1f   : > { %v909_v50 = vpop.f32.mrb[2].mxu0 }
 0xd20   : > { %v910_v52 = vadd.f32 %v3297_v25, %v909_v50  ;;  %v1770_v53 = vpop.f32.mrb[3].mxu0 }
 0xd22   : > { %v920_v55 = vrot.slane %v910_v52, %v919_v62 }
 0xd24   : > { %v921_v58 = vcombine.high %v920_v55, %v920_v55  ;;  %v928_v61 = vrot.slane %v920_v55, %v919_v62 }
 0xd26   : > { %v935_v63 = vrot.slane %v921_v58, %v919_v62  ;;  %v939_v2 = vrot.slane %v928_v61, %v3081_v57 }
 0xd27   : > { %v3084_v46 = vpop.f32.mrb[4].mxu0 }
 0xd28   : > { %v943_v36 = vrot.slane %v935_v63, %v3081_v57  ;;  %v1792_v59 = vpop.f32.mrb[5].mxu0  ;;  %v947_v38 = vadd.f32 %v939_v2, %v3298_v12  ;;  %v946_v37 = vadd.f32 %v939_v2, %v3299_v11  ;;  %v948_v50 = vadd.f32 %v939_v2, %v3300_v13 }
 0xd29   : > { %v949_v53 = vadd.f32 %v939_v2, %v3302_v14 }
 0xd2a   : > { %1991 = vtanh.f32 %v947_v38  ;;  %v950_v52 = vadd.f32 %v943_v36, %v3301_v15  ;;  %v951_v62 = vadd.f32 %v943_v36, %v3303_v16  ;;  %v952_v59 = vadd.f32 %v943_v36, %v3304_v17 }
 0xd2b   : > { %1993 = vtanh.f32 %v946_v37  ;;  %v953_v55 = vadd.f32 %v943_v36, %v3305_v18 }
 0xd2c   : > { %1995 = vtanh.f32 %v948_v50 }
 0xd2d   : > { %1997 = vtanh.f32 %v950_v52 }
 0xd2e   : > { %1999 = vtanh.f32 %v949_v53 }
 0xd2f   : > { %2001 = vtanh.f32 %v951_v62 }
 0xd30   : > { %2003 = vtanh.f32 %v952_v59 }
 0xd31   : > { %2005 = vtanh.f32 %v953_v55 }
 0xd34   : > { %v1992_v58 = vpop.eup %1991 }
 0xd35   : > { %v1994_v61 = vpop.eup %1993  ;;  %v969_v63 = vmul.f32 %v1992_v58, %v3289_v26 }
 0xd36   : > { %v1996_v38 = vpop.eup %1995  ;;  %v968_v2 = vmul.f32 %v1994_v61, %v3289_v26 }
 0xd37   : > { %v1998_v37 = vpop.eup %1997  ;;  %v980_v11 = vsel %vm976_vm4, %v969_v63, 0.0  ;;  %v970_v50 = vmul.f32 %v1996_v38, %v3289_v26 }
 0xd38   : > { %v2000_v52 = vpop.eup %1999  ;;  %981 = vadd.xlane.f32.xlu1 %v980_v11  ;;  %v977_v53 = vsel %vm976_vm4, %v968_v2, 0.0  ;;  %v972_v36 = vmul.f32 %v1998_v37, %v3289_v26 }
 0xd39   : > { %v2002_v62 = vpop.eup %2001  ;;  %978 = vadd.xlane.f32.xlu0 %v977_v53  ;;  %v983_v59 = vsel %vm976_vm4, %v970_v50, 0.0  ;;  %v971_v58 = vmul.f32 %v2000_v52, %v3289_v26 }
 0xd3a   : > { %v989_v61 = vsel %vm976_vm4, %v972_v36, 0.0  ;;  %v973_v63 = vmul.f32 %v2002_v62, %v3289_v26  ;;  %v2004_v12 = vpop.eup %2003  ;;  %v3307_v62 = vlaneseq }
 0xd3b   : > { %v986_v55 = vsel %vm976_vm4, %v971_v58, 0.0  ;;  %v974_v38 = vmul.f32 %v2004_v12, %v3289_v26  ;;  %v2006_v2 = vpop.eup %2005 }
 0xd3c   : > { %984 = vadd.xlane.f32.xlu1 %v983_v59  ;;  %v992_v11 = vsel %vm976_vm4, %v973_v63, 0.0  ;;  %v975_v50 = vmul.f32 %v2006_v2, %v3289_v26  ;;  %v3113_v59 = vand.u32 127, %v3307_v62 }
 0xd3d   : > { %990 = vadd.xlane.f32.xlu0 %v989_v61  ;;  %v995_v37 = vsel %vm976_vm4, %v974_v38, 0.0 }
 0xd3e   : > { %v998_v52 = vsel %vm976_vm4, %v975_v50, 0.0  ;;  %v1039_v12 = vadd.s32 4294967280, %v3113_v59  ;;  %v1032_v63 = vadd.s32 4294967288, %v3113_v59  ;;  %v1046_v2 = vadd.s32 4294967272, %v3113_v59 }
 0xd40   : > { %987 = vadd.xlane.f32.xlu1 %v986_v55  ;;  %v3118_v38 = vsub.s32 %v1039_v12, %v3076_v41  ;;  %v3126_v50 = vsub.s32 %v1032_v63, %v3076_v41  ;;  %v3129_v12 = vsub.s32 %v1046_v2, %v3076_v41 }
 0xd41   : > { %993 = vadd.xlane.f32.xlu0 %v992_v11 }
 0xd45   : > { %996 = vadd.xlane.f32.xlu0 %v995_v37  ;;  %v3123_v37 = vsub.s32 %v3113_v59, %v3076_v41 }
 0xd49   : > { %999 = vadd.xlane.f32.xlu0 %v998_v52 }
 0xd51   : > { %1007 = vperm.xlu1 %1973, %v3306_v27  }
 0xdc5   : > { %v982_v53 = vpop.xlane.xlu1 %981 }
 0xdc6   : > { %v979_v36 = vpop.xlane.xlu0 %978 }
 0xdc9   : > { %v985_v58 = vpop.xlane.xlu1 %984 }
 0xdca   : > { %v991_v61 = vpop.xlane.xlu0 %990 }
 0xdcd   : > { %v988_v55 = vpop.xlane.xlu1 %987 }
 0xdce   : > { %v994_v11 = vpop.xlane.xlu0 %993 }
 0xdd1   : > { %v1008_v52 = vpop.permute.xlu1 %1007 }
 0xdd2   : > { %v997_v62 = vpop.xlane.xlu0 %996  ;;  %v1010_v13 = vadd.f32 %v1008_v52, %v979_v36  ;;  %v1011_v14 = vadd.f32 %v1008_v52, %v982_v53  ;;  %v1012_v15 = vadd.f32 %v1008_v52, %v985_v58  ;;  %v1014_v17 = vadd.f32 %v1008_v52, %v991_v61 }
 0xdd3   : > { %v1016_v16 = vadd.f32 %v1008_v52, %v997_v62  ;;  %v1015_v18 = vadd.f32 %v1008_v52, %v994_v11  ;;  %v1013_v63 = vadd.f32 %v1008_v52, %v988_v55 }
 0xdd4   : > { %v1031_v21 = vrot.slane %v1010_v13, %v3123_v37  ;;  %v1036_v22 = vrot.slane %v1011_v14, %v3126_v50  ;;  %v1043_v23 = vrot.slane %v1012_v15, %v3118_v38  ;;  %v1056_v24 = vrot.slane %v1014_v17, %v3123_v37 }
 0xdd5   : > { %v1060_v53 = vrot.slane %v1015_v18, %v3126_v50  ;;  %v1065_v36 = vrot.slane %v1016_v16, %v3118_v38  ;;  %v1050_v55 = vrot.slane %v1013_v63, %v3129_v12 }
 0xdd6   : > { %v1000_v58 = vpop.xlane.xlu0 %999  ;;  %v1038_v61 = vsel %vm1037_vm5, %v1036_v22, %v1031_v21 }
 0xdd7   : > { %v1017_v11 = vadd.f32 %v1008_v52, %v1000_v58  ;;  %v1061_v2 = vsel %vm1037_vm5, %v1060_v53, %v1056_v24  ;;  %v1045_v62 = vsel %vm1044_vm6, %v1043_v23, %v1038_v61  ;;  %v3266_v23 = vsub.s32 1, %v3076_v41 }
 0xdd8   : > { %v1066_v26 = vsel %vm1044_vm6, %v1065_v36, %v1061_v2  ;;  %v1052_v27 = vsel %vm1051_vm7, %v1050_v55, %v1045_v62 }
 0xdd9   : > { %v1070_v25 = vrot.slane %v1017_v11, %v3129_v12 }
 0xddb   : > { %v1071_v28 = vsel %vm1051_vm7, %v1070_v25, %v1066_v26 }
 0xddc   : > { %v1073_v21 = vsel %vm1072_vm8, %v1071_v28, %v1052_v27 }
 0xddd   : > { %v1076_v22 = vsel %vm1075_vm9, %v1073_v21, -inf }
 0xdde   : > { %1077 = vmax.xlane.f32.xlu0 %v1076_v22 }
 0xe6b   : > { %v1078_v24 = vpop.xlane.xlu0 %1077 }
 0xe6c   : > { %v1083_v52 = vrot.slane %v1078_v24, %v3081_v57  ;;  %v1087_v53 = vrot.slane %v1078_v24, %v3266_v23 }
 0xe6e   : > { %v1090_v58 = vsub.f32 %v1010_v13, %v1083_v52  ;;  %v1091_v36 = vsub.f32 %v1011_v14, %v1083_v52  ;;  %v1094_v61 = vsub.f32 %v1014_v17, %v1087_v53  ;;  %v1095_v25 = vsub.f32 %v1015_v18, %v1087_v53 }
 0xe6f   : > { %v1092_v27 = vsub.f32 %v1012_v15, %v1083_v52  ;;  %v1096_v55 = vsub.f32 %v1016_v16, %v1087_v53  ;;  %v1093_v24 = vsub.f32 %v1013_v63, %v1083_v52  ;;  %v1097_v17 = vsub.f32 %v1017_v11, %v1087_v53 }
 0xe70   : > { %v1098_v2 = vmul.f32 1.442695, %v1090_v58  ;;  %v1100_v62 = vmul.f32 1.442695, %v1091_v36  ;;  %v1106_v26 = vmul.f32 1.442695, %v1094_v61 }
 0xe71   : > { %v1108_v28 = vmul.f32 1.442695, %v1095_v25  ;;  %v1102_v21 = vmul.f32 1.442695, %v1092_v27  ;;  %v1110_v13 = vmul.f32 1.442695, %v1096_v55 }
 0xe72   : > { %2007 = vpow2.f32 %v1098_v2  ;;  %v1104_v58 = vmul.f32 1.442695, %v1093_v24  ;;  %v1112_v15 = vmul.f32 1.442695, %v1097_v17 }
 0xe73   : > { %2009 = vpow2.f32 %v1100_v62 }
 0xe74   : > { %2011 = vpow2.f32 %v1106_v26 }
 0xe75   : > { %2013 = vpow2.f32 %v1108_v28 }
 0xe76   : > { %2015 = vpow2.f32 %v1102_v21 }
 0xe77   : > { %2017 = vpow2.f32 %v1110_v13 }
 0xe78   : > { %2019 = vpow2.f32 %v1104_v58 }
 0xe79   : > { %2021 = vpow2.f32 %v1112_v15 }
 0xe7c   : > { %v2008_v22 = vpop.eup %2007 }
 0xe7d   : > { %v2010_v29 = vpop.eup %2009  ;;  %1123 = vperm.xlu0 %1974, %v2008_v22  }
 0xe7e   : > { %1126 = vperm.xlu1 %1973, %v2010_v29   ;;  %v2012_v14 = vpop.eup %2011 }
 0xe7f   : > { %v2014_v18 = vpop.eup %2013 }
 0xe80   : > { %v2016_v36 = vpop.eup %2015 }
 0xe81   : > { %v2018_v16 = vpop.eup %2017 }
 0xe82   : > { %1135 = vperm.xlu1 %1973, %v2012_v14   ;;  %v2020_v61 = vpop.eup %2019 }
 0xe83   : > { %v2022_v2 = vpop.eup %2021 }
 0xe86   : > { %1138 = vperm.xlu1 %1973, %v2014_v18  }
 0xe8a   : > { %1129 = vperm.xlu1 %1973, %v2016_v36  }
 0xe8e   : > { %1141 = vperm.xlu1 %1973, %v2018_v16  }
 0xe92   : > { %1132 = vperm.xlu1 %1973, %v2020_v61  }
 0xe96   : > { %1144 = vperm.xlu1 %1973, %v2022_v2  }
 0xefc   : > { %v1124_v53 = vpop.permute.xlu0 %1123 }
 0xefd   : > { %v1127_v63 = vpop.permute.xlu1 %1126  ;;  %v1149_v28 = vrot.slane %v1124_v53, %v3123_v37 }
 0xefe   : > { %v1153_v27 = vrot.slane %v1127_v63, %v3126_v50 }
 0xf00   : > { %v1154_v15 = vsel %vm1037_vm5, %v1153_v27, %v1149_v28 }
 0xf01   : > { %v1136_v52 = vpop.permute.xlu1 %1135 }
 0xf02   : > { %v1168_v13 = vrot.slane %v1136_v52, %v3123_v37 }
 0xf05   : > { %v1139_v62 = vpop.permute.xlu1 %1138 }
 0xf06   : > { %v1172_v55 = vrot.slane %v1139_v62, %v3126_v50 }
 0xf08   : > { %v1173_v23 = vsel %vm1037_vm5, %v1172_v55, %v1168_v13 }
 0xf09   : > { %v1130_v25 = vpop.permute.xlu1 %1129 }
 0xf0a   : > { %v1158_v21 = vrot.slane %v1130_v25, %v3118_v38 }
 0xf0c   : > { %v1159_v63 = vsel %vm1044_vm6, %v1158_v21, %v1154_v15 }
 0xf0d   : > { %v1142_v11 = vpop.permute.xlu1 %1141 }
 0xf0e   : > { %v1177_v24 = vrot.slane %v1142_v11, %v3118_v38  ;;  %v3308_v11 = vsub.s32 1, %v3076_v41  ;;  %v1861_v41 = vpack.c.bf16 %v2912_v33, %v2910_v32 }
 0xf10   : > { %v1178_v53 = vsel %vm1044_vm6, %v1177_v24, %v1173_v23  ;;  %1862 = vmatpush3.bf16.msra.mxu1 %v1861_v41 }
 0xf11   : > { %v1133_v26 = vpop.permute.xlu1 %1132 }
 0xf12   : > { %v1163_v17 = vrot.slane %v1133_v26, %v3129_v12 }
 0xf14   : > { %v1164_v50 = vsel %vm1051_vm7, %v1163_v17, %v1159_v63 }
 0xf15   : > { %v1145_v58 = vpop.permute.xlu1 %1144 }
 0xf16   : > { %v1182_v30 = vrot.slane %v1145_v58, %v3129_v12 }
 0xf18   : > { %v1183_v62 = vsel %vm1051_vm7, %v1182_v30, %v1178_v53 }
 0xf19   : > { %v1184_v38 = vsel %vm1072_vm8, %v1183_v62, %v1164_v50 }
 0xf1a   : > { %v1186_v37 = vsel %vm1075_vm9, %v1184_v38, 0.0 }
 0xf1b   : > { %1187 = vadd.xlane.f32.xlu1 %v1186_v37 }
 0xfa8   : > { %v1188_v52 = vpop.xlane.xlu1 %1187 }
 0xfa9   : > { %v1193_v25 = vrot.slane %v1188_v52, %v3081_v57  ;;  %v1197_v12 = vrot.slane %v1188_v52, %v3308_v11 }
 0xfab   : > { %2023 = vrcp.f32 %v1193_v25 }
 0xfac   : > { %2025 = vrcp.f32 %v1197_v12 }
 0xfb5   : > { %v2024_v26 = vpop.eup %2023 }
 0xfb6   : > { %v1201_v27 = vmul.f32 %v2024_v26, %v2008_v22  ;;  %v1202_v23 = vmul.f32 %v2024_v26, %v2010_v29  ;;  %v2026_v28 = vpop.eup %2025  ;;  %v1203_v21 = vmul.f32 %v2024_v26, %v2016_v36  ;;  %v1204_v57 = vmul.f32 %v2024_v26, %v2020_v61 }
 0xfb7   : > { %v1206_v30 = vmul.f32 %v2026_v28, %v2012_v14  ;;  %v1207_v55 = vmul.f32 %v2026_v28, %v2014_v18  ;;  %v1208_v24 = vmul.f32 %v2026_v28, %v2018_v16  ;;  %v1209_v13 = vmul.f32 %v2026_v28, %v2022_v2 }
 0xfb8   : > { %1212 = vperm.xlu0 %1974, %v1201_v27   ;;  %v1864_v29 = vpack.c.bf16 %v2916_v35, %v2914_v34  ;;  %v3309_v22 = vmov 0.0|0.0  }
 0xfb9   : > { %1863 = vmatprep.subr.bf16.mxu1 %v3309_v22 }
 0xfba   : > { %1865 = vmatpush3.bf16.msra.mxu1 %v1864_v29 }
 0xfbb   : > { %1872 = vmatprep.subr.bf16.mxu1 %v3309_v22 }
 0xfbc   : > { %1217 = vperm.xlu0 %1974, %v1202_v23  }
 0xfc0   : > { %1232 = vperm.xlu0 %1974, %v1206_v30  }
 0xfc4   : > { %1237 = vperm.xlu0 %1974, %v1207_v55  }
 0xfc8   : > { %1222 = vperm.xlu0 %1974, %v1203_v21  }
 0xfcc   : > { %1242 = vperm.xlu0 %1974, %v1208_v24  }
 0xfd0   : > { %1227 = vperm.xlu0 %1974, %v1204_v57  }
 0xfd4   : > { %1247 = vperm.xlu0 %1974, %v1209_v13  }
0x1037   : > { %v1213_v14 = vpop.permute.xlu0 %1212 }
0x1038   : > { %v1250_v17 = vmul.f32 %v1213_v14, %v2852_v3 }
0x103a   : > { %v1258_v50 = vsel %vm314_vm1, %v1250_v17, 0.0 }
0x103b   : > { %v1218_v18 = vpop.permute.xlu0 %1217 }
0x103c   : > { %v1251_v2 = vmul.f32 %v1218_v18, %v2854_v4 }
0x103e   : > { %v1259_v63 = vsel %vm314_vm1, %v1251_v2, 0.0 }
0x103f   : > { %v1233_v36 = vpop.permute.xlu0 %1232  ;;  %v1260_v52 = vadd.f32 %v1259_v63, %v1258_v50  ;;  %v3310_v50 = vmov 0.0  }
0x1040   : > { %v1254_v62 = vmul.f32 %v1233_v36, %v2860_v7 }
0x1042   : > { %v1271_v27 = vsel %vm314_vm1, %v1254_v62, 0.0 }
0x1043   : > { %v1238_v16 = vpop.permute.xlu0 %1237 }
0x1044   : > { %v1255_v53 = vmul.f32 %v1238_v16, %v2862_v8 }
0x1046   : > { %v1272_v11 = vsel %vm314_vm1, %v1255_v53, 0.0 }
0x1047   : > { %v1223_v61 = vpop.permute.xlu0 %1222  ;;  %v1273_v30 = vadd.f32 %v1272_v11, %v1271_v27 }
0x1048   : > { %v1252_v58 = vmul.f32 %v1223_v61, %v2856_v5 }
0x104a   : > { %v1261_v38 = vsel %vm314_vm1, %v1252_v58, 0.0 }
0x104b   : > { %v1243_v15 = vpop.permute.xlu0 %1242  ;;  %v1262_v26 = vadd.f32 %v1261_v38, %v1260_v52 }
0x104c   : > { %v1256_v37 = vmul.f32 %v1243_v15, %v2864_v9 }
0x104e   : > { %v1274_v23 = vsel %vm314_vm1, %v1256_v37, 0.0 }
0x104f   : > { %v1228_v25 = vpop.permute.xlu0 %1227  ;;  %v1275_v57 = vadd.f32 %v1274_v23, %v1273_v30 }
0x1050   : > { %v1253_v12 = vmul.f32 %v1228_v25, %v2858_v6 }
0x1052   : > { %v1263_v28 = vsel %vm314_vm1, %v1253_v12, 0.0 }
0x1053   : > { %v1264_v55 = vadd.f32 %v1263_v28, %v1262_v26  ;;  %v1248_v21 = vpop.permute.xlu0 %1247 }
0x1054   : > { %v1257_v24 = vmul.f32 %v1248_v21, %v2866_v10 }
0x1055   : > { %v1265_v13 = vrot.slane %v1264_v55, 4 }
0x1056   : > { %v1276_v41 = vsel %vm314_vm1, %v1257_v24, 0.0 }
0x1057   : > { %v1266_v29 = vadd.f32 %v1265_v13, %v1264_v55  ;;  %v1277_v22 = vadd.f32 %v1276_v41, %v1275_v57 }
0x1059   : > { %v1267_v14 = vrot.slane %v1266_v29, 2  ;;  %v1278_v18 = vrot.slane %v1277_v22, 4 }
0x105b   : > { %v1268_v36 = vadd.f32 %v1267_v14, %v1266_v29  ;;  %v1279_v16 = vadd.f32 %v1278_v18, %v1277_v22 }
0x105d   : > { %v1280_v61 = vrot.slane %v1279_v16, 2  ;;  %v1269_v2 = vrot.slane %v1268_v36, 1 }
0x105f   : > { %v1281_v17 = vadd.f32 %v1280_v61, %v1279_v16  ;;  %v1270_v15 = vadd.f32 %v1269_v2, %v1268_v36  ;;  %v1873_v36 = vpack.c.bf16 %v2886_v20, %v2884_v19 }
0x1061   : > { %v1282_v58 = vrot.slane %v1281_v17, 1 }
0x1063   : > { %v1283_v63 = vadd.f32 %v1282_v58, %v1281_v17 }
0x1065   : > { %v1286_v53 = vsel %vm1072_vm8, %v1283_v63, %v1270_v15 }
0x1066   : > { %1780 = vmatmul.mubr.msk.f32.vlgmr.msra.gmra.mrb[2].mxu1 %vm314_vm1, %v1286_v53 }
0x1067   : > { %1797 = vmatprep.mubr.msk.f32.mxu1 %vm2498_vm3, %v3310_v50  ;;  %1875 = vmatpush3.bf16.msk.msra.mxu1 %vm1874_vm14, %v1873_v36 }
0x1139   : > { %v1355_v62 = vpop.f32.mrb[2].mxu1 }
0x113a   : > { %v1426_v38 = vadd.f32 %v3084_v46, %v1355_v62  ;;  %v1781_v37 = vpop.f32.mrb[3].mxu1 }
0x113c   : > { %v1429_v52 = vadd.f32 %v1426_v38, %v2978_v1 }
0x113e   : > { %v1431_v25 = vsel %vm1430_vm10, %v1429_v52, -inf }
0x113f   : > { %1432 = vmax.xlane.f32.xlu1 %v1431_v25 }
0x11cc   : > { %v1433_v11 = vpop.xlane.xlu1 %1432 }
0x11cd   : > { %v1434_v12 = vsub.f32 %v1429_v52, %v1433_v11 }
0x11cf   : > { %v1435_v26 = vmul.f32 1.442695, %v1434_v12 }
0x11d1   : > { %2027 = vpow2.f32 %v1435_v26 }
0x11db   : > { %v2028_v27 = vpop.eup %2027 }
0x11dc   : > { %v1437_v23 = vsel %vm1430_vm10, %v2028_v27, 0.0 }
0x11dd   : > { %1438 = vadd.xlane.f32.xlu0 %v1437_v23 }
0x126a   : > { %v1439_v28 = vpop.xlane.xlu0 %1438 }
0x126b   : > { %2029 = vrcp.f32 %v1439_v28 }
0x1275   : > { %v2030_v30 = vpop.eup %2029 }
0x1276   : > { %v1441_v46 = vmul.f32 %v2030_v30, %v2028_v27 }
0x1278   : > { %v1445_v55 = vsel %vm1430_vm10, %v1441_v46, -inf  ;;  %1444 = vst [vmem:[%s1443_s22] sm:$0x3] %v1441_v46 }
0x1279   : > { %1446 = vmax.xlane.f32.xlu1 %v1445_v55 }
0x1306   : > { %v1447_v21 = vpop.xlane.xlu1 %1446 }
0x1307   : > { %vm1448_vm11 = vcmp.ge.f32.partialorder %v1441_v46, %v1447_v21 }
0x1308   : > { %v1449_v24 = vsel %vm1448_vm11, %v3113_v59, 128 }
0x1309   : > { %v1450_v57 = vsel %vm1430_vm10, %v1449_v24, 2147483647 }
0x130a   : > { %v1452_v13 = vshra.s32 %v1450_v57, 16  ;;  %v1451_v29 = vand.u32 65535, %v1450_v57 }
0x130c   : > { %v1454_v41 = vcvt.s32.f32 %v1452_v13  ;;  %v1453_v14 = vcvt.s32.f32 %v1451_v29 }
0x130e   : > { %1455 = vmin.xlane.f32.xlu1 %v1454_v41 }
0x139b   : > { %v1456_v22 = vpop.xlane.xlu1 %1455 }
0x139c   : > { %vm1457_vm12 = vcmp.eq.f32.partialorder %v1454_v41, %v1456_v22  ;;  %v1462_v16 = vcvt.f32.s32 %v1456_v22 }
0x139d   : > { %v1458_v18 = vsel %vm1457_vm12, %v1453_v14, inf }
0x139e   : > { %1459 = vmin.xlane.f32.xlu1 %v1458_v18  ;;  %v1463_v2 = vshll.u32 %v1462_v16, 16 }
0x142b   : > { %v1460_v61 = vpop.xlane.xlu1 %1459 }
0x142c   : > { %v1461_v17 = vcvt.f32.s32 %v1460_v61 }
0x142e   : > { %v1464_v58 = vadd.s32 %v1463_v2, %v1461_v17 }
0x1430   : > { %vm1465_vm0 = vcmp.eq.s32.totalorder %v3113_v59, %v1464_v58 }
0x1431   : > { %v1611_v15 = vsel %vm1465_vm0, 1.0, %v3310_v50 }
0x1432   : > { %1798 = vmatmul.mubr.msk.f32.vlgmr.msra.gmra.mrb[4].mxu1 %vm1468_vm15, %v1611_v15 }
0x1500   :  { %617 = sbr.rel (!%p615_p2) target bundleno = 1625 (0x659), region = 160 }
0x1505   : > { %v1541_v36 = vpop.f32.mrb[4].mxu1  }
0x1506   : > { %v1799_v63 = vpop.f32.mrb[5].mxu1 }
0x1507   :  { %2394 = shalt.err (!%p2391_p7)
}
0x1508   :  { %s2395_s20 = scalar_lea.hbm %s3257_s17, 160 }
0x1509   :  { %p2396_p8 = scmp.ne.s32.totalorder %s3257_s17, %s2395_s20  ;;  %p2399_p9 = scmp.lt.u32.totalorder %s2395_s20, %s3257_s17 }
0x150b   :  { %p2401_p10 = pnand %p2399_p9, %p2396_p8 }
0x150d   :  { %2404 = shalt.err (!%p2401_p10)
}
0x150e   :  { %s2505_s7 = smov 2  }
0x150f   :  { %1556 = dma.vmem_to_hbm [thread:$0]  %s1551_s26, 160, %s3257_s17, [#allocation5], %s2495_s24, %s2495_s24, %s2505_s7  }
0x1510   :  { %2447 = dma.done.wait [#allocation5], 160  }
0x1511   :  { %2448 = vsyncadd [#allocation5], 4294967136 }
0x1512   :  { %1560 = vsyncpa [#allocation4], 1 }
0x1513   :  { %1561 = vsyncpa [#allocation7], 1 }
0x1514   :  { %1562 = vsyncpa [#allocation10], 1 }
0x1515   :  { %1563 = vsyncpa [#allocation13], 1 }
0x1516   :  { %1564 = vsyncpa [#allocation16], 1 }
0x1517   :  { %1565 = vsyncpa [#allocation19], 1 }
0x1518   :  { %1566 = vsyncpa [#allocation22], 1 }
0x1519   :  { %1567 = vsyncpa [#allocation25], 1 }
0x151a   :  { %1568 = vsyncpa [#allocation28], 1 }
0x151b   :  { %1569 = vsyncpa [#allocation5], 1 }

</bundles_post_ra>
